<compile_context>
chip_gen: v7x
topology: tpu7x:2x2x1
jax: 0.10.0
libtpu: 0.0.40
codegen_flags: <defaults>
</compile_context>

<pallas_src>
import functools

import jax
import jax.numpy as jnp
from jax import lax
from jax.experimental import pallas as pl
from jax.experimental.pallas import tpu as pltpu


def _round_up(x, m):
    return ((x + m - 1) // m) * m


def _pick_batch_tile(bp):
    """Largest of (64, 32, 16, 8) dividing bp (bp is always a multiple of 8)."""
    for c in (64, 32, 16, 8):
        if bp % c == 0:
            return c
    return bp


def _rnn_recurrence_kernel(px_ref, whh_ref, h_out_ref, h_carry, h_buf):
    """One (batch tile, sequence chunk) of the tanh RNN recurrence.

    px_ref   : (Bt, Lt, H) f32    precomputed x@W_ih + bias pre-activations
    whh_ref  : (H, H)      bf16   hidden->hidden weight (transposed)
    h_out_ref: (Bt, Lt, H) bf16   hidden states for this chunk (batch-first)
    h_carry  : (Bt, H)     f32    VMEM scratch carrying h across sequence chunks
    h_buf    : (Bt, Lt, H) f32    VMEM staging for the chunk's hidden states
    """
    # Grid is (batch tiles, sequence chunks); sequence axis is innermost, so reset
    # the carried hidden state at the first chunk of every batch tile.
    @pl.when(pl.program_id(1) == 0)
    def _init():
        h_carry[...] = jnp.zeros_like(h_carry)

    whh = whh_ref[...]                         # hoisted out of the step loop
    lt = px_ref.shape[1]

    h = h_carry[...]                           # (Bt, H) f32, lives in vregs
    for t in range(lt):                        # bounded static unroll over the chunk
        pre = px_ref[:, t, :] + jnp.dot(h.astype(jnp.bfloat16), whh,
                                        preferred_element_type=jnp.float32)
        h = jnp.tanh(pre)                      # f32 elementwise (v5e-safe)
        h_buf[:, t, :] = h
    h_carry[...] = h
    # Single dense bf16 store for the whole chunk (halves HBM writeback).
    h_out_ref[...] = h_buf[...].astype(jnp.bfloat16)


def _output_projection_kernel(h_ref, w_ref, b_ref, out_ref):
    """(Mt, H) bf16 @ (H, Vt) bf16 + b -> (Mt, Vt) f32 logits tile."""
    out_ref[...] = (
        jnp.dot(h_ref[...], w_ref[...], preferred_element_type=jnp.float32)
        + b_ref[...])


def language_model_forward(indices, lengths, params, *, l_chunk=64):
    """Forward pass matching LanguageModel.forward (nn.RNN, 1 layer, batch_first).

    indices: (B, L) int32; lengths: (B,) int32 (unused — the PyTorch forward also
    ignores it).  Returns logits of shape (B, L, V) float32.
    """
    del lengths  # PyTorch forward ignores `lengths` as well.
    emb = params["embedding"]                        # (vocab, E) f32
    wih_t = params["w_ih_t"]                         # (E, H)    f32
    whh = params["w_hh_t"].astype(jnp.bfloat16)      # (H, H)    bf16 for MXU
    b_rnn = params["b_rnn"]                          # (1, H)    f32
    wout = params["w_out_t"].astype(jnp.bfloat16)    # (H, V)    bf16 for MXU
    b_out = params["b_out"]                          # (1, V)    f32

    B, L = indices.shape
    H = whh.shape[0]
    V = wout.shape[1]

    # Per-token pre-activation table: removes the x@W_ih matmul from the serial
    # recurrence chain entirely (and keeps that term in full f32 precision).
    px_table = emb @ wih_t + b_rnn                   # (vocab, H) f32

    # Pad batch to a sublane multiple and length to a chunk multiple; padded
    # rows/steps are sliced off and cannot influence the real outputs.
    Bp = _round_up(B, 8)
    Lt = min(_round_up(max(L, 1), 16), _round_up(l_chunk, 16))
    Lp = _round_up(L, Lt)
    Bt = _pick_batch_tile(Bp)

    idx_p = jnp.pad(indices.astype(jnp.int32), ((0, Bp - B), (0, Lp - L)))
    # TODO(synk): fuse the table gather into the recurrence kernel via
    # PrefetchScalarGridSpec + per-row DMA instead of a wrapper-side jnp.take.
    px = jnp.take(px_table, idx_p, axis=0)           # (Bp, Lp, H) f32

    # --- 1) recurrence: hidden states only (pure h@Whh + tanh on the serial path) ---
    h_all = pl.pallas_call(
        _rnn_recurrence_kernel,
        out_shape=jax.ShapeDtypeStruct((Bp, Lp, H), jnp.bfloat16),
        grid_spec=pltpu.PrefetchScalarGridSpec(
            num_scalar_prefetch=0,
            grid=(Bp // Bt, Lp // Lt),
            in_specs=[
                pl.BlockSpec((Bt, Lt, H), lambda b, l: (b, l, 0)),
                pl.BlockSpec((H, H), lambda b, l: (0, 0)),
            ],
            out_specs=pl.BlockSpec((Bt, Lt, H), lambda b, l: (b, l, 0)),
            scratch_shapes=[
                pltpu.VMEM((Bt, H), jnp.float32),        # h carry across chunks
                pltpu.VMEM((Bt, Lt, H), jnp.float32),    # per-chunk h staging
            ],
        ),
        compiler_params=pltpu.CompilerParams(
            # batch tiles can be split across TCs (v7x); sequence chunks are serial.
            dimension_semantics=("parallel", "arbitrary"),
            vmem_limit_bytes=32 * 1024 * 1024,
        ),
    )(px, whh)

    # --- 2) output projection: tiled (B*L, H) @ (H, V), W_out tile kept resident ----
    M = Bp * Lp
    h_flat = h_all.reshape(M, H)                     # free reshape, batch-major rows

    # Tile picks with hardened fallback: pad M / V up to the tile multiple instead of
    # ever using a full-extent (possibly VMEM-busting) tile.
    Mt = M if M <= 512 else 512                      # M is a multiple of 8
    Mp = _round_up(M, Mt)
    Vt = min(2048, _round_up(V, 128))
    Vp = _round_up(V, Vt)

    if Mp > M:
        h_flat = jnp.pad(h_flat, ((0, Mp - M), (0, 0)))
    wout_p = jnp.pad(wout, ((0, 0), (0, Vp - V))) if Vp > V else wout
    b_out_p = jnp.pad(b_out, ((0, 0), (0, Vp - V))) if Vp > V else b_out

    logits_flat = pl.pallas_call(
        _output_projection_kernel,
        out_shape=jax.ShapeDtypeStruct((Mp, Vp), jnp.float32),
        grid_spec=pltpu.PrefetchScalarGridSpec(
            num_scalar_prefetch=0,
            # V tiles outer, M tiles inner: each (H, Vt) weight tile is DMA'd once
            # and stays VMEM-resident across the whole M sweep.
            grid=(Vp // Vt, Mp // Mt),
            in_specs=[
                pl.BlockSpec((Mt, H), lambda j, i: (i, 0)),
                pl.BlockSpec((H, Vt), lambda j, i: (0, j)),
                pl.BlockSpec((1, Vt), lambda j, i: (0, j)),
            ],
            out_specs=pl.BlockSpec((Mt, Vt), lambda j, i: (i, j)),
        ),
        compiler_params=pltpu.CompilerParams(
            dimension_semantics=("parallel", "parallel"),   # megacore-splittable
            # Tiles are sized so double-buffered blocks fit v7x's 64 MiB VMEM too.
            vmem_limit_bytes=48 * 1024 * 1024,
        ),
    )(h_flat, wout_p, b_out_p)

    # Batch-first already; drop padding (cheap slices + free reshape).
    return logits_flat[:M, :V].reshape(Bp, Lp, V)[:B, :L, :]


def init_params(key, vocab_size, embed_size, hidden_size, pad_id):
    ks = jax.random.split(key, 6)
    emb = 0.1 * jax.random.normal(ks[0], (vocab_size, embed_size), jnp.float32)
    emb = emb.at[pad_id].set(0.0)                    # padding_idx row is zero
    w_ih = 0.1 * jax.random.normal(ks[1], (hidden_size, embed_size), jnp.float32)
    w_hh = 0.1 * jax.random.normal(ks[2], (hidden_size, hidden_size), jnp.float32)
    b_ih = 0.1 * jax.random.normal(ks[3], (hidden_size,), jnp.float32)
    b_hh = 0.1 * jax.random.normal(ks[4], (hidden_size,), jnp.float32)
    w_out = 0.1 * jax.random.normal(ks[5], (vocab_size, hidden_size), jnp.float32)
    b_out = jnp.zeros((vocab_size,), jnp.float32)
    return {
        "embedding": emb,
        "w_ih_t": w_ih.T,                            # (E, H)
        "w_hh_t": w_hh.T,                            # (H, H)
        "b_rnn": (b_ih + b_hh).reshape(1, -1),       # (1, H)
        "w_out_t": w_out.T,                          # (H, V)
        "b_out": b_out.reshape(1, -1),               # (1, V)
    }


def reference_forward(indices, params):
    """Pure-JAX f32 reference (lax.scan) for the correctness check."""
    x = jnp.take(params["embedding"], indices, axis=0)       # (B, L, E)
    x_tm = jnp.transpose(x, (1, 0, 2))                       # (L, B, E)
    B = indices.shape[0]
    H = params["w_hh_t"].shape[0]

    def step(h, x_t):
        h_new = jnp.tanh(x_t @ params["w_ih_t"] + h @ params["w_hh_t"]
                         + params["b_rnn"])
        logit = h_new @ params["w_out_t"] + params["b_out"]
        return h_new, logit

    _, logits_tm = lax.scan(step, jnp.zeros((B, H), jnp.float32), x_tm)
    return jnp.transpose(logits_tm, (1, 0, 2))


if __name__ == "__main__":
    B, L = 2, 8
    # The module's Linear maps embed_size -> vocab, applied to RNN outputs, which
    # requires embed_size == hidden_size (as in the defaults); small lane-aligned sizes.
    VOCAB, EMBED, HIDDEN = 256, 128, 128
    PAD_ID = 0

    key = jax.random.PRNGKey(0)
    k_params, k_idx, k_len = jax.random.split(key, 3)

    params = init_params(k_params, VOCAB, EMBED, HIDDEN, PAD_ID)
    indices = jax.random.randint(k_idx, (B, L), 0, VOCAB, dtype=jnp.int32)
    lengths = jax.random.randint(k_len, (B,), 1, L + 1, dtype=jnp.int32)

    fwd = jax.jit(functools.partial(language_model_forward, params=params))
    logits = jax.block_until_ready(fwd(indices, lengths))

    ref = reference_forward(indices, params)
    assert logits.shape == (B, L, VOCAB), logits.shape
    # Tolerance covers bf16 MXU weights + bf16 hidden-state storage vs. f32 reference.
    max_err = float(jnp.max(jnp.abs(logits - ref)))
    assert max_err < 3e-2, f"mismatch vs reference: max abs err {max_err}"

    print("KERNEL_OK")
</pallas_src>

<mosaic_0001>
module attributes {stable_mosaic.version = 11 : i64} {
  func.func @_rnn_recurrence_kernel(%arg0: i32, %arg1: i32, %arg2: memref<8x16x128xf32, #tpu.memory_space<vmem>>, %arg3: memref<128x128xbf16, #tpu.memory_space<vmem>>, %arg4: memref<8x16x128xbf16, #tpu.memory_space<vmem>>, %arg5: memref<8x128xf32, #tpu.memory_space<vmem>>, %arg6: memref<8x16x128xf32, #tpu.memory_space<vmem>>) attributes {dimension_semantics = [#tpu.dimension_semantics<parallel>, #tpu.dimension_semantics<arbitrary>], iteration_bounds = array<i64: 1, 1>, scalar_prefetch = 0 : i64, scratch_operands = 2 : i64, tpu.core_type = #tpu.core_type<tc>, window_params = [{transform_indices = @transform_0, window_bounds = array<i64: 8, 16, 128>}, {pipeline_mode = #tpu.pipeline_mode<synchronous>, transform_indices = @transform_1, window_bounds = array<i64: 128, 128>}, {transform_indices = @transform_2, window_bounds = array<i64: 8, 16, 128>}]} {
    %c0_i32 = arith.constant 0 : i32
    %0 = arith.cmpi eq, %arg1, %c0_i32 : i32
    %1 = arith.extui %0 : i1 to i32
    %c0_i32_0 = arith.constant 0 : i32
    %2 = arith.cmpi ne, %1, %c0_i32_0 : i32
    scf.if %2 {
      %cst_108 = arith.constant 0.000000e+00 : f32
      %153 = vector.broadcast %cst_108 : f32 to vector<8x128xf32>
      %c0_109 = arith.constant 0 : index
      %c0_110 = arith.constant 0 : index
      %154 = vector.load %arg5[%c0_109, %c0_110] : memref<8x128xf32, #tpu.memory_space<vmem>>, vector<8x128xf32>
      tpu.vector_store %arg5[%c0_109, %c0_110], %153 {strides = array<i32>} : memref<8x128xf32, #tpu.memory_space<vmem>>, vector<8x128xf32>,
    } else {
    }
    %c0 = arith.constant 0 : index
    %c0_1 = arith.constant 0 : index
    %3 = vector.load %arg3[%c0, %c0_1] : memref<128x128xbf16, #tpu.memory_space<vmem>>, vector<128x128xbf16>
    %c0_2 = arith.constant 0 : index
    %c0_3 = arith.constant 0 : index
    %4 = vector.load %arg5[%c0_2, %c0_3] : memref<8x128xf32, #tpu.memory_space<vmem>>, vector<8x128xf32>
    %c0_4 = arith.constant 0 : index
    %c0_5 = arith.constant 0 : index
    %c0_6 = arith.constant 0 : index
    %5 = vector.load %arg2[%c0_4, %c0_5, %c0_6] : memref<8x16x128xf32, #tpu.memory_space<vmem>>, vector<8x1x128xf32>
    %6 = vector.shape_cast %5 : vector<8x1x128xf32> to vector<8x128xf32>
    %7 = arith.truncf %4 : vector<8x128xf32> to vector<8x128xbf16>
    %cst = arith.constant dense<0.000000e+00> : vector<8x128xf32>
    %8 = tpu.matmul %7, %3, %cst {dimension_numbers = #tpu.dot_dimension_numbers<[1], [0], [0], [1], [0, 0, 1, 1], [], []>} : vector<8x128xbf16>, vector<128x128xbf16>, vector<8x128xf32> -> vector<8x128xf32>
    %9 = arith.addf %6, %8 : vector<8x128xf32>
    %10 = math.tanh %9 : vector<8x128xf32>
    %c0_7 = arith.constant 0 : index
    %c0_8 = arith.constant 0 : index
    %c0_9 = arith.constant 0 : index
    %11 = vector.load %arg6[%c0_7, %c0_8, %c0_9] : memref<8x16x128xf32, #tpu.memory_space<vmem>>, vector<8x1x128xf32>
    %12 = vector.shape_cast %11 : vector<8x1x128xf32> to vector<8x128xf32>
    %13 = vector.shape_cast %10 : vector<8x128xf32> to vector<8x1x128xf32>
    tpu.vector_store %arg6[%c0_7, %c0_8, %c0_9], %13 {strides = array<i32>} : memref<8x16x128xf32, #tpu.memory_space<vmem>>, vector<8x1x128xf32>,
    %c0_10 = arith.constant 0 : index
    %c1 = arith.constant 1 : index
    %c0_11 = arith.constant 0 : index
    %14 = vector.load %arg2[%c0_10, %c1, %c0_11] : memref<8x16x128xf32, #tpu.memory_space<vmem>>, vector<8x1x128xf32>
    %15 = vector.shape_cast %14 : vector<8x1x128xf32> to vector<8x128xf32>
    %16 = arith.truncf %10 : vector<8x128xf32> to vector<8x128xbf16>
    %cst_12 = arith.constant dense<0.000000e+00> : vector<8x128xf32>
    %17 = tpu.matmul %16, %3, %cst_12 {dimension_numbers = #tpu.dot_dimension_numbers<[1], [0], [0], [1], [0, 0, 1, 1], [], []>} : vector<8x128xbf16>, vector<128x128xbf16>, vector<8x128xf32> -> vector<8x128xf32>
    %18 = arith.addf %15, %17 : vector<8x128xf32>
    %19 = math.tanh %18 : vector<8x128xf32>
    %c0_13 = arith.constant 0 : index
    %c1_14 = arith.constant 1 : index
    %c0_15 = arith.constant 0 : index
    %20 = vector.load %arg6[%c0_13, %c1_14, %c0_15] : memref<8x16x128xf32, #tpu.memory_space<vmem>>, vector<8x1x128xf32>
    %21 = vector.shape_cast %20 : vector<8x1x128xf32> to vector<8x128xf32>
    %22 = vector.shape_cast %19 : vector<8x128xf32> to vector<8x1x128xf32>
    tpu.vector_store %arg6[%c0_13, %c1_14, %c0_15], %22 {strides = array<i32>} : memref<8x16x128xf32, #tpu.memory_space<vmem>>, vector<8x1x128xf32>,
    %c0_16 = arith.constant 0 : index
    %c2 = arith.constant 2 : index
    %c0_17 = arith.constant 0 : index
    %23 = vector.load %arg2[%c0_16, %c2, %c0_17] : memref<8x16x128xf32, #tpu.memory_space<vmem>>, vector<8x1x128xf32>
    %24 = vector.shape_cast %23 : vector<8x1x128xf32> to vector<8x128xf32>
    %25 = arith.truncf %19 : vector<8x128xf32> to vector<8x128xbf16>
    %cst_18 = arith.constant dense<0.000000e+00> : vector<8x128xf32>
    %26 = tpu.matmul %25, %3, %cst_18 {dimension_numbers = #tpu.dot_dimension_numbers<[1], [0], [0], [1], [0, 0, 1, 1], [], []>} : vector<8x128xbf16>, vector<128x128xbf16>, vector<8x128xf32> -> vector<8x128xf32>
    %27 = arith.addf %24, %26 : vector<8x128xf32>
    %28 = math.tanh %27 : vector<8x128xf32>
    %c0_19 = arith.constant 0 : index
    %c2_20 = arith.constant 2 : index
    %c0_21 = arith.constant 0 : index
    %29 = vector.load %arg6[%c0_19, %c2_20, %c0_21] : memref<8x16x128xf32, #tpu.memory_space<vmem>>, vector<8x1x128xf32>
    %30 = vector.shape_cast %29 : vector<8x1x128xf32> to vector<8x128xf32>
    %31 = vector.shape_cast %28 : vector<8x128xf32> to vector<8x1x128xf32>
    tpu.vector_store %arg6[%c0_19, %c2_20, %c0_21], %31 {strides = array<i32>} : memref<8x16x128xf32, #tpu.memory_space<vmem>>, vector<8x1x128xf32>,
    %c0_22 = arith.constant 0 : index
    %c3 = arith.constant 3 : index
    %c0_23 = arith.constant 0 : index
    %32 = vector.load %arg2[%c0_22, %c3, %c0_23] : memref<8x16x128xf32, #tpu.memory_space<vmem>>, vector<8x1x128xf32>
    %33 = vector.shape_cast %32 : vector<8x1x128xf32> to vector<8x128xf32>
    %34 = arith.truncf %28 : vector<8x128xf32> to vector<8x128xbf16>
    %cst_24 = arith.constant dense<0.000000e+00> : vector<8x128xf32>
    %35 = tpu.matmul %34, %3, %cst_24 {dimension_numbers = #tpu.dot_dimension_numbers<[1], [0], [0], [1], [0, 0, 1, 1], [], []>} : vector<8x128xbf16>, vector<128x128xbf16>, vector<8x128xf32> -> vector<8x128xf32>
    %36 = arith.addf %33, %35 : vector<8x128xf32>
    %37 = math.tanh %36 : vector<8x128xf32>
    %c0_25 = arith.constant 0 : index
    %c3_26 = arith.constant 3 : index
    %c0_27 = arith.constant 0 : index
    %38 = vector.load %arg6[%c0_25, %c3_26, %c0_27] : memref<8x16x128xf32, #tpu.memory_space<vmem>>, vector<8x1x128xf32>
    %39 = vector.shape_cast %38 : vector<8x1x128xf32> to vector<8x128xf32>
    %40 = vector.shape_cast %37 : vector<8x128xf32> to vector<8x1x128xf32>
    tpu.vector_store %arg6[%c0_25, %c3_26, %c0_27], %40 {strides = array<i32>} : memref<8x16x128xf32, #tpu.memory_space<vmem>>, vector<8x1x128xf32>,
    %c0_28 = arith.constant 0 : index
    %c4 = arith.constant 4 : index
    %c0_29 = arith.constant 0 : index
    %41 = vector.load %arg2[%c0_28, %c4, %c0_29] : memref<8x16x128xf32, #tpu.memory_space<vmem>>, vector<8x1x128xf32>
    %42 = vector.shape_cast %41 : vector<8x1x128xf32> to vector<8x128xf32>
    %43 = arith.truncf %37 : vector<8x128xf32> to vector<8x128xbf16>
    %cst_30 = arith.constant dense<0.000000e+00> : vector<8x128xf32>
    %44 = tpu.matmul %43, %3, %cst_30 {dimension_numbers = #tpu.dot_dimension_numbers<[1], [0], [0], [1], [0, 0, 1, 1], [], []>} : vector<8x128xbf16>, vector<128x128xbf16>, vector<8x128xf32> -> vector<8x128xf32>
    %45 = arith.addf %42, %44 : vector<8x128xf32>
    %46 = math.tanh %45 : vector<8x128xf32>
    %c0_31 = arith.constant 0 : index
    %c4_32 = arith.constant 4 : index
    %c0_33 = arith.constant 0 : index
    %47 = vector.load %arg6[%c0_31, %c4_32, %c0_33] : memref<8x16x128xf32, #tpu.memory_space<vmem>>, vector<8x1x128xf32>
    %48 = vector.shape_cast %47 : vector<8x1x128xf32> to vector<8x128xf32>
    %49 = vector.shape_cast %46 : vector<8x128xf32> to vector<8x1x128xf32>
    tpu.vector_store %arg6[%c0_31, %c4_32, %c0_33], %49 {strides = array<i32>} : memref<8x16x128xf32, #tpu.memory_space<vmem>>, vector<8x1x128xf32>,
    %c0_34 = arith.constant 0 : index
    %c5 = arith.constant 5 : index
    %c0_35 = arith.constant 0 : index
    %50 = vector.load %arg2[%c0_34, %c5, %c0_35] : memref<8x16x128xf32, #tpu.memory_space<vmem>>, vector<8x1x128xf32>
    %51 = vector.shape_cast %50 : vector<8x1x128xf32> to vector<8x128xf32>
    %52 = arith.truncf %46 : vector<8x128xf32> to vector<8x128xbf16>
    %cst_36 = arith.constant dense<0.000000e+00> : vector<8x128xf32>
    %53 = tpu.matmul %52, %3, %cst_36 {dimension_numbers = #tpu.dot_dimension_numbers<[1], [0], [0], [1], [0, 0, 1, 1], [], []>} : vector<8x128xbf16>, vector<128x128xbf16>, vector<8x128xf32> -> vector<8x128xf32>
    %54 = arith.addf %51, %53 : vector<8x128xf32>
    %55 = math.tanh %54 : vector<8x128xf32>
    %c0_37 = arith.constant 0 : index
    %c5_38 = arith.constant 5 : index
    %c0_39 = arith.constant 0 : index
    %56 = vector.load %arg6[%c0_37, %c5_38, %c0_39] : memref<8x16x128xf32, #tpu.memory_space<vmem>>, vector<8x1x128xf32>
    %57 = vector.shape_cast %56 : vector<8x1x128xf32> to vector<8x128xf32>
    %58 = vector.shape_cast %55 : vector<8x128xf32> to vector<8x1x128xf32>
    tpu.vector_store %arg6[%c0_37, %c5_38, %c0_39], %58 {strides = array<i32>} : memref<8x16x128xf32, #tpu.memory_space<vmem>>, vector<8x1x128xf32>,
    %c0_40 = arith.constant 0 : index
    %c6 = arith.constant 6 : index
    %c0_41 = arith.constant 0 : index
    %59 = vector.load %arg2[%c0_40, %c6, %c0_41] : memref<8x16x128xf32, #tpu.memory_space<vmem>>, vector<8x1x128xf32>
    %60 = vector.shape_cast %59 : vector<8x1x128xf32> to vector<8x128xf32>
    %61 = arith.truncf %55 : vector<8x128xf32> to vector<8x128xbf16>
    %cst_42 = arith.constant dense<0.000000e+00> : vector<8x128xf32>
    %62 = tpu.matmul %61, %3, %cst_42 {dimension_numbers = #tpu.dot_dimension_numbers<[1], [0], [0], [1], [0, 0, 1, 1], [], []>} : vector<8x128xbf16>, vector<128x128xbf16>, vector<8x128xf32> -> vector<8x128xf32>
    %63 = arith.addf %60, %62 : vector<8x128xf32>
    %64 = math.tanh %63 : vector<8x128xf32>
    %c0_43 = arith.constant 0 : index
    %c6_44 = arith.constant 6 : index
    %c0_45 = arith.constant 0 : index
    %65 = vector.load %arg6[%c0_43, %c6_44, %c0_45] : memref<8x16x128xf32, #tpu.memory_space<vmem>>, vector<8x1x128xf32>
    %66 = vector.shape_cast %65 : vector<8x1x128xf32> to vector<8x128xf32>
    %67 = vector.shape_cast %64 : vector<8x128xf32> to vector<8x1x128xf32>
    tpu.vector_store %arg6[%c0_43, %c6_44, %c0_45], %67 {strides = array<i32>} : memref<8x16x128xf32, #tpu.memory_space<vmem>>, vector<8x1x128xf32>,
    %c0_46 = arith.constant 0 : index
    %c7 = arith.constant 7 : index
    %c0_47 = arith.constant 0 : index
    %68 = vector.load %arg2[%c0_46, %c7, %c0_47] : memref<8x16x128xf32, #tpu.memory_space<vmem>>, vector<8x1x128xf32>
    %69 = vector.shape_cast %68 : vector<8x1x128xf32> to vector<8x128xf32>
    %70 = arith.truncf %64 : vector<8x128xf32> to vector<8x128xbf16>
    %cst_48 = arith.constant dense<0.000000e+00> : vector<8x128xf32>
    %71 = tpu.matmul %70, %3, %cst_48 {dimension_numbers = #tpu.dot_dimension_numbers<[1], [0], [0], [1], [0, 0, 1, 1], [], []>} : vector<8x128xbf16>, vector<128x128xbf16>, vector<8x128xf32> -> vector<8x128xf32>
    %72 = arith.addf %69, %71 : vector<8x128xf32>
    %73 = math.tanh %72 : vector<8x128xf32>
    %c0_49 = arith.constant 0 : index
    %c7_50 = arith.constant 7 : index
    %c0_51 = arith.constant 0 : index
    %74 = vector.load %arg6[%c0_49, %c7_50, %c0_51] : memref<8x16x128xf32, #tpu.memory_space<vmem>>, vector<8x1x128xf32>
    %75 = vector.shape_cast %74 : vector<8x1x128xf32> to vector<8x128xf32>
    %76 = vector.shape_cast %73 : vector<8x128xf32> to vector<8x1x128xf32>
    tpu.vector_store %arg6[%c0_49, %c7_50, %c0_51], %76 {strides = array<i32>} : memref<8x16x128xf32, #tpu.memory_space<vmem>>, vector<8x1x128xf32>,
    %c0_52 = arith.constant 0 : index
    %c8 = arith.constant 8 : index
    %c0_53 = arith.constant 0 : index
    %77 = vector.load %arg2[%c0_52, %c8, %c0_53] : memref<8x16x128xf32, #tpu.memory_space<vmem>>, vector<8x1x128xf32>
    %78 = vector.shape_cast %77 : vector<8x1x128xf32> to vector<8x128xf32>
    %79 = arith.truncf %73 : vector<8x128xf32> to vector<8x128xbf16>
    %cst_54 = arith.constant dense<0.000000e+00> : vector<8x128xf32>
    %80 = tpu.matmul %79, %3, %cst_54 {dimension_numbers = #tpu.dot_dimension_numbers<[1], [0], [0], [1], [0, 0, 1, 1], [], []>} : vector<8x128xbf16>, vector<128x128xbf16>, vector<8x128xf32> -> vector<8x128xf32>
    %81 = arith.addf %78, %80 : vector<8x128xf32>
    %82 = math.tanh %81 : vector<8x128xf32>
    %c0_55 = arith.constant 0 : index
    %c8_56 = arith.constant 8 : index
    %c0_57 = arith.constant 0 : index
    %83 = vector.load %arg6[%c0_55, %c8_56, %c0_57] : memref<8x16x128xf32, #tpu.memory_space<vmem>>, vector<8x1x128xf32>
    %84 = vector.shape_cast %83 : vector<8x1x128xf32> to vector<8x128xf32>
    %85 = vector.shape_cast %82 : vector<8x128xf32> to vector<8x1x128xf32>
    tpu.vector_store %arg6[%c0_55, %c8_56, %c0_57], %85 {strides = array<i32>} : memref<8x16x128xf32, #tpu.memory_space<vmem>>, vector<8x1x128xf32>,
    %c0_58 = arith.constant 0 : index
    %c9 = arith.constant 9 : index
    %c0_59 = arith.constant 0 : index
    %86 = vector.load %arg2[%c0_58, %c9, %c0_59] : memref<8x16x128xf32, #tpu.memory_space<vmem>>, vector<8x1x128xf32>
    %87 = vector.shape_cast %86 : vector<8x1x128xf32> to vector<8x128xf32>
    %88 = arith.truncf %82 : vector<8x128xf32> to vector<8x128xbf16>
    %cst_60 = arith.constant dense<0.000000e+00> : vector<8x128xf32>
    %89 = tpu.matmul %88, %3, %cst_60 {dimension_numbers = #tpu.dot_dimension_numbers<[1], [0], [0], [1], [0, 0, 1, 1], [], []>} : vector<8x128xbf16>, vector<128x128xbf16>, vector<8x128xf32> -> vector<8x128xf32>
    %90 = arith.addf %87, %89 : vector<8x128xf32>
    %91 = math.tanh %90 : vector<8x128xf32>
    %c0_61 = arith.constant 0 : index
    %c9_62 = arith.constant 9 : index
    %c0_63 = arith.constant 0 : index
    %92 = vector.load %arg6[%c0_61, %c9_62, %c0_63] : memref<8x16x128xf32, #tpu.memory_space<vmem>>, vector<8x1x128xf32>
    %93 = vector.shape_cast %92 : vector<8x1x128xf32> to vector<8x128xf32>
    %94 = vector.shape_cast %91 : vector<8x128xf32> to vector<8x1x128xf32>
    tpu.vector_store %arg6[%c0_61, %c9_62, %c0_63], %94 {strides = array<i32>} : memref<8x16x128xf32, #tpu.memory_space<vmem>>, vector<8x1x128xf32>,
    %c0_64 = arith.constant 0 : index
    %c10 = arith.constant 10 : index
    %c0_65 = arith.constant 0 : index
    %95 = vector.load %arg2[%c0_64, %c10, %c0_65] : memref<8x16x128xf32, #tpu.memory_space<vmem>>, vector<8x1x128xf32>
    %96 = vector.shape_cast %95 : vector<8x1x128xf32> to vector<8x128xf32>
    %97 = arith.truncf %91 : vector<8x128xf32> to vector<8x128xbf16>
    %cst_66 = arith.constant dense<0.000000e+00> : vector<8x128xf32>
    %98 = tpu.matmul %97, %3, %cst_66 {dimension_numbers = #tpu.dot_dimension_numbers<[1], [0], [0], [1], [0, 0, 1, 1], [], []>} : vector<8x128xbf16>, vector<128x128xbf16>, vector<8x128xf32> -> vector<8x128xf32>
    %99 = arith.addf %96, %98 : vector<8x128xf32>
    %100 = math.tanh %99 : vector<8x128xf32>
    %c0_67 = arith.constant 0 : index
    %c10_68 = arith.constant 10 : index
    %c0_69 = arith.constant 0 : index
    %101 = vector.load %arg6[%c0_67, %c10_68, %c0_69] : memref<8x16x128xf32, #tpu.memory_space<vmem>>, vector<8x1x128xf32>
    %102 = vector.shape_cast %101 : vector<8x1x128xf32> to vector<8x128xf32>
    %103 = vector.shape_cast %100 : vector<8x128xf32> to vector<8x1x128xf32>
    tpu.vector_store %arg6[%c0_67, %c10_68, %c0_69], %103 {strides = array<i32>} : memref<8x16x128xf32, #tpu.memory_space<vmem>>, vector<8x1x128xf32>,
    %c0_70 = arith.constant 0 : index
    %c11 = arith.constant 11 : index
    %c0_71 = arith.constant 0 : index
    %104 = vector.load %arg2[%c0_70, %c11, %c0_71] : memref<8x16x128xf32, #tpu.memory_space<vmem>>, vector<8x1x128xf32>
    %105 = vector.shape_cast %104 : vector<8x1x128xf32> to vector<8x128xf32>
    %106 = arith.truncf %100 : vector<8x128xf32> to vector<8x128xbf16>
    %cst_72 = arith.constant dense<0.000000e+00> : vector<8x128xf32>
    %107 = tpu.matmul %106, %3, %cst_72 {dimension_numbers = #tpu.dot_dimension_numbers<[1], [0], [0], [1], [0, 0, 1, 1], [], []>} : vector<8x128xbf16>, vector<128x128xbf16>, vector<8x128xf32> -> vector<8x128xf32>
    %108 = arith.addf %105, %107 : vector<8x128xf32>
    %109 = math.tanh %108 : vector<8x128xf32>
    %c0_73 = arith.constant 0 : index
    %c11_74 = arith.constant 11 : index
    %c0_75 = arith.constant 0 : index
    %110 = vector.load %arg6[%c0_73, %c11_74, %c0_75] : memref<8x16x128xf32, #tpu.memory_space<vmem>>, vector<8x1x128xf32>
    %111 = vector.shape_cast %110 : vector<8x1x128xf32> to vector<8x128xf32>
    %112 = vector.shape_cast %109 : vector<8x128xf32> to vector<8x1x128xf32>
    tpu.vector_store %arg6[%c0_73, %c11_74, %c0_75], %112 {strides = array<i32>} : memref<8x16x128xf32, #tpu.memory_space<vmem>>, vector<8x1x128xf32>,
    %c0_76 = arith.constant 0 : index
    %c12 = arith.constant 12 : index
    %c0_77 = arith.constant 0 : index
    %113 = vector.load %arg2[%c0_76, %c12, %c0_77] : memref<8x16x128xf32, #tpu.memory_space<vmem>>, vector<8x1x128xf32>
    %114 = vector.shape_cast %113 : vector<8x1x128xf32> to vector<8x128xf32>
    %115 = arith.truncf %109 : vector<8x128xf32> to vector<8x128xbf16>
    %cst_78 = arith.constant dense<0.000000e+00> : vector<8x128xf32>
    %116 = tpu.matmul %115, %3, %cst_78 {dimension_numbers = #tpu.dot_dimension_numbers<[1], [0], [0], [1], [0, 0, 1, 1], [], []>} : vector<8x128xbf16>, vector<128x128xbf16>, vector<8x128xf32> -> vector<8x128xf32>
    %117 = arith.addf %114, %116 : vector<8x128xf32>
    %118 = math.tanh %117 : vector<8x128xf32>
    %c0_79 = arith.constant 0 : index
    %c12_80 = arith.constant 12 : index
    %c0_81 = arith.constant 0 : index
    %119 = vector.load %arg6[%c0_79, %c12_80, %c0_81] : memref<8x16x128xf32, #tpu.memory_space<vmem>>, vector<8x1x128xf32>
    %120 = vector.shape_cast %119 : vector<8x1x128xf32> to vector<8x128xf32>
    %121 = vector.shape_cast %118 : vector<8x128xf32> to vector<8x1x128xf32>
    tpu.vector_store %arg6[%c0_79, %c12_80, %c0_81], %121 {strides = array<i32>} : memref<8x16x128xf32, #tpu.memory_space<vmem>>, vector<8x1x128xf32>,
    %c0_82 = arith.constant 0 : index
    %c13 = arith.constant 13 : index
    %c0_83 = arith.constant 0 : index
    %122 = vector.load %arg2[%c0_82, %c13, %c0_83] : memref<8x16x128xf32, #tpu.memory_space<vmem>>, vector<8x1x128xf32>
    %123 = vector.shape_cast %122 : vector<8x1x128xf32> to vector<8x128xf32>
    %124 = arith.truncf %118 : vector<8x128xf32> to vector<8x128xbf16>
    %cst_84 = arith.constant dense<0.000000e+00> : vector<8x128xf32>
    %125 = tpu.matmul %124, %3, %cst_84 {dimension_numbers = #tpu.dot_dimension_numbers<[1], [0], [0], [1], [0, 0, 1, 1], [], []>} : vector<8x128xbf16>, vector<128x128xbf16>, vector<8x128xf32> -> vector<8x128xf32>
    %126 = arith.addf %123, %125 : vector<8x128xf32>
    %127 = math.tanh %126 : vector<8x128xf32>
    %c0_85 = arith.constant 0 : index
    %c13_86 = arith.constant 13 : index
    %c0_87 = arith.constant 0 : index
    %128 = vector.load %arg6[%c0_85, %c13_86, %c0_87] : memref<8x16x128xf32, #tpu.memory_space<vmem>>, vector<8x1x128xf32>
    %129 = vector.shape_cast %128 : vector<8x1x128xf32> to vector<8x128xf32>
    %130 = vector.shape_cast %127 : vector<8x128xf32> to vector<8x1x128xf32>
    tpu.vector_store %arg6[%c0_85, %c13_86, %c0_87], %130 {strides = array<i32>} : memref<8x16x128xf32, #tpu.memory_space<vmem>>, vector<8x1x128xf32>,
    %c0_88 = arith.constant 0 : index
    %c14 = arith.constant 14 : index
    %c0_89 = arith.constant 0 : index
    %131 = vector.load %arg2[%c0_88, %c14, %c0_89] : memref<8x16x128xf32, #tpu.memory_space<vmem>>, vector<8x1x128xf32>
    %132 = vector.shape_cast %131 : vector<8x1x128xf32> to vector<8x128xf32>
    %133 = arith.truncf %127 : vector<8x128xf32> to vector<8x128xbf16>
    %cst_90 = arith.constant dense<0.000000e+00> : vector<8x128xf32>
    %134 = tpu.matmul %133, %3, %cst_90 {dimension_numbers = #tpu.dot_dimension_numbers<[1], [0], [0], [1], [0, 0, 1, 1], [], []>} : vector<8x128xbf16>, vector<128x128xbf16>, vector<8x128xf32> -> vector<8x128xf32>
    %135 = arith.addf %132, %134 : vector<8x128xf32>
    %136 = math.tanh %135 : vector<8x128xf32>
    %c0_91 = arith.constant 0 : index
    %c14_92 = arith.constant 14 : index
    %c0_93 = arith.constant 0 : index
    %137 = vector.load %arg6[%c0_91, %c14_92, %c0_93] : memref<8x16x128xf32, #tpu.memory_space<vmem>>, vector<8x1x128xf32>
    %138 = vector.shape_cast %137 : vector<8x1x128xf32> to vector<8x128xf32>
    %139 = vector.shape_cast %136 : vector<8x128xf32> to vector<8x1x128xf32>
    tpu.vector_store %arg6[%c0_91, %c14_92, %c0_93], %139 {strides = array<i32>} : memref<8x16x128xf32, #tpu.memory_space<vmem>>, vector<8x1x128xf32>,
    %c0_94 = arith.constant 0 : index
    %c15 = arith.constant 15 : index
    %c0_95 = arith.constant 0 : index
    %140 = vector.load %arg2[%c0_94, %c15, %c0_95] : memref<8x16x128xf32, #tpu.memory_space<vmem>>, vector<8x1x128xf32>
    %141 = vector.shape_cast %140 : vector<8x1x128xf32> to vector<8x128xf32>
    %142 = arith.truncf %136 : vector<8x128xf32> to vector<8x128xbf16>
    %cst_96 = arith.constant dense<0.000000e+00> : vector<8x128xf32>
    %143 = tpu.matmul %142, %3, %cst_96 {dimension_numbers = #tpu.dot_dimension_numbers<[1], [0], [0], [1], [0, 0, 1, 1], [], []>} : vector<8x128xbf16>, vector<128x128xbf16>, vector<8x128xf32> -> vector<8x128xf32>
    %144 = arith.addf %141, %143 : vector<8x128xf32>
    %145 = math.tanh %144 : vector<8x128xf32>
    %c0_97 = arith.constant 0 : index
    %c15_98 = arith.constant 15 : index
    %c0_99 = arith.constant 0 : index
    %146 = vector.load %arg6[%c0_97, %c15_98, %c0_99] : memref<8x16x128xf32, #tpu.memory_space<vmem>>, vector<8x1x128xf32>
    %147 = vector.shape_cast %146 : vector<8x1x128xf32> to vector<8x128xf32>
    %148 = vector.shape_cast %145 : vector<8x128xf32> to vector<8x1x128xf32>
    tpu.vector_store %arg6[%c0_97, %c15_98, %c0_99], %148 {strides = array<i32>} : memref<8x16x128xf32, #tpu.memory_space<vmem>>, vector<8x1x128xf32>,
    %c0_100 = arith.constant 0 : index
    %c0_101 = arith.constant 0 : index
    %149 = vector.load %arg5[%c0_100, %c0_101] : memref<8x128xf32, #tpu.memory_space<vmem>>, vector<8x128xf32>
    tpu.vector_store %arg5[%c0_100, %c0_101], %145 {strides = array<i32>} : memref<8x128xf32, #tpu.memory_space<vmem>>, vector<8x128xf32>,
    %c0_102 = arith.constant 0 : index
    %c0_103 = arith.constant 0 : index
    %c0_104 = arith.constant 0 : index
    %150 = vector.load %arg6[%c0_102, %c0_103, %c0_104] : memref<8x16x128xf32, #tpu.memory_space<vmem>>, vector<8x16x128xf32>
    %151 = arith.truncf %150 : vector<8x16x128xf32> to vector<8x16x128xbf16>
    %c0_105 = arith.constant 0 : index
    %c0_106 = arith.constant 0 : index
    %c0_107 = arith.constant 0 : index
    %152 = vector.load %arg4[%c0_105, %c0_106, %c0_107] : memref<8x16x128xbf16, #tpu.memory_space<vmem>>, vector<8x16x128xbf16>
    tpu.vector_store %arg4[%c0_105, %c0_106, %c0_107], %151 {strides = array<i32>} : memref<8x16x128xbf16, #tpu.memory_space<vmem>>, vector<8x16x128xbf16>,
    return
  }
  func.func @transform_0(%arg0: i32, %arg1: i32) -> (i32, i32, i32) {
    %c0_i32 = arith.constant 0 : i32
    %c0_i32_0 = arith.constant 0 : i32
    return %arg0, %arg1, %c0_i32 : i32, i32, i32
  }
  func.func @transform_1(%arg0: i32, %arg1: i32) -> (i32, i32) {
    %c0_i32 = arith.constant 0 : i32
    %c0_i32_0 = arith.constant 0 : i32
    %c0_i32_1 = arith.constant 0 : i32
    return %c0_i32, %c0_i32_0 : i32, i32
  }
  func.func @transform_2(%arg0: i32, %arg1: i32) -> (i32, i32, i32) {
    %c0_i32 = arith.constant 0 : i32
    %c0_i32_0 = arith.constant 0 : i32
    return %arg0, %arg1, %c0_i32 : i32, i32, i32
  }
}

module attributes {stable_mosaic.version = 11 : i64} {
  func.func @_output_projection_kernel(%arg0: i32, %arg1: i32, %arg2: memref<128x128xbf16, #tpu.memory_space<vmem>>, %arg3: memref<128x256xbf16, #tpu.memory_space<vmem>>, %arg4: memref<1x256xf32, #tpu.memory_space<vmem>>, %arg5: memref<128x256xf32, #tpu.memory_space<vmem>>) attributes {dimension_semantics = [#tpu.dimension_semantics<parallel>, #tpu.dimension_semantics<parallel>], iteration_bounds = array<i64: 1, 1>, scalar_prefetch = 0 : i64, scratch_operands = 0 : i64, tpu.core_type = #tpu.core_type<tc>, window_params = [{transform_indices = @transform_0, window_bounds = array<i64: 128, 128>}, {transform_indices = @transform_1, window_bounds = array<i64: 128, 256>}, {transform_indices = @transform_2, window_bounds = array<i64: 1, 256>}, {transform_indices = @transform_3, window_bounds = array<i64: 128, 256>}]} {
    %c0 = arith.constant 0 : index
    %c0_0 = arith.constant 0 : index
    %0 = vector.load %arg2[%c0, %c0_0] : memref<128x128xbf16, #tpu.memory_space<vmem>>, vector<128x128xbf16>
    %c0_1 = arith.constant 0 : index
    %c0_2 = arith.constant 0 : index
    %1 = vector.load %arg3[%c0_1, %c0_2] : memref<128x256xbf16, #tpu.memory_space<vmem>>, vector<128x256xbf16>
    %cst = arith.constant dense<0.000000e+00> : vector<128x256xf32>
    %2 = tpu.matmul %0, %1, %cst {dimension_numbers = #tpu.dot_dimension_numbers<[1], [0], [0], [1], [0, 0, 1, 1], [], []>} : vector<128x128xbf16>, vector<128x256xbf16>, vector<128x256xf32> -> vector<128x256xf32>
    %c0_3 = arith.constant 0 : index
    %c0_4 = arith.constant 0 : index
    %3 = vector.load %arg4[%c0_3, %c0_4] : memref<1x256xf32, #tpu.memory_space<vmem>>, vector<1x256xf32>
    %4 = vector.broadcast %3 : vector<1x256xf32> to vector<128x256xf32>
    %5 = arith.addf %2, %4 : vector<128x256xf32>
    %c0_5 = arith.constant 0 : index
    %c0_6 = arith.constant 0 : index
    %6 = vector.load %arg5[%c0_5, %c0_6] : memref<128x256xf32, #tpu.memory_space<vmem>>, vector<128x256xf32>
    tpu.vector_store %arg5[%c0_5, %c0_6], %5 {strides = array<i32>} : memref<128x256xf32, #tpu.memory_space<vmem>>, vector<128x256xf32>,
    return
  }
  func.func @transform_0(%arg0: i32, %arg1: i32) -> (i32, i32) {
    %c0_i32 = arith.constant 0 : i32
    %c0_i32_0 = arith.constant 0 : i32
    return %arg1, %c0_i32 : i32, i32
  }
  func.func @transform_1(%arg0: i32, %arg1: i32) -> (i32, i32) {
    %c0_i32 = arith.constant 0 : i32
    %c0_i32_0 = arith.constant 0 : i32
    return %c0_i32, %arg0 : i32, i32
  }
  func.func @transform_2(%arg0: i32, %arg1: i32) -> (i32, i32) {
    %c0_i32 = arith.constant 0 : i32
    %c0_i32_0 = arith.constant 0 : i32
    return %c0_i32, %arg0 : i32, i32
  }
  func.func @transform_3(%arg0: i32, %arg1: i32) -> (i32, i32) {
    %c0_i32 = arith.constant 0 : i32
    return %arg1, %arg0 : i32, i32
  }
}

</mosaic_0001>

<bundles_post_ra>
// kernel: language_model_forward.3
= control target key start
LH: loop header
LB: loop body
LE: loop exit
PB: predicated region body
PF: predicated region fallthrough
CT: control target
= control target key end

     0   :  { %v409_v1 = vmov 0   ;;  %v49_v25 = vlaneseq  ;;  %s645_s1 = inlined_call_operand.vmem [shape: bf16[128,256], index: 1, kind: input, shape index: {}]   ;;  %s646_s0 = inlined_call_operand.vmem [shape: bf16[128,128], index: 0, kind: input, shape index: {}]   ;;  %s647_s2 = inlined_call_operand.vmem [shape: f32[1,256], index: 2, kind: input, shape index: {}]   ;;  %s648_s3 = inlined_call_operand.vmem [shape: f32[128,256], index: 3, kind: output, shape index: {}]  }
   0x1   :  { %v377_v0 = vld [vmem:[%s645_s1 + $0x4] ss:$8 sps:$4 sm:$0xff]   ;;  %219 = vmatprep.mubr.bf16.mxu0 %v409_v1  ;;  %259 = vmatprep.mubr.bf16.mxu1 %v409_v1  ;;  %v379_v2 = vld [vmem:[%s645_s1] ss:$8 sps:$4 sm:$0xff]   ;;  %v380_v3 = vld [vmem:[%s645_s1 + $0x14] ss:$8 sps:$4 sm:$0xff]  }
   0x2   :  { %187 = vmatprep.subr.bf16.mxu0 %v377_v0  ;;  %360 = vmatprep.subr.bf16.mxu1 %v377_v0  ;;  %v382_v4 = vld [vmem:[%s645_s1 + $0x10] ss:$8 sps:$4 sm:$0xff]   ;;  %v383_v5 = vld [vmem:[%s645_s1 + $0x24] ss:$8 sps:$4 sm:$0xff]   ;;  %v385_v6 = vld [vmem:[%s645_s1 + $0x20] ss:$8 sps:$4 sm:$0xff]  }
   0x3   :  { %188 = vmatpush1.bf16.msra.mxu0 %v379_v2  ;;  %368 = vmatpush1.bf16.msra.mxu1 %v379_v2  ;;  %v386_v7 = vld [vmem:[%s645_s1 + $0x34] ss:$8 sps:$4 sm:$0xff]   ;;  %v388_v8 = vld [vmem:[%s645_s1 + $0x30] ss:$8 sps:$4 sm:$0xff]   ;;  %v389_v9 = vld [vmem:[%s645_s1 + $0x44] ss:$8 sps:$4 sm:$0xff]  }
   0x4   :  { %189 = vmatprep.subr.bf16.mxu0 %v380_v3  ;;  %361 = vmatprep.subr.bf16.mxu1 %v380_v3  ;;  %v391_v10 = vld [vmem:[%s645_s1 + $0x40] ss:$8 sps:$4 sm:$0xff]   ;;  %v392_v11 = vld [vmem:[%s645_s1 + $0x54] ss:$8 sps:$4 sm:$0xff]   ;;  %v394_v12 = vld [vmem:[%s645_s1 + $0x50] ss:$8 sps:$4 sm:$0xff]  }
   0x5   :  { %v395_v13 = vld [vmem:[%s645_s1 + $0x64] ss:$8 sps:$4 sm:$0xff]   ;;  %v397_v14 = vld [vmem:[%s645_s1 + $0x60] ss:$8 sps:$4 sm:$0xff]   ;;  %v398_v15 = vld [vmem:[%s645_s1 + $0x74] ss:$8 sps:$4 sm:$0xff]  }
   0x6   :  { %v400_v16 = vld [vmem:[%s645_s1 + $0x70] ss:$8 sps:$4 sm:$0xff]   ;;  %v401_v17 = vld [vmem:[%s646_s0] sm:$0xff]   ;;  %v403_v19 = vld [vmem:[%s646_s0 + $0x8] sm:$0xff]   ;;  %v50_v26 = vshrl.u32 %v49_v25, 7 }
   0x7   :  { %190 = vmatpush1.bf16.msra.mxu0 %v382_v4  ;;  %369 = vmatpush1.bf16.msra.mxu1 %v382_v4  ;;  %v402_v18 = vld [vmem:[%s646_s0 + $0x20] sm:$0xff]   ;;  %v404_v20 = vld [vmem:[%s646_s0 + $0x28] sm:$0xff]   ;;  %v405_v21 = vld [vmem:[%s646_s0 + $0x10] sm:$0xff]  }
   0x8   :  { %191 = vmatprep.subr.bf16.mxu0 %v383_v5  ;;  %362 = vmatprep.subr.bf16.mxu1 %v383_v5  ;;  %v406_v22 = vld [vmem:[%s646_s0 + $0x30] sm:$0xff]   ;;  %v407_v23 = vld [vmem:[%s646_s0 + $0x18] sm:$0xff]   ;;  %v51_v27 = vsub.s32 0, %v50_v26  ;;  %v47_v28 = vld [vmem:[%s647_s2] sm:$0x3]  ;;  %v55_v29 = vsub.s32 1, %v50_v26 }
   0x9   :  { %v408_v24 = vld [vmem:[%s646_s0 + $0x38] sm:$0xff]  }
   0xa   :  { %v513_v30 = vrot.slane %v47_v28, %v51_v27  ;;  %v515_v31 = vrot.slane %v47_v28, %v55_v29 }
   0xb   :  { %192 = vmatpush1.bf16.msra.mxu0 %v385_v6  ;;  %370 = vmatpush1.bf16.msra.mxu1 %v385_v6 }
   0xc   :  { %193 = vmatprep.subr.bf16.mxu0 %v386_v7  ;;  %363 = vmatprep.subr.bf16.mxu1 %v386_v7 }
   0xf   :  { %194 = vmatpush1.bf16.msra.mxu0 %v388_v8  ;;  %371 = vmatpush1.bf16.msra.mxu1 %v388_v8 }
  0x10   :  { %195 = vmatprep.subr.bf16.mxu0 %v389_v9  ;;  %364 = vmatprep.subr.bf16.mxu1 %v389_v9 }
  0x13   :  { %196 = vmatpush1.bf16.msra.mxu0 %v391_v10  ;;  %372 = vmatpush1.bf16.msra.mxu1 %v391_v10 }
  0x14   :  { %197 = vmatprep.subr.bf16.mxu0 %v392_v11  ;;  %365 = vmatprep.subr.bf16.mxu1 %v392_v11 }
  0x17   :  { %198 = vmatpush1.bf16.msra.mxu0 %v394_v12  ;;  %373 = vmatpush1.bf16.msra.mxu1 %v394_v12 }
  0x18   :  { %199 = vmatprep.subr.bf16.mxu0 %v395_v13  ;;  %366 = vmatprep.subr.bf16.mxu1 %v395_v13 }
  0x1b   :  { %200 = vmatpush1.bf16.msra.mxu0 %v397_v14  ;;  %374 = vmatpush1.bf16.msra.mxu1 %v397_v14 }
  0x1c   :  { %201 = vmatprep.subr.bf16.mxu0 %v398_v15  ;;  %367 = vmatprep.subr.bf16.mxu1 %v398_v15 }
  0x1f   :  { %202 = vmatpush1.bf16.msra.mxu0 %v400_v16  ;;  %375 = vmatpush1.bf16.msra.mxu1 %v400_v16 }
  0x22   :  { %220 = vmatmul.mubr.bf16.vlgmr.msra.gmra.mrb[0].mxu0 %v401_v17  ;;  %260 = vmatmul.mubr.bf16.vlgmr.msra.gmra.mrb[0].mxu1 %v402_v18 }
  0x23   :  { %229 = vmatprep.mubr.bf16.mxu0 %v409_v1  ;;  %269 = vmatprep.mubr.bf16.mxu1 %v409_v1 }
  0x2a   :  { %230 = vmatmul.mubr.bf16.gmra.mrb[4].mxu0 %v403_v19  ;;  %270 = vmatmul.mubr.bf16.gmra.mrb[4].mxu1 %v404_v20 }
  0x2b   :  { %239 = vmatprep.mubr.bf16.mxu0 %v409_v1  ;;  %279 = vmatprep.mubr.bf16.mxu1 %v409_v1 }
  0x32   :  { %240 = vmatmul.mubr.bf16.gmra.mrb[8].mxu0 %v405_v21  ;;  %280 = vmatmul.mubr.bf16.gmra.mrb[8].mxu1 %v406_v22 }
  0x33   :  { %249 = vmatprep.mubr.bf16.mxu0 %v409_v1  ;;  %289 = vmatprep.mubr.bf16.mxu1 %v409_v1 }
  0x3a   :  { %250 = vmatmul.mubr.bf16.gmra.mrb[12].mxu0 %v407_v23  ;;  %290 = vmatmul.mubr.bf16.gmra.mrb[12].mxu1 %v408_v24 }
  0xf5   :  { %v221_v32 = vpop.f32.mrb[0].mxu0  ;;  %v261_v33 = vpop.f32.mrb[0].mxu1 }
  0xf6   :  { %v222_v34 = vadd.f32 %v221_v32, %v513_v30  ;;  %v262_v35 = vadd.f32 %v261_v33, %v513_v30  ;;  %v223_v36 = vpop.f32.mrb[1].mxu0  ;;  %v263_v37 = vpop.f32.mrb[1].mxu1 }
  0xf7   :  { %v224_v38 = vadd.f32 %v223_v36, %v515_v31  ;;  %v264_v39 = vadd.f32 %v263_v37, %v515_v31  ;;  %v225_v40 = vpop.f32.mrb[2].mxu0  ;;  %v265_v41 = vpop.f32.mrb[2].mxu1 }
  0xf8   :  { %300 = vst [vmem:[%s648_s3] sm:$0xff] %v222_v34  ;;  %316 = vst [vmem:[%s648_s3 + $0x80] sm:$0xff] %v262_v35  ;;  %v226_v42 = vadd.f32 %v225_v40, %v513_v30  ;;  %v266_v43 = vadd.f32 %v265_v41, %v513_v30  ;;  %v227_v44 = vpop.f32.mrb[3].mxu0  ;;  %v267_v45 = vpop.f32.mrb[3].mxu1 }
  0xf9   :  { %301 = vst [vmem:[%s648_s3 + $0x8] sm:$0xff] %v224_v38  ;;  %317 = vst [vmem:[%s648_s3 + $0x88] sm:$0xff] %v264_v39  ;;  %v228_v46 = vadd.f32 %v227_v44, %v515_v31  ;;  %v268_v47 = vadd.f32 %v267_v45, %v515_v31 }
  0xfa   :  { %302 = vst [vmem:[%s648_s3 + $0x10] sm:$0xff] %v226_v42  ;;  %318 = vst [vmem:[%s648_s3 + $0x90] sm:$0xff] %v266_v43 }
  0xfb   :  { %303 = vst [vmem:[%s648_s3 + $0x18] sm:$0xff] %v228_v46  ;;  %319 = vst [vmem:[%s648_s3 + $0x98] sm:$0xff] %v268_v47 }
  0xfd   :  { %v231_v48 = vpop.f32.mrb[4].mxu0  ;;  %v271_v49 = vpop.f32.mrb[4].mxu1 }
  0xfe   :  { %v232_v50 = vadd.f32 %v231_v48, %v513_v30  ;;  %v272_v51 = vadd.f32 %v271_v49, %v513_v30  ;;  %v233_v52 = vpop.f32.mrb[5].mxu0  ;;  %v273_v53 = vpop.f32.mrb[5].mxu1 }
  0xff   :  { %v234_v54 = vadd.f32 %v233_v52, %v515_v31  ;;  %v274_v55 = vadd.f32 %v273_v53, %v515_v31  ;;  %v235_v56 = vpop.f32.mrb[6].mxu0  ;;  %v275_v57 = vpop.f32.mrb[6].mxu1 }
 0x100   :  { %304 = vst [vmem:[%s648_s3 + $0x20] sm:$0xff] %v232_v50  ;;  %320 = vst [vmem:[%s648_s3 + $0xa0] sm:$0xff] %v272_v51  ;;  %v236_v58 = vadd.f32 %v235_v56, %v513_v30  ;;  %v276_v59 = vadd.f32 %v275_v57, %v513_v30  ;;  %v237_v60 = vpop.f32.mrb[7].mxu0  ;;  %v277_v61 = vpop.f32.mrb[7].mxu1 }
 0x101   :  { %305 = vst [vmem:[%s648_s3 + $0x28] sm:$0xff] %v234_v54  ;;  %321 = vst [vmem:[%s648_s3 + $0xa8] sm:$0xff] %v274_v55  ;;  %v238_v62 = vadd.f32 %v237_v60, %v515_v31  ;;  %v278_v63 = vadd.f32 %v277_v61, %v515_v31 }
 0x102   :  { %306 = vst [vmem:[%s648_s3 + $0x30] sm:$0xff] %v236_v58  ;;  %322 = vst [vmem:[%s648_s3 + $0xb0] sm:$0xff] %v276_v59 }
 0x103   :  { %307 = vst [vmem:[%s648_s3 + $0x38] sm:$0xff] %v238_v62  ;;  %323 = vst [vmem:[%s648_s3 + $0xb8] sm:$0xff] %v278_v63 }
 0x105   :  { %v241_v0 = vpop.f32.mrb[8].mxu0  ;;  %v281_v1 = vpop.f32.mrb[8].mxu1 }
 0x106   :  { %v242_v2 = vadd.f32 %v241_v0, %v513_v30  ;;  %v282_v3 = vadd.f32 %v281_v1, %v513_v30  ;;  %v243_v4 = vpop.f32.mrb[9].mxu0  ;;  %v283_v5 = vpop.f32.mrb[9].mxu1 }
 0x107   :  { %v244_v6 = vadd.f32 %v243_v4, %v515_v31  ;;  %v284_v7 = vadd.f32 %v283_v5, %v515_v31  ;;  %v245_v8 = vpop.f32.mrb[10].mxu0  ;;  %v285_v9 = vpop.f32.mrb[10].mxu1 }
 0x108   :  { %308 = vst [vmem:[%s648_s3 + $0x40] sm:$0xff] %v242_v2  ;;  %324 = vst [vmem:[%s648_s3 + $0xc0] sm:$0xff] %v282_v3  ;;  %v246_v10 = vadd.f32 %v245_v8, %v513_v30  ;;  %v286_v11 = vadd.f32 %v285_v9, %v513_v30  ;;  %v247_v12 = vpop.f32.mrb[11].mxu0  ;;  %v287_v13 = vpop.f32.mrb[11].mxu1 }
 0x109   :  { %309 = vst [vmem:[%s648_s3 + $0x48] sm:$0xff] %v244_v6  ;;  %325 = vst [vmem:[%s648_s3 + $0xc8] sm:$0xff] %v284_v7  ;;  %v248_v14 = vadd.f32 %v247_v12, %v515_v31  ;;  %v288_v15 = vadd.f32 %v287_v13, %v515_v31 }
 0x10a   :  { %310 = vst [vmem:[%s648_s3 + $0x50] sm:$0xff] %v246_v10  ;;  %326 = vst [vmem:[%s648_s3 + $0xd0] sm:$0xff] %v286_v11 }
 0x10b   :  { %311 = vst [vmem:[%s648_s3 + $0x58] sm:$0xff] %v248_v14  ;;  %327 = vst [vmem:[%s648_s3 + $0xd8] sm:$0xff] %v288_v15 }
 0x10d   :  { %v251_v16 = vpop.f32.mrb[12].mxu0  ;;  %v291_v17 = vpop.f32.mrb[12].mxu1 }
 0x10e   :  { %v252_v18 = vadd.f32 %v251_v16, %v513_v30  ;;  %v292_v19 = vadd.f32 %v291_v17, %v513_v30  ;;  %v253_v20 = vpop.f32.mrb[13].mxu0  ;;  %v293_v21 = vpop.f32.mrb[13].mxu1 }
 0x10f   :  { %v254_v22 = vadd.f32 %v253_v20, %v515_v31  ;;  %v294_v23 = vadd.f32 %v293_v21, %v515_v31  ;;  %v255_v24 = vpop.f32.mrb[14].mxu0  ;;  %v295_v25 = vpop.f32.mrb[14].mxu1 }
 0x110   :  { %312 = vst [vmem:[%s648_s3 + $0x60] sm:$0xff] %v252_v18  ;;  %328 = vst [vmem:[%s648_s3 + $0xe0] sm:$0xff] %v292_v19  ;;  %v256_v26 = vadd.f32 %v255_v24, %v513_v30  ;;  %v296_v27 = vadd.f32 %v295_v25, %v513_v30  ;;  %v257_v28 = vpop.f32.mrb[15].mxu0  ;;  %v297_v29 = vpop.f32.mrb[15].mxu1 }
 0x111   :  { %313 = vst [vmem:[%s648_s3 + $0x68] sm:$0xff] %v254_v22  ;;  %329 = vst [vmem:[%s648_s3 + $0xe8] sm:$0xff] %v294_v23  ;;  %v258_v32 = vadd.f32 %v257_v28, %v515_v31  ;;  %v298_v33 = vadd.f32 %v297_v29, %v515_v31 }
 0x112   :  { %314 = vst [vmem:[%s648_s3 + $0x70] sm:$0xff] %v256_v26  ;;  %330 = vst [vmem:[%s648_s3 + $0xf0] sm:$0xff] %v296_v27 }
 0x113   :  { %315 = vst [vmem:[%s648_s3 + $0x78] sm:$0xff] %v258_v32  ;;  %331 = vst [vmem:[%s648_s3 + $0xf8] sm:$0xff] %v298_v33 }

// kernel: language_model_forward.2
= control target key start
LH: loop header
LB: loop body
LE: loop exit
PB: predicated region body
PF: predicated region fallthrough
CT: control target
= control target key end

     0   :  { %v3056_v0 = vmov 0.0   ;;  %vm3057_vm0 = vmmov 0   ;;  %v3058_v9 = vmov 0.0|0.0   ;;  %vm204_vm1 = vcmask 1041409   ;;  %s3995_s1 = inlined_call_operand.vmem [shape: bf16[128,128], index: 1, kind: input, shape index: {}]   ;;  %s3996_s0 = inlined_call_operand.vmem [shape: f32[8,16,128], index: 0, kind: input, shape index: {}]   ;;  %s3997_s2 = inlined_call_operand.vmem [shape: bf16[8,16,128], index: 2, kind: output, shape index: {}]  }
   0x1   :  { %2453 = vmatprep.subr.bf16.mxu0 %v3056_v0  ;;  %v3078_v1 = vld [vmem:[%s3995_s1] sm:$0xff]   ;;  %2469 = vmatprep.mubr.msk.bf16.mxu0 %vm3057_vm0, %v3056_v0  ;;  %v3089_v2 = vld [vmem:[%s3995_s1 + $0x8] sm:$0xff]   ;;  %v3098_v3 = vld [vmem:[%s3995_s1 + $0x10] sm:$0xff]   ;;  %vm207_vm2 = vcmask 1042434   ;;  %vm210_vm3 = vcmask 1043459   ;;  %vm213_vm4 = vcmask 1044484  }
   0x2   :  { %2473 = vmatprep.subr.bf16.mxu1 %v3056_v0  ;;  %2489 = vmatprep.mubr.msk.bf16.mxu1 %vm3057_vm0, %v3056_v0  ;;  %v3107_v4 = vld [vmem:[%s3995_s1 + $0x18] sm:$0xff]   ;;  %v3116_v5 = vld [vmem:[%s3995_s1 + $0x20] sm:$0xff]   ;;  %v3125_v6 = vld [vmem:[%s3995_s1 + $0x28] sm:$0xff]   ;;  %vm216_vm5 = vcmask 1045509   ;;  %vm219_vm6 = vcmask 1046534   ;;  %vm222_vm7 = vcmask 1047559  }
   0x3   :  { %2454 = vmatpush3.bf16.msra.mxu0 %v3078_v1  ;;  %2474 = vmatpush3.bf16.msra.mxu1 %v3078_v1  ;;  %v3134_v7 = vld [vmem:[%s3995_s1 + $0x30] sm:$0xff]   ;;  %v3143_v8 = vld [vmem:[%s3995_s1 + $0x38] sm:$0xff]   ;;  %v34_v10 = vld [vmem:[%s3996_s0] sm:$0x1] }
   0x4   :  { %2455 = vmatprep.subr.bf16.mxu0 %v3056_v0  ;;  %2475 = vmatprep.subr.bf16.mxu1 %v3056_v0  ;;  %v35_v11 = vld [vmem:[%s3996_s0 + $0x10] sm:$0x1]  ;;  %v36_v12 = vld [vmem:[%s3996_s0 + $0x20] sm:$0x1] }
   0x5   :  { %v37_v13 = vld [vmem:[%s3996_s0 + $0x30] sm:$0x1]  ;;  %v38_v14 = vld [vmem:[%s3996_s0 + $0x40] sm:$0x1] }
   0x6   :  { %v39_v21 = vld [vmem:[%s3996_s0 + $0x50] sm:$0x1]  ;;  %v40_v26 = vld [vmem:[%s3996_s0 + $0x60] sm:$0x1] }
   0x7   :  { %2456 = vmatpush3.bf16.msra.mxu0 %v3089_v2  ;;  %2476 = vmatpush3.bf16.msra.mxu1 %v3089_v2  ;;  %v41_v33 = vld [vmem:[%s3996_s0 + $0x70] sm:$0x1] }
   0x8   :  { %2457 = vmatprep.subr.bf16.mxu0 %v3056_v0  ;;  %2477 = vmatprep.subr.bf16.mxu1 %v3056_v0 }
   0xb   :  { %2458 = vmatpush3.bf16.msra.mxu0 %v3098_v3  ;;  %2478 = vmatpush3.bf16.msra.mxu1 %v3098_v3 }
   0xc   :  { %2459 = vmatprep.subr.bf16.mxu0 %v3056_v0  ;;  %2479 = vmatprep.subr.bf16.mxu1 %v3056_v0 }
   0xf   :  { %2460 = vmatpush3.bf16.msra.mxu0 %v3107_v4  ;;  %2480 = vmatpush3.bf16.msra.mxu1 %v3107_v4 }
  0x10   :  { %2461 = vmatprep.subr.bf16.mxu0 %v3056_v0  ;;  %2481 = vmatprep.subr.bf16.mxu1 %v3056_v0 }
  0x13   :  { %2462 = vmatpush3.bf16.msra.mxu0 %v3116_v5  ;;  %2482 = vmatpush3.bf16.msra.mxu1 %v3116_v5 }
  0x14   :  { %2463 = vmatprep.subr.bf16.mxu0 %v3056_v0  ;;  %2483 = vmatprep.subr.bf16.mxu1 %v3056_v0 }
  0x17   :  { %2464 = vmatpush3.bf16.msra.mxu0 %v3125_v6  ;;  %2484 = vmatpush3.bf16.msra.mxu1 %v3125_v6 }
  0x18   :  { %2465 = vmatprep.subr.bf16.mxu0 %v3056_v0  ;;  %2485 = vmatprep.subr.bf16.mxu1 %v3056_v0 }
  0x1b   :  { %2466 = vmatpush3.bf16.msra.mxu0 %v3134_v7  ;;  %2486 = vmatpush3.bf16.msra.mxu1 %v3134_v7 }
  0x1c   :  { %2467 = vmatprep.subr.bf16.mxu0 %v3056_v0  ;;  %2487 = vmatprep.subr.bf16.mxu1 %v3056_v0 }
  0x1f   :  { %2468 = vmatpush3.bf16.msra.mxu0 %v3143_v8  ;;  %2488 = vmatpush3.bf16.msra.mxu1 %v3143_v8 }
  0x20   :  { %2493 = vmatprep.subr.bf16.mxu0 %v3056_v0  ;;  %2513 = vmatprep.subr.bf16.mxu1 %v3056_v0 }
  0x22   :  { %2470 = vmatmul.mubr.bf16.vlgmr.msra.gmra.mrb[0].mxu0 %v3058_v9 }
  0x23   :  { %2494 = vmatpush3.bf16.msra.mxu0 %v3078_v1  ;;  %2509 = vmatprep.mubr.msk.bf16.mxu0 %vm3057_vm0, %v3056_v0 }
  0x24   :  { %2495 = vmatprep.subr.bf16.mxu0 %v3056_v0 }
  0x27   :  { %2496 = vmatpush3.bf16.msra.mxu0 %v3089_v2 }
  0x28   :  { %2497 = vmatprep.subr.bf16.mxu0 %v3056_v0 }
  0x2b   :  { %2498 = vmatpush3.bf16.msra.mxu0 %v3098_v3 }
  0x2c   :  { %2499 = vmatprep.subr.bf16.mxu0 %v3056_v0 }
  0x2f   :  { %2500 = vmatpush3.bf16.msra.mxu0 %v3107_v4 }
  0x30   :  { %2501 = vmatprep.subr.bf16.mxu0 %v3056_v0 }
  0x33   :  { %2502 = vmatpush3.bf16.msra.mxu0 %v3116_v5 }
  0x34   :  { %2503 = vmatprep.subr.bf16.mxu0 %v3056_v0 }
  0x37   :  { %2504 = vmatpush3.bf16.msra.mxu0 %v3125_v6 }
  0x38   :  { %2505 = vmatprep.subr.bf16.mxu0 %v3056_v0 }
  0x3b   :  { %2506 = vmatpush3.bf16.msra.mxu0 %v3134_v7 }
  0x3c   :  { %2507 = vmatprep.subr.bf16.mxu0 %v3056_v0 }
  0x3f   :  { %2508 = vmatpush3.bf16.msra.mxu0 %v3143_v8 }
  0x40   :  { %2533 = vmatprep.subr.bf16.mxu0 %v3056_v0 }
  0xf5   :  { %v125_v15 = vpop.f32.mrb[0].mxu0 }
  0xf6   :  { %v132_v16 = vrot.slane %v125_v15, 1  ;;  %v133_v17 = vrot.slane %v125_v15, 2  ;;  %v134_v18 = vrot.slane %v125_v15, 3  ;;  %v135_v19 = vrot.slane %v125_v15, 4  ;;  %v2471_v20 = vpop.f32.mrb[1].mxu0 }
  0xf7   :  { %v136_v22 = vrot.slane %v125_v15, 5  ;;  %v137_v23 = vrot.slane %v125_v15, 6  ;;  %v147_v24 = vadd.f32 %v125_v15, %v34_v10  ;;  %v128_v25 = vpop.f32.mrb[2].mxu0  ;;  %v138_v27 = vrot.slane %v125_v15, 7 }
  0xf8   :  { %v148_v28 = vadd.f32 %v132_v16, %v35_v11  ;;  %v149_v29 = vadd.f32 %v133_v17, %v36_v12  ;;  %v150_v30 = vadd.f32 %v134_v18, %v37_v13  ;;  %v2472_v31 = vpop.f32.mrb[3].mxu0  ;;  %v151_v32 = vadd.f32 %v135_v19, %v38_v14  ;;  %v175_v25 = vld [vmem:[%s3996_s0 + $0x41] sm:$0x1] }
  0xf9   :  { %2784 = vtanh.f32 %v147_v24  ;;  %v152_v34 = vadd.f32 %v136_v22, %v39_v21  ;;  %v153_v35 = vadd.f32 %v137_v23, %v40_v26  ;;  %v154_v36 = vadd.f32 %v138_v27, %v41_v33  ;;  %v171_v21 = vld [vmem:[%s3996_s0 + $0x1] sm:$0x1]  ;;  %v172_v22 = vld [vmem:[%s3996_s0 + $0x11] sm:$0x1] }
  0xfa   :  { %2786 = vtanh.f32 %v148_v28  ;;  %v173_v23 = vld [vmem:[%s3996_s0 + $0x21] sm:$0x1]  ;;  %v174_v24 = vld [vmem:[%s3996_s0 + $0x31] sm:$0x1] }
  0xfb   :  { %2788 = vtanh.f32 %v149_v29 }
  0xfc   :  { %2790 = vtanh.f32 %v150_v30 }
  0xfd   :  { %2792 = vtanh.f32 %v151_v32  ;;  %v176_v32 = vld [vmem:[%s3996_s0 + $0x51] sm:$0x1] }
  0xfe   :  { %2794 = vtanh.f32 %v152_v34 }
  0xff   :  { %2796 = vtanh.f32 %v153_v35 }
 0x100   :  { %2798 = vtanh.f32 %v154_v36 }
 0x103   :  { %v2785_v37 = vpop.eup %2784 }
 0x104   :  { %v2787_v38 = vpop.eup %2786  ;;  %163 = vst [vmem:[#allocation3] sm:$0x1] %v2785_v37  ;;  %v179_v40 = vpack.c.bf16 %v2785_v37, %v2785_v37  ;;  %v177_v37 = vld [vmem:[%s3996_s0 + $0x61] sm:$0x1] }
 0x105   :  { %v2789_v39 = vpop.eup %2788  ;;  %164 = vst [vmem:[#allocation3 + $0x10] sm:$0x1] %v2787_v38  ;;  %v180_v41 = vpack.c.bf16 %v2787_v38, %v2787_v38 }
 0x106   :  { %v2791_v42 = vpop.eup %2790  ;;  %165 = vst [vmem:[#allocation3 + $0x20] sm:$0x1] %v2789_v39  ;;  %v181_v43 = vpack.c.bf16 %v2789_v39, %v2789_v39  ;;  %v195_v52 = vunpack.c.l.b16 %v179_v40 }
 0x107   :  { %v2793_v44 = vpop.eup %2792  ;;  %166 = vst [vmem:[#allocation3 + $0x30] sm:$0x1] %v2791_v42  ;;  %v182_v45 = vpack.c.bf16 %v2791_v42, %v2791_v42  ;;  %v196_v46 = vunpack.c.l.b16 %v180_v41 }
 0x108   :  { %v2795_v47 = vpop.eup %2794  ;;  %167 = vst [vmem:[#allocation3 + $0x40] sm:$0x1] %v2793_v44  ;;  %v183_v48 = vpack.c.bf16 %v2793_v44, %v2793_v44  ;;  %v197_v49 = vunpack.c.l.b16 %v181_v43  ;;  %v178_v43 = vld [vmem:[%s3996_s0 + $0x71] sm:$0x1] }
 0x109   :  { %v2797_v50 = vpop.eup %2796  ;;  %168 = vst [vmem:[#allocation3 + $0x50] sm:$0x1] %v2795_v47  ;;  %v184_v51 = vpack.c.bf16 %v2795_v47, %v2795_v47  ;;  %v198_v53 = vunpack.c.l.b16 %v182_v45  ;;  %v203_v54 = vrot.slane %v196_v46, 7 }
 0x10a   :  { %v2799_v55 = vpop.eup %2798  ;;  %169 = vst [vmem:[#allocation3 + $0x60] sm:$0x1] %v2797_v50  ;;  %v185_v56 = vpack.c.bf16 %v2797_v50, %v2797_v50  ;;  %v199_v57 = vunpack.c.l.b16 %v183_v48  ;;  %v206_v58 = vrot.slane %v197_v49, 6 }
 0x10b   :  { %170 = vst [vmem:[#allocation3 + $0x70] sm:$0x1] %v2799_v55  ;;  %v186_v59 = vpack.c.bf16 %v2799_v55, %v2799_v55  ;;  %v200_v60 = vunpack.c.l.b16 %v184_v51  ;;  %v205_v61 = vsel %vm204_vm1, %v203_v54, %v195_v52  ;;  %v209_v62 = vrot.slane %v198_v53, 5 }
 0x10c   :  { %v201_v63 = vunpack.c.l.b16 %v185_v56  ;;  %v208_v9 = vsel %vm207_vm2, %v206_v58, %v205_v61  ;;  %v212_v10 = vrot.slane %v199_v57, 4 }
 0x10d   :  { %v202_v11 = vunpack.c.l.b16 %v186_v59  ;;  %v211_v12 = vsel %vm210_vm3, %v209_v62, %v208_v9  ;;  %v215_v13 = vrot.slane %v200_v60, 3 }
 0x10e   :  { %v214_v14 = vsel %vm213_vm4, %v212_v10, %v211_v12  ;;  %v218_v15 = vrot.slane %v201_v63, 2 }
 0x10f   :  { %v217_v16 = vsel %vm216_vm5, %v215_v13, %v214_v14  ;;  %v221_v17 = vrot.slane %v202_v11, 1 }
 0x110   :  { %v220_v18 = vsel %vm219_vm6, %v218_v15, %v217_v16 }
 0x111   :  { %v223_v19 = vsel %vm222_vm7, %v221_v17, %v220_v18 }
 0x112   :  { %v224_v20 = vpack.c.b16 %v223_v19, %v223_v19 }
 0x114   :  { %2490 = vmatmul.mubr.bf16.vlgmr.msra.gmra.mrb[0].mxu1 %v224_v20 }
 0x115   :  { %2514 = vmatpush3.bf16.msra.mxu1 %v3078_v1  ;;  %2529 = vmatprep.mubr.msk.bf16.mxu1 %vm3057_vm0, %v3056_v0 }
 0x116   :  { %2515 = vmatprep.subr.bf16.mxu1 %v3056_v0 }
 0x119   :  { %2516 = vmatpush3.bf16.msra.mxu1 %v3089_v2 }
 0x11a   :  { %2517 = vmatprep.subr.bf16.mxu1 %v3056_v0 }
 0x11d   :  { %2518 = vmatpush3.bf16.msra.mxu1 %v3098_v3 }
 0x11e   :  { %2519 = vmatprep.subr.bf16.mxu1 %v3056_v0 }
 0x121   :  { %2520 = vmatpush3.bf16.msra.mxu1 %v3107_v4 }
 0x122   :  { %2521 = vmatprep.subr.bf16.mxu1 %v3056_v0 }
 0x125   :  { %2522 = vmatpush3.bf16.msra.mxu1 %v3116_v5 }
 0x126   :  { %2523 = vmatprep.subr.bf16.mxu1 %v3056_v0 }
 0x129   :  { %2524 = vmatpush3.bf16.msra.mxu1 %v3125_v6 }
 0x12a   :  { %2525 = vmatprep.subr.bf16.mxu1 %v3056_v0 }
 0x12d   :  { %2526 = vmatpush3.bf16.msra.mxu1 %v3134_v7 }
 0x12e   :  { %2527 = vmatprep.subr.bf16.mxu1 %v3056_v0 }
 0x131   :  { %2528 = vmatpush3.bf16.msra.mxu1 %v3143_v8 }
 0x132   :  { %2553 = vmatprep.subr.bf16.mxu1 %v3056_v0 }
 0x1e7   :  { %v260_v26 = vpop.f32.mrb[0].mxu1 }
 0x1e8   :  { %v267_v27 = vrot.slane %v260_v26, 1  ;;  %v268_v28 = vrot.slane %v260_v26, 2  ;;  %v269_v29 = vrot.slane %v260_v26, 3  ;;  %v270_v30 = vrot.slane %v260_v26, 4  ;;  %v2491_v31 = vpop.f32.mrb[1].mxu1 }
 0x1e9   :  { %v271_v33 = vrot.slane %v260_v26, 5  ;;  %v272_v34 = vrot.slane %v260_v26, 6  ;;  %v282_v35 = vadd.f32 %v260_v26, %v171_v21  ;;  %v263_v36 = vpop.f32.mrb[2].mxu1  ;;  %v273_v38 = vrot.slane %v260_v26, 7 }
 0x1ea   :  { %v283_v39 = vadd.f32 %v267_v27, %v172_v22  ;;  %v284_v40 = vadd.f32 %v268_v28, %v173_v23  ;;  %v285_v41 = vadd.f32 %v269_v29, %v174_v24  ;;  %v2492_v42 = vpop.f32.mrb[3].mxu1  ;;  %v286_v44 = vadd.f32 %v270_v30, %v175_v25  ;;  %v310_v36 = vld [vmem:[%s3996_s0 + $0x42] sm:$0x1] }
 0x1eb   :  { %2800 = vtanh.f32 %v282_v35  ;;  %v287_v45 = vadd.f32 %v271_v33, %v176_v32  ;;  %v288_v46 = vadd.f32 %v272_v34, %v177_v37  ;;  %v289_v47 = vadd.f32 %v273_v38, %v178_v43  ;;  %v306_v32 = vld [vmem:[%s3996_s0 + $0x2] sm:$0x1]  ;;  %v307_v33 = vld [vmem:[%s3996_s0 + $0x12] sm:$0x1] }
 0x1ec   :  { %2802 = vtanh.f32 %v283_v39  ;;  %v308_v34 = vld [vmem:[%s3996_s0 + $0x22] sm:$0x1]  ;;  %v309_v35 = vld [vmem:[%s3996_s0 + $0x32] sm:$0x1] }
 0x1ed   :  { %2804 = vtanh.f32 %v284_v40  ;;  %v311_v43 = vld [vmem:[%s3996_s0 + $0x52] sm:$0x1] }
 0x1ee   :  { %2806 = vtanh.f32 %v285_v41 }
 0x1ef   :  { %2808 = vtanh.f32 %v286_v44 }
 0x1f0   :  { %2810 = vtanh.f32 %v287_v45 }
 0x1f1   :  { %2812 = vtanh.f32 %v288_v46 }
 0x1f2   :  { %2814 = vtanh.f32 %v289_v47 }
 0x1f5   :  { %v2801_v48 = vpop.eup %2800 }
 0x1f6   :  { %v2803_v49 = vpop.eup %2802  ;;  %298 = vst [vmem:[#allocation3 + $0x1] sm:$0x1] %v2801_v48  ;;  %v314_v51 = vpack.c.bf16 %v2801_v48, %v2801_v48  ;;  %v312_v48 = vld [vmem:[%s3996_s0 + $0x62] sm:$0x1] }
 0x1f7   :  { %v2805_v50 = vpop.eup %2804  ;;  %299 = vst [vmem:[#allocation3 + $0x11] sm:$0x1] %v2803_v49  ;;  %v315_v52 = vpack.c.bf16 %v2803_v49, %v2803_v49 }
 0x1f8   :  { %v2807_v53 = vpop.eup %2806  ;;  %300 = vst [vmem:[#allocation3 + $0x21] sm:$0x1] %v2805_v50  ;;  %v316_v54 = vpack.c.bf16 %v2805_v50, %v2805_v50  ;;  %v330_v63 = vunpack.c.l.b16 %v314_v51 }
 0x1f9   :  { %v2809_v55 = vpop.eup %2808  ;;  %301 = vst [vmem:[#allocation3 + $0x31] sm:$0x1] %v2807_v53  ;;  %v317_v56 = vpack.c.bf16 %v2807_v53, %v2807_v53  ;;  %v331_v57 = vunpack.c.l.b16 %v315_v52 }
 0x1fa   :  { %v2811_v58 = vpop.eup %2810  ;;  %302 = vst [vmem:[#allocation3 + $0x41] sm:$0x1] %v2809_v55  ;;  %v318_v59 = vpack.c.bf16 %v2809_v55, %v2809_v55  ;;  %v332_v60 = vunpack.c.l.b16 %v316_v54  ;;  %v313_v54 = vld [vmem:[%s3996_s0 + $0x72] sm:$0x1] }
 0x1fb   :  { %v2813_v61 = vpop.eup %2812  ;;  %303 = vst [vmem:[#allocation3 + $0x51] sm:$0x1] %v2811_v58  ;;  %v319_v62 = vpack.c.bf16 %v2811_v58, %v2811_v58  ;;  %v333_v9 = vunpack.c.l.b16 %v317_v56  ;;  %v338_v10 = vrot.slane %v331_v57, 7 }
 0x1fc   :  { %v2815_v11 = vpop.eup %2814  ;;  %304 = vst [vmem:[#allocation3 + $0x61] sm:$0x1] %v2813_v61  ;;  %v320_v12 = vpack.c.bf16 %v2813_v61, %v2813_v61  ;;  %v334_v13 = vunpack.c.l.b16 %v318_v59  ;;  %v340_v14 = vrot.slane %v332_v60, 6 }
 0x1fd   :  { %305 = vst [vmem:[#allocation3 + $0x71] sm:$0x1] %v2815_v11  ;;  %v321_v15 = vpack.c.bf16 %v2815_v11, %v2815_v11  ;;  %v335_v16 = vunpack.c.l.b16 %v319_v62  ;;  %v339_v17 = vsel %vm204_vm1, %v338_v10, %v330_v63  ;;  %v342_v18 = vrot.slane %v333_v9, 5 }
 0x1fe   :  { %v336_v19 = vunpack.c.l.b16 %v320_v12  ;;  %v341_v20 = vsel %vm207_vm2, %v340_v14, %v339_v17  ;;  %v344_v21 = vrot.slane %v334_v13, 4 }
 0x1ff   :  { %v337_v22 = vunpack.c.l.b16 %v321_v15  ;;  %v343_v23 = vsel %vm210_vm3, %v342_v18, %v341_v20  ;;  %v346_v24 = vrot.slane %v335_v16, 3 }
 0x200   :  { %v345_v25 = vsel %vm213_vm4, %v344_v21, %v343_v23  ;;  %v348_v26 = vrot.slane %v336_v19, 2 }
 0x201   :  { %v347_v27 = vsel %vm216_vm5, %v346_v24, %v345_v25  ;;  %v350_v28 = vrot.slane %v337_v22, 1 }
 0x202   :  { %v349_v29 = vsel %vm219_vm6, %v348_v26, %v347_v27 }
 0x203   :  { %v351_v30 = vsel %vm222_vm7, %v350_v28, %v349_v29 }
 0x204   :  { %v352_v31 = vpack.c.b16 %v351_v30, %v351_v30 }
 0x206   :  { %2510 = vmatmul.mubr.bf16.vlgmr.msra.gmra.mrb[4].mxu0 %v352_v31 }
 0x207   :  { %2534 = vmatpush3.bf16.msra.mxu0 %v3078_v1  ;;  %2549 = vmatprep.mubr.msk.bf16.mxu0 %vm3057_vm0, %v3056_v0 }
 0x208   :  { %2535 = vmatprep.subr.bf16.mxu0 %v3056_v0 }
 0x20b   :  { %2536 = vmatpush3.bf16.msra.mxu0 %v3089_v2 }
 0x20c   :  { %2537 = vmatprep.subr.bf16.mxu0 %v3056_v0 }
 0x20f   :  { %2538 = vmatpush3.bf16.msra.mxu0 %v3098_v3 }
 0x210   :  { %2539 = vmatprep.subr.bf16.mxu0 %v3056_v0 }
 0x213   :  { %2540 = vmatpush3.bf16.msra.mxu0 %v3107_v4 }
 0x214   :  { %2541 = vmatprep.subr.bf16.mxu0 %v3056_v0 }
 0x217   :  { %2542 = vmatpush3.bf16.msra.mxu0 %v3116_v5 }
 0x218   :  { %2543 = vmatprep.subr.bf16.mxu0 %v3056_v0 }
 0x21b   :  { %2544 = vmatpush3.bf16.msra.mxu0 %v3125_v6 }
 0x21c   :  { %2545 = vmatprep.subr.bf16.mxu0 %v3056_v0 }
 0x21f   :  { %2546 = vmatpush3.bf16.msra.mxu0 %v3134_v7 }
 0x220   :  { %2547 = vmatprep.subr.bf16.mxu0 %v3056_v0 }
 0x223   :  { %2548 = vmatpush3.bf16.msra.mxu0 %v3143_v8 }
 0x224   :  { %2573 = vmatprep.subr.bf16.mxu0 %v3056_v0 }
 0x2d9   :  { %v388_v37 = vpop.f32.mrb[4].mxu0 }
 0x2da   :  { %v395_v38 = vrot.slane %v388_v37, 1  ;;  %v396_v39 = vrot.slane %v388_v37, 2  ;;  %v397_v40 = vrot.slane %v388_v37, 3  ;;  %v398_v41 = vrot.slane %v388_v37, 4  ;;  %v2511_v42 = vpop.f32.mrb[5].mxu0 }
 0x2db   :  { %v399_v44 = vrot.slane %v388_v37, 5  ;;  %v400_v45 = vrot.slane %v388_v37, 6  ;;  %v410_v46 = vadd.f32 %v388_v37, %v306_v32  ;;  %v391_v47 = vpop.f32.mrb[6].mxu0  ;;  %v401_v49 = vrot.slane %v388_v37, 7 }
 0x2dc   :  { %v411_v50 = vadd.f32 %v395_v38, %v307_v33  ;;  %v412_v51 = vadd.f32 %v396_v39, %v308_v34  ;;  %v413_v52 = vadd.f32 %v397_v40, %v309_v35  ;;  %v2512_v53 = vpop.f32.mrb[7].mxu0  ;;  %v414_v55 = vadd.f32 %v398_v41, %v310_v36  ;;  %v438_v47 = vld [vmem:[%s3996_s0 + $0x43] sm:$0x1] }
 0x2dd   :  { %2816 = vtanh.f32 %v410_v46  ;;  %v415_v56 = vadd.f32 %v399_v44, %v311_v43  ;;  %v416_v57 = vadd.f32 %v400_v45, %v312_v48  ;;  %v417_v58 = vadd.f32 %v401_v49, %v313_v54  ;;  %v434_v43 = vld [vmem:[%s3996_s0 + $0x3] sm:$0x1]  ;;  %v435_v44 = vld [vmem:[%s3996_s0 + $0x13] sm:$0x1] }
 0x2de   :  { %2818 = vtanh.f32 %v411_v50  ;;  %v436_v45 = vld [vmem:[%s3996_s0 + $0x23] sm:$0x1]  ;;  %v437_v46 = vld [vmem:[%s3996_s0 + $0x33] sm:$0x1] }
 0x2df   :  { %2820 = vtanh.f32 %v412_v51  ;;  %v439_v54 = vld [vmem:[%s3996_s0 + $0x53] sm:$0x1] }
 0x2e0   :  { %2822 = vtanh.f32 %v413_v52 }
 0x2e1   :  { %2824 = vtanh.f32 %v414_v55 }
 0x2e2   :  { %2826 = vtanh.f32 %v415_v56 }
 0x2e3   :  { %2828 = vtanh.f32 %v416_v57 }
 0x2e4   :  { %2830 = vtanh.f32 %v417_v58 }
 0x2e7   :  { %v2817_v59 = vpop.eup %2816 }
 0x2e8   :  { %v2819_v60 = vpop.eup %2818  ;;  %426 = vst [vmem:[#allocation3 + $0x2] sm:$0x1] %v2817_v59  ;;  %v442_v62 = vpack.c.bf16 %v2817_v59, %v2817_v59  ;;  %v440_v59 = vld [vmem:[%s3996_s0 + $0x63] sm:$0x1] }
 0x2e9   :  { %v2821_v61 = vpop.eup %2820  ;;  %427 = vst [vmem:[#allocation3 + $0x12] sm:$0x1] %v2819_v60  ;;  %v443_v63 = vpack.c.bf16 %v2819_v60, %v2819_v60 }
 0x2ea   :  { %v2823_v9 = vpop.eup %2822  ;;  %428 = vst [vmem:[#allocation3 + $0x22] sm:$0x1] %v2821_v61  ;;  %v444_v10 = vpack.c.bf16 %v2821_v61, %v2821_v61  ;;  %v458_v19 = vunpack.c.l.b16 %v442_v62 }
 0x2eb   :  { %v2825_v11 = vpop.eup %2824  ;;  %429 = vst [vmem:[#allocation3 + $0x32] sm:$0x1] %v2823_v9  ;;  %v445_v12 = vpack.c.bf16 %v2823_v9, %v2823_v9  ;;  %v459_v13 = vunpack.c.l.b16 %v443_v63 }
 0x2ec   :  { %v2827_v14 = vpop.eup %2826  ;;  %430 = vst [vmem:[#allocation3 + $0x42] sm:$0x1] %v2825_v11  ;;  %v446_v15 = vpack.c.bf16 %v2825_v11, %v2825_v11  ;;  %v460_v16 = vunpack.c.l.b16 %v444_v10  ;;  %v441_v10 = vld [vmem:[%s3996_s0 + $0x73] sm:$0x1] }
 0x2ed   :  { %v2829_v17 = vpop.eup %2828  ;;  %431 = vst [vmem:[#allocation3 + $0x52] sm:$0x1] %v2827_v14  ;;  %v447_v18 = vpack.c.bf16 %v2827_v14, %v2827_v14  ;;  %v461_v20 = vunpack.c.l.b16 %v445_v12  ;;  %v466_v21 = vrot.slane %v459_v13, 7 }
 0x2ee   :  { %v2831_v22 = vpop.eup %2830  ;;  %432 = vst [vmem:[#allocation3 + $0x62] sm:$0x1] %v2829_v17  ;;  %v448_v23 = vpack.c.bf16 %v2829_v17, %v2829_v17  ;;  %v462_v24 = vunpack.c.l.b16 %v446_v15  ;;  %v468_v25 = vrot.slane %v460_v16, 6 }
 0x2ef   :  { %433 = vst [vmem:[#allocation3 + $0x72] sm:$0x1] %v2831_v22  ;;  %v449_v26 = vpack.c.bf16 %v2831_v22, %v2831_v22  ;;  %v463_v27 = vunpack.c.l.b16 %v447_v18  ;;  %v467_v28 = vsel %vm204_vm1, %v466_v21, %v458_v19  ;;  %v470_v29 = vrot.slane %v461_v20, 5 }
 0x2f0   :  { %v464_v30 = vunpack.c.l.b16 %v448_v23  ;;  %v469_v31 = vsel %vm207_vm2, %v468_v25, %v467_v28  ;;  %v472_v32 = vrot.slane %v462_v24, 4 }
 0x2f1   :  { %v465_v33 = vunpack.c.l.b16 %v449_v26  ;;  %v471_v34 = vsel %vm210_vm3, %v470_v29, %v469_v31  ;;  %v474_v35 = vrot.slane %v463_v27, 3 }
 0x2f2   :  { %v473_v36 = vsel %vm213_vm4, %v472_v32, %v471_v34  ;;  %v476_v37 = vrot.slane %v464_v30, 2 }
 0x2f3   :  { %v475_v38 = vsel %vm216_vm5, %v474_v35, %v473_v36  ;;  %v478_v39 = vrot.slane %v465_v33, 1 }
 0x2f4   :  { %v477_v40 = vsel %vm219_vm6, %v476_v37, %v475_v38 }
 0x2f5   :  { %v479_v41 = vsel %vm222_vm7, %v478_v39, %v477_v40 }
 0x2f6   :  { %v480_v42 = vpack.c.b16 %v479_v41, %v479_v41 }
 0x2f8   :  { %2530 = vmatmul.mubr.bf16.vlgmr.msra.gmra.mrb[4].mxu1 %v480_v42 }
 0x2f9   :  { %2554 = vmatpush3.bf16.msra.mxu1 %v3078_v1  ;;  %2569 = vmatprep.mubr.msk.bf16.mxu1 %vm3057_vm0, %v3056_v0 }
 0x2fa   :  { %2555 = vmatprep.subr.bf16.mxu1 %v3056_v0 }
 0x2fd   :  { %2556 = vmatpush3.bf16.msra.mxu1 %v3089_v2 }
 0x2fe   :  { %2557 = vmatprep.subr.bf16.mxu1 %v3056_v0 }
 0x301   :  { %2558 = vmatpush3.bf16.msra.mxu1 %v3098_v3 }
 0x302   :  { %2559 = vmatprep.subr.bf16.mxu1 %v3056_v0 }
 0x305   :  { %2560 = vmatpush3.bf16.msra.mxu1 %v3107_v4 }
 0x306   :  { %2561 = vmatprep.subr.bf16.mxu1 %v3056_v0 }
 0x309   :  { %2562 = vmatpush3.bf16.msra.mxu1 %v3116_v5 }
 0x30a   :  { %2563 = vmatprep.subr.bf16.mxu1 %v3056_v0 }
 0x30d   :  { %2564 = vmatpush3.bf16.msra.mxu1 %v3125_v6 }
 0x30e   :  { %2565 = vmatprep.subr.bf16.mxu1 %v3056_v0 }
 0x311   :  { %2566 = vmatpush3.bf16.msra.mxu1 %v3134_v7 }
 0x312   :  { %2567 = vmatprep.subr.bf16.mxu1 %v3056_v0 }
 0x315   :  { %2568 = vmatpush3.bf16.msra.mxu1 %v3143_v8 }
 0x316   :  { %2593 = vmatprep.subr.bf16.mxu1 %v3056_v0 }
 0x3cb   :  { %v516_v48 = vpop.f32.mrb[4].mxu1 }
 0x3cc   :  { %v523_v49 = vrot.slane %v516_v48, 1  ;;  %v524_v50 = vrot.slane %v516_v48, 2  ;;  %v525_v51 = vrot.slane %v516_v48, 3  ;;  %v526_v52 = vrot.slane %v516_v48, 4  ;;  %v2531_v53 = vpop.f32.mrb[5].mxu1 }
 0x3cd   :  { %v527_v55 = vrot.slane %v516_v48, 5  ;;  %v528_v56 = vrot.slane %v516_v48, 6  ;;  %v538_v57 = vadd.f32 %v516_v48, %v434_v43  ;;  %v519_v58 = vpop.f32.mrb[6].mxu1  ;;  %v529_v60 = vrot.slane %v516_v48, 7 }
 0x3ce   :  { %v539_v61 = vadd.f32 %v523_v49, %v435_v44  ;;  %v540_v62 = vadd.f32 %v524_v50, %v436_v45  ;;  %v541_v63 = vadd.f32 %v525_v51, %v437_v46  ;;  %v2532_v9 = vpop.f32.mrb[7].mxu1  ;;  %v542_v11 = vadd.f32 %v526_v52, %v438_v47 }
 0x3cf   :  { %2832 = vtanh.f32 %v538_v57  ;;  %v543_v12 = vadd.f32 %v527_v55, %v439_v54  ;;  %v544_v13 = vadd.f32 %v528_v56, %v440_v59  ;;  %v545_v14 = vadd.f32 %v529_v60, %v441_v10  ;;  %v567_v57 = vld [vmem:[%s3996_s0 + $0x54] sm:$0x1] }
 0x3d0   :  { %2834 = vtanh.f32 %v539_v61 }
 0x3d1   :  { %2836 = vtanh.f32 %v540_v62  ;;  %v568_v62 = vld [vmem:[%s3996_s0 + $0x64] sm:$0x1] }
 0x3d2   :  { %2838 = vtanh.f32 %v541_v63 }
 0x3d3   :  { %2840 = vtanh.f32 %v542_v11 }
 0x3d4   :  { %2842 = vtanh.f32 %v543_v12 }
 0x3d5   :  { %2844 = vtanh.f32 %v544_v13  ;;  %v569_v13 = vld [vmem:[%s3996_s0 + $0x74] sm:$0x1] }
 0x3d6   :  { %2846 = vtanh.f32 %v545_v14 }
 0x3d9   :  { %v2833_v15 = vpop.eup %2832 }
 0x3da   :  { %v2835_v16 = vpop.eup %2834  ;;  %554 = vst [vmem:[#allocation3 + $0x3] sm:$0x1] %v2833_v15  ;;  %v570_v18 = vpack.c.bf16 %v2833_v15, %v2833_v15 }
 0x3db   :  { %v2837_v17 = vpop.eup %2836  ;;  %555 = vst [vmem:[#allocation3 + $0x13] sm:$0x1] %v2835_v16  ;;  %v571_v19 = vpack.c.bf16 %v2835_v16, %v2835_v16 }
 0x3dc   :  { %v2839_v20 = vpop.eup %2838  ;;  %556 = vst [vmem:[#allocation3 + $0x23] sm:$0x1] %v2837_v17  ;;  %v572_v21 = vpack.c.bf16 %v2837_v17, %v2837_v17  ;;  %v586_v30 = vunpack.c.l.b16 %v570_v18 }
 0x3dd   :  { %v2841_v22 = vpop.eup %2840  ;;  %557 = vst [vmem:[#allocation3 + $0x33] sm:$0x1] %v2839_v20  ;;  %v573_v23 = vpack.c.bf16 %v2839_v20, %v2839_v20  ;;  %v587_v24 = vunpack.c.l.b16 %v571_v19 }
 0x3de   :  { %v2843_v25 = vpop.eup %2842  ;;  %558 = vst [vmem:[#allocation3 + $0x43] sm:$0x1] %v2841_v22  ;;  %v574_v26 = vpack.c.bf16 %v2841_v22, %v2841_v22  ;;  %v588_v27 = vunpack.c.l.b16 %v572_v21 }
 0x3df   :  { %v2845_v28 = vpop.eup %2844  ;;  %559 = vst [vmem:[#allocation3 + $0x53] sm:$0x1] %v2843_v25  ;;  %v575_v29 = vpack.c.bf16 %v2843_v25, %v2843_v25  ;;  %v589_v31 = vunpack.c.l.b16 %v573_v23  ;;  %v594_v32 = vrot.slane %v587_v24, 7 }
 0x3e0   :  { %v2847_v33 = vpop.eup %2846  ;;  %560 = vst [vmem:[#allocation3 + $0x63] sm:$0x1] %v2845_v28  ;;  %v576_v34 = vpack.c.bf16 %v2845_v28, %v2845_v28  ;;  %v590_v35 = vunpack.c.l.b16 %v574_v26  ;;  %v596_v36 = vrot.slane %v588_v27, 6 }
 0x3e1   :  { %561 = vst [vmem:[#allocation3 + $0x73] sm:$0x1] %v2847_v33  ;;  %v577_v37 = vpack.c.bf16 %v2847_v33, %v2847_v33  ;;  %v591_v38 = vunpack.c.l.b16 %v575_v29  ;;  %v595_v39 = vsel %vm204_vm1, %v594_v32, %v586_v30  ;;  %v598_v40 = vrot.slane %v589_v31, 5 }
 0x3e2   :  { %v592_v41 = vunpack.c.l.b16 %v576_v34  ;;  %v597_v42 = vsel %vm207_vm2, %v596_v36, %v595_v39  ;;  %v600_v43 = vrot.slane %v590_v35, 4 }
 0x3e3   :  { %v593_v44 = vunpack.c.l.b16 %v577_v37  ;;  %v599_v45 = vsel %vm210_vm3, %v598_v40, %v597_v42  ;;  %v602_v46 = vrot.slane %v591_v38, 3 }
 0x3e4   :  { %v601_v47 = vsel %vm213_vm4, %v600_v43, %v599_v45  ;;  %v604_v48 = vrot.slane %v592_v41, 2 }
 0x3e5   :  { %v603_v49 = vsel %vm216_vm5, %v602_v46, %v601_v47  ;;  %v606_v50 = vrot.slane %v593_v44, 1 }
 0x3e6   :  { %v605_v51 = vsel %vm219_vm6, %v604_v48, %v603_v49 }
 0x3e7   :  { %v607_v52 = vsel %vm222_vm7, %v606_v50, %v605_v51 }
 0x3e8   :  { %v608_v53 = vpack.c.b16 %v607_v52, %v607_v52 }
 0x3ea   :  { %2550 = vmatmul.mubr.bf16.vlgmr.msra.gmra.mrb[8].mxu0 %v608_v53 }
 0x3eb   :  { %2574 = vmatpush3.bf16.msra.mxu0 %v3078_v1  ;;  %2589 = vmatprep.mubr.msk.bf16.mxu0 %vm3057_vm0, %v3056_v0  ;;  %v562_v1 = vld [vmem:[%s3996_s0 + $0x4] sm:$0x1] }
 0x3ec   :  { %2575 = vmatprep.subr.bf16.mxu0 %v3056_v0 }
 0x3ef   :  { %2576 = vmatpush3.bf16.msra.mxu0 %v3089_v2  ;;  %v563_v2 = vld [vmem:[%s3996_s0 + $0x14] sm:$0x1] }
 0x3f0   :  { %2577 = vmatprep.subr.bf16.mxu0 %v3056_v0 }
 0x3f3   :  { %2578 = vmatpush3.bf16.msra.mxu0 %v3098_v3  ;;  %v564_v3 = vld [vmem:[%s3996_s0 + $0x24] sm:$0x1] }
 0x3f4   :  { %2579 = vmatprep.subr.bf16.mxu0 %v3056_v0 }
 0x3f7   :  { %2580 = vmatpush3.bf16.msra.mxu0 %v3107_v4  ;;  %v565_v4 = vld [vmem:[%s3996_s0 + $0x34] sm:$0x1] }
 0x3f8   :  { %2581 = vmatprep.subr.bf16.mxu0 %v3056_v0 }
 0x3fb   :  { %2582 = vmatpush3.bf16.msra.mxu0 %v3116_v5  ;;  %v566_v5 = vld [vmem:[%s3996_s0 + $0x44] sm:$0x1] }
 0x3fc   :  { %2583 = vmatprep.subr.bf16.mxu0 %v3056_v0 }
 0x3ff   :  { %2584 = vmatpush3.bf16.msra.mxu0 %v3125_v6 }
 0x400   :  { %2585 = vmatprep.subr.bf16.mxu0 %v3056_v0 }
 0x403   :  { %2586 = vmatpush3.bf16.msra.mxu0 %v3134_v7 }
 0x404   :  { %2587 = vmatprep.subr.bf16.mxu0 %v3056_v0 }
 0x407   :  { %2588 = vmatpush3.bf16.msra.mxu0 %v3143_v8 }
 0x408   :  { %2613 = vmatprep.subr.bf16.mxu0 %v3056_v0 }
 0x4bd   :  { %v644_v6 = vpop.f32.mrb[8].mxu0 }
 0x4be   :  { %v651_v7 = vrot.slane %v644_v6, 1  ;;  %v652_v8 = vrot.slane %v644_v6, 2  ;;  %v653_v54 = vrot.slane %v644_v6, 3  ;;  %v654_v55 = vrot.slane %v644_v6, 4  ;;  %v2551_v56 = vpop.f32.mrb[9].mxu0 }
 0x4bf   :  { %v655_v58 = vrot.slane %v644_v6, 5  ;;  %v656_v59 = vrot.slane %v644_v6, 6  ;;  %v666_v60 = vadd.f32 %v644_v6, %v562_v1  ;;  %v647_v61 = vpop.f32.mrb[10].mxu0  ;;  %v657_v63 = vrot.slane %v644_v6, 7  ;;  %v3416_v6 = vld [vmem:[%s3995_s1 + $0x10] sm:$0xff]   ;;  %v3451_v56 = vld [vmem:[%s3995_s1 + $0x38] sm:$0xff]  }
 0x4c0   :  { %v667_v9 = vadd.f32 %v651_v7, %v563_v2  ;;  %v668_v10 = vadd.f32 %v652_v8, %v564_v3  ;;  %v669_v11 = vadd.f32 %v653_v54, %v565_v4  ;;  %v2552_v12 = vpop.f32.mrb[11].mxu0  ;;  %v670_v14 = vadd.f32 %v654_v55, %v566_v5  ;;  %v3400_v4 = vld [vmem:[%s3995_s1] sm:$0xff]   ;;  %v3409_v5 = vld [vmem:[%s3995_s1 + $0x8] sm:$0xff]   ;;  %v3423_v7 = vld [vmem:[%s3995_s1 + $0x18] sm:$0xff]  }
 0x4c1   :  { %2848 = vtanh.f32 %v666_v60  ;;  %v671_v15 = vadd.f32 %v655_v58, %v567_v57  ;;  %v672_v16 = vadd.f32 %v656_v59, %v568_v62  ;;  %v673_v17 = vadd.f32 %v657_v63, %v569_v13  ;;  %v3430_v8 = vld [vmem:[%s3995_s1 + $0x20] sm:$0xff]   ;;  %v3437_v54 = vld [vmem:[%s3995_s1 + $0x28] sm:$0xff]   ;;  %v3444_v55 = vld [vmem:[%s3995_s1 + $0x30] sm:$0xff]  }
 0x4c2   :  { %2850 = vtanh.f32 %v667_v9  ;;  %v690_v57 = vld [vmem:[%s3996_s0 + $0x5] sm:$0x1]  ;;  %v691_v58 = vld [vmem:[%s3996_s0 + $0x15] sm:$0x1] }
 0x4c3   :  { %2852 = vtanh.f32 %v668_v10  ;;  %v692_v59 = vld [vmem:[%s3996_s0 + $0x25] sm:$0x1]  ;;  %v693_v60 = vld [vmem:[%s3996_s0 + $0x35] sm:$0x1] }
 0x4c4   :  { %2854 = vtanh.f32 %v669_v11  ;;  %v694_v61 = vld [vmem:[%s3996_s0 + $0x45] sm:$0x1]  ;;  %v695_v13 = vld [vmem:[%s3996_s0 + $0x55] sm:$0x1] }
 0x4c5   :  { %2856 = vtanh.f32 %v670_v14 }
 0x4c6   :  { %2858 = vtanh.f32 %v671_v15 }
 0x4c7   :  { %2860 = vtanh.f32 %v672_v16 }
 0x4c8   :  { %2862 = vtanh.f32 %v673_v17 }
 0x4cb   :  { %v2849_v18 = vpop.eup %2848 }
 0x4cc   :  { %v2851_v19 = vpop.eup %2850  ;;  %682 = vst [vmem:[#allocation3 + $0x4] sm:$0x1] %v2849_v18  ;;  %v698_v21 = vpack.c.bf16 %v2849_v18, %v2849_v18  ;;  %v696_v18 = vld [vmem:[%s3996_s0 + $0x65] sm:$0x1] }
 0x4cd   :  { %v2853_v20 = vpop.eup %2852  ;;  %683 = vst [vmem:[#allocation3 + $0x14] sm:$0x1] %v2851_v19  ;;  %v699_v22 = vpack.c.bf16 %v2851_v19, %v2851_v19 }
 0x4ce   :  { %v2855_v23 = vpop.eup %2854  ;;  %684 = vst [vmem:[#allocation3 + $0x24] sm:$0x1] %v2853_v20  ;;  %v700_v24 = vpack.c.bf16 %v2853_v20, %v2853_v20  ;;  %v714_v33 = vunpack.c.l.b16 %v698_v21 }
 0x4cf   :  { %v2857_v25 = vpop.eup %2856  ;;  %685 = vst [vmem:[#allocation3 + $0x34] sm:$0x1] %v2855_v23  ;;  %v701_v26 = vpack.c.bf16 %v2855_v23, %v2855_v23  ;;  %v715_v27 = vunpack.c.l.b16 %v699_v22 }
 0x4d0   :  { %v2859_v28 = vpop.eup %2858  ;;  %686 = vst [vmem:[#allocation3 + $0x44] sm:$0x1] %v2857_v25  ;;  %v702_v29 = vpack.c.bf16 %v2857_v25, %v2857_v25  ;;  %v716_v30 = vunpack.c.l.b16 %v700_v24  ;;  %v697_v24 = vld [vmem:[%s3996_s0 + $0x75] sm:$0x1] }
 0x4d1   :  { %v2861_v31 = vpop.eup %2860  ;;  %687 = vst [vmem:[#allocation3 + $0x54] sm:$0x1] %v2859_v28  ;;  %v703_v32 = vpack.c.bf16 %v2859_v28, %v2859_v28  ;;  %v717_v34 = vunpack.c.l.b16 %v701_v26  ;;  %v722_v35 = vrot.slane %v715_v27, 7 }
 0x4d2   :  { %v2863_v36 = vpop.eup %2862  ;;  %688 = vst [vmem:[#allocation3 + $0x64] sm:$0x1] %v2861_v31  ;;  %v704_v37 = vpack.c.bf16 %v2861_v31, %v2861_v31  ;;  %v718_v38 = vunpack.c.l.b16 %v702_v29  ;;  %v724_v39 = vrot.slane %v716_v30, 6 }
 0x4d3   :  { %689 = vst [vmem:[#allocation3 + $0x74] sm:$0x1] %v2863_v36  ;;  %v705_v40 = vpack.c.bf16 %v2863_v36, %v2863_v36  ;;  %v719_v41 = vunpack.c.l.b16 %v703_v32  ;;  %v723_v42 = vsel %vm204_vm1, %v722_v35, %v714_v33  ;;  %v726_v43 = vrot.slane %v717_v34, 5 }
 0x4d4   :  { %v720_v44 = vunpack.c.l.b16 %v704_v37  ;;  %v725_v45 = vsel %vm207_vm2, %v724_v39, %v723_v42  ;;  %v728_v46 = vrot.slane %v718_v38, 4 }
 0x4d5   :  { %v721_v47 = vunpack.c.l.b16 %v705_v40  ;;  %v727_v48 = vsel %vm210_vm3, %v726_v43, %v725_v45  ;;  %v730_v49 = vrot.slane %v719_v41, 3 }
 0x4d6   :  { %v729_v50 = vsel %vm213_vm4, %v728_v46, %v727_v48  ;;  %v732_v51 = vrot.slane %v720_v44, 2 }
 0x4d7   :  { %v731_v52 = vsel %vm216_vm5, %v730_v49, %v729_v50  ;;  %v734_v53 = vrot.slane %v721_v47, 1 }
 0x4d8   :  { %v733_v1 = vsel %vm219_vm6, %v732_v51, %v731_v52 }
 0x4d9   :  { %v735_v2 = vsel %vm222_vm7, %v734_v53, %v733_v1 }
 0x4da   :  { %v736_v3 = vpack.c.b16 %v735_v2, %v735_v2 }
 0x4dc   :  { %2570 = vmatmul.mubr.bf16.vlgmr.msra.gmra.mrb[8].mxu1 %v736_v3 }
 0x4dd   :  { %2594 = vmatpush3.bf16.msra.mxu1 %v3400_v4  ;;  %2609 = vmatprep.mubr.msk.bf16.mxu1 %vm3057_vm0, %v3056_v0 }
 0x4de   :  { %2595 = vmatprep.subr.bf16.mxu1 %v3056_v0 }
 0x4e1   :  { %2596 = vmatpush3.bf16.msra.mxu1 %v3409_v5 }
 0x4e2   :  { %2597 = vmatprep.subr.bf16.mxu1 %v3056_v0 }
 0x4e5   :  { %2598 = vmatpush3.bf16.msra.mxu1 %v3416_v6 }
 0x4e6   :  { %2599 = vmatprep.subr.bf16.mxu1 %v3056_v0 }
 0x4e9   :  { %2600 = vmatpush3.bf16.msra.mxu1 %v3423_v7 }
 0x4ea   :  { %2601 = vmatprep.subr.bf16.mxu1 %v3056_v0 }
 0x4ed   :  { %2602 = vmatpush3.bf16.msra.mxu1 %v3430_v8 }
 0x4ee   :  { %2603 = vmatprep.subr.bf16.mxu1 %v3056_v0 }
 0x4f1   :  { %2604 = vmatpush3.bf16.msra.mxu1 %v3437_v54 }
 0x4f2   :  { %2605 = vmatprep.subr.bf16.mxu1 %v3056_v0 }
 0x4f5   :  { %2606 = vmatpush3.bf16.msra.mxu1 %v3444_v55 }
 0x4f6   :  { %2607 = vmatprep.subr.bf16.mxu1 %v3056_v0 }
 0x4f9   :  { %2608 = vmatpush3.bf16.msra.mxu1 %v3451_v56 }
 0x4fa   :  { %2633 = vmatprep.subr.bf16.mxu1 %v3056_v0 }
 0x5af   :  { %v772_v62 = vpop.f32.mrb[8].mxu1 }
 0x5b0   :  { %v779_v63 = vrot.slane %v772_v62, 1  ;;  %v780_v9 = vrot.slane %v772_v62, 2  ;;  %v781_v10 = vrot.slane %v772_v62, 3  ;;  %v782_v11 = vrot.slane %v772_v62, 4  ;;  %v2571_v12 = vpop.f32.mrb[9].mxu1 }
 0x5b1   :  { %v783_v14 = vrot.slane %v772_v62, 5  ;;  %v784_v15 = vrot.slane %v772_v62, 6  ;;  %v794_v16 = vadd.f32 %v772_v62, %v690_v57  ;;  %v775_v17 = vpop.f32.mrb[10].mxu1  ;;  %v785_v19 = vrot.slane %v772_v62, 7 }
 0x5b2   :  { %v795_v20 = vadd.f32 %v779_v63, %v691_v58  ;;  %v796_v21 = vadd.f32 %v780_v9, %v692_v59  ;;  %v797_v22 = vadd.f32 %v781_v10, %v693_v60  ;;  %v2572_v23 = vpop.f32.mrb[11].mxu1  ;;  %v798_v25 = vadd.f32 %v782_v11, %v694_v61  ;;  %v822_v17 = vld [vmem:[%s3996_s0 + $0x46] sm:$0x1] }
 0x5b3   :  { %2864 = vtanh.f32 %v794_v16  ;;  %v799_v26 = vadd.f32 %v783_v14, %v695_v13  ;;  %v800_v27 = vadd.f32 %v784_v15, %v696_v18  ;;  %v801_v28 = vadd.f32 %v785_v19, %v697_v24  ;;  %v818_v13 = vld [vmem:[%s3996_s0 + $0x6] sm:$0x1]  ;;  %v819_v14 = vld [vmem:[%s3996_s0 + $0x16] sm:$0x1] }
 0x5b4   :  { %2866 = vtanh.f32 %v795_v20  ;;  %v820_v15 = vld [vmem:[%s3996_s0 + $0x26] sm:$0x1]  ;;  %v821_v16 = vld [vmem:[%s3996_s0 + $0x36] sm:$0x1] }
 0x5b5   :  { %2868 = vtanh.f32 %v796_v21  ;;  %v823_v24 = vld [vmem:[%s3996_s0 + $0x56] sm:$0x1] }
 0x5b6   :  { %2870 = vtanh.f32 %v797_v22 }
 0x5b7   :  { %2872 = vtanh.f32 %v798_v25 }
 0x5b8   :  { %2874 = vtanh.f32 %v799_v26 }
 0x5b9   :  { %2876 = vtanh.f32 %v800_v27 }
 0x5ba   :  { %2878 = vtanh.f32 %v801_v28 }
 0x5bd   :  { %v2865_v29 = vpop.eup %2864 }
 0x5be   :  { %v2867_v30 = vpop.eup %2866  ;;  %810 = vst [vmem:[#allocation3 + $0x5] sm:$0x1] %v2865_v29  ;;  %v826_v32 = vpack.c.bf16 %v2865_v29, %v2865_v29  ;;  %v824_v29 = vld [vmem:[%s3996_s0 + $0x66] sm:$0x1] }
 0x5bf   :  { %v2869_v31 = vpop.eup %2868  ;;  %811 = vst [vmem:[#allocation3 + $0x15] sm:$0x1] %v2867_v30  ;;  %v827_v33 = vpack.c.bf16 %v2867_v30, %v2867_v30 }
 0x5c0   :  { %v2871_v34 = vpop.eup %2870  ;;  %812 = vst [vmem:[#allocation3 + $0x25] sm:$0x1] %v2869_v31  ;;  %v828_v35 = vpack.c.bf16 %v2869_v31, %v2869_v31  ;;  %v842_v44 = vunpack.c.l.b16 %v826_v32 }
 0x5c1   :  { %v2873_v36 = vpop.eup %2872  ;;  %813 = vst [vmem:[#allocation3 + $0x35] sm:$0x1] %v2871_v34  ;;  %v829_v37 = vpack.c.bf16 %v2871_v34, %v2871_v34  ;;  %v843_v38 = vunpack.c.l.b16 %v827_v33 }
 0x5c2   :  { %v2875_v39 = vpop.eup %2874  ;;  %814 = vst [vmem:[#allocation3 + $0x45] sm:$0x1] %v2873_v36  ;;  %v830_v40 = vpack.c.bf16 %v2873_v36, %v2873_v36  ;;  %v844_v41 = vunpack.c.l.b16 %v828_v35  ;;  %v825_v35 = vld [vmem:[%s3996_s0 + $0x76] sm:$0x1] }
 0x5c3   :  { %v2877_v42 = vpop.eup %2876  ;;  %815 = vst [vmem:[#allocation3 + $0x55] sm:$0x1] %v2875_v39  ;;  %v831_v43 = vpack.c.bf16 %v2875_v39, %v2875_v39  ;;  %v845_v45 = vunpack.c.l.b16 %v829_v37  ;;  %v850_v46 = vrot.slane %v843_v38, 7 }
 0x5c4   :  { %v2879_v47 = vpop.eup %2878  ;;  %816 = vst [vmem:[#allocation3 + $0x65] sm:$0x1] %v2877_v42  ;;  %v832_v48 = vpack.c.bf16 %v2877_v42, %v2877_v42  ;;  %v846_v49 = vunpack.c.l.b16 %v830_v40  ;;  %v852_v50 = vrot.slane %v844_v41, 6 }
 0x5c5   :  { %817 = vst [vmem:[#allocation3 + $0x75] sm:$0x1] %v2879_v47  ;;  %v833_v51 = vpack.c.bf16 %v2879_v47, %v2879_v47  ;;  %v847_v52 = vunpack.c.l.b16 %v831_v43  ;;  %v851_v53 = vsel %vm204_vm1, %v850_v46, %v842_v44  ;;  %v854_v1 = vrot.slane %v845_v45, 5 }
 0x5c6   :  { %v848_v2 = vunpack.c.l.b16 %v832_v48  ;;  %v853_v3 = vsel %vm207_vm2, %v852_v50, %v851_v53  ;;  %v856_v57 = vrot.slane %v846_v49, 4 }
 0x5c7   :  { %v849_v58 = vunpack.c.l.b16 %v833_v51  ;;  %v855_v59 = vsel %vm210_vm3, %v854_v1, %v853_v3  ;;  %v858_v60 = vrot.slane %v847_v52, 3 }
 0x5c8   :  { %v857_v61 = vsel %vm213_vm4, %v856_v57, %v855_v59  ;;  %v860_v62 = vrot.slane %v848_v2, 2 }
 0x5c9   :  { %v859_v63 = vsel %vm216_vm5, %v858_v60, %v857_v61  ;;  %v862_v9 = vrot.slane %v849_v58, 1 }
 0x5ca   :  { %v861_v10 = vsel %vm219_vm6, %v860_v62, %v859_v63 }
 0x5cb   :  { %v863_v11 = vsel %vm222_vm7, %v862_v9, %v861_v10 }
 0x5cc   :  { %v864_v12 = vpack.c.b16 %v863_v11, %v863_v11 }
 0x5ce   :  { %2590 = vmatmul.mubr.bf16.vlgmr.msra.gmra.mrb[12].mxu0 %v864_v12 }
 0x5cf   :  { %2614 = vmatpush3.bf16.msra.mxu0 %v3400_v4  ;;  %2629 = vmatprep.mubr.msk.bf16.mxu0 %vm3057_vm0, %v3056_v0 }
 0x5d0   :  { %2615 = vmatprep.subr.bf16.mxu0 %v3056_v0 }
 0x5d3   :  { %2616 = vmatpush3.bf16.msra.mxu0 %v3409_v5 }
 0x5d4   :  { %2617 = vmatprep.subr.bf16.mxu0 %v3056_v0 }
 0x5d7   :  { %2618 = vmatpush3.bf16.msra.mxu0 %v3416_v6 }
 0x5d8   :  { %2619 = vmatprep.subr.bf16.mxu0 %v3056_v0 }
 0x5db   :  { %2620 = vmatpush3.bf16.msra.mxu0 %v3423_v7 }
 0x5dc   :  { %2621 = vmatprep.subr.bf16.mxu0 %v3056_v0 }
 0x5df   :  { %2622 = vmatpush3.bf16.msra.mxu0 %v3430_v8 }
 0x5e0   :  { %2623 = vmatprep.subr.bf16.mxu0 %v3056_v0 }
 0x5e3   :  { %2624 = vmatpush3.bf16.msra.mxu0 %v3437_v54 }
 0x5e4   :  { %2625 = vmatprep.subr.bf16.mxu0 %v3056_v0 }
 0x5e7   :  { %2626 = vmatpush3.bf16.msra.mxu0 %v3444_v55 }
 0x5e8   :  { %2627 = vmatprep.subr.bf16.mxu0 %v3056_v0 }
 0x5eb   :  { %2628 = vmatpush3.bf16.msra.mxu0 %v3451_v56 }
 0x5ec   :  { %2653 = vmatprep.subr.bf16.mxu0 %v3056_v0 }
 0x6a1   :  { %v900_v18 = vpop.f32.mrb[12].mxu0 }
 0x6a2   :  { %v907_v19 = vrot.slane %v900_v18, 1  ;;  %v908_v20 = vrot.slane %v900_v18, 2  ;;  %v909_v21 = vrot.slane %v900_v18, 3  ;;  %v910_v22 = vrot.slane %v900_v18, 4  ;;  %v2591_v23 = vpop.f32.mrb[13].mxu0 }
 0x6a3   :  { %v911_v25 = vrot.slane %v900_v18, 5  ;;  %v912_v26 = vrot.slane %v900_v18, 6  ;;  %v922_v27 = vadd.f32 %v900_v18, %v818_v13  ;;  %v903_v28 = vpop.f32.mrb[14].mxu0  ;;  %v913_v30 = vrot.slane %v900_v18, 7 }
 0x6a4   :  { %v923_v31 = vadd.f32 %v907_v19, %v819_v14  ;;  %v924_v32 = vadd.f32 %v908_v20, %v820_v15  ;;  %v925_v33 = vadd.f32 %v909_v21, %v821_v16  ;;  %v2592_v34 = vpop.f32.mrb[15].mxu0  ;;  %v926_v36 = vadd.f32 %v910_v22, %v822_v17  ;;  %v950_v28 = vld [vmem:[%s3996_s0 + $0x47] sm:$0x1] }
 0x6a5   :  { %2880 = vtanh.f32 %v922_v27  ;;  %v927_v37 = vadd.f32 %v911_v25, %v823_v24  ;;  %v928_v38 = vadd.f32 %v912_v26, %v824_v29  ;;  %v929_v39 = vadd.f32 %v913_v30, %v825_v35  ;;  %v946_v24 = vld [vmem:[%s3996_s0 + $0x7] sm:$0x1]  ;;  %v947_v25 = vld [vmem:[%s3996_s0 + $0x17] sm:$0x1] }
 0x6a6   :  { %2882 = vtanh.f32 %v923_v31  ;;  %v948_v26 = vld [vmem:[%s3996_s0 + $0x27] sm:$0x1]  ;;  %v949_v27 = vld [vmem:[%s3996_s0 + $0x37] sm:$0x1] }
 0x6a7   :  { %2884 = vtanh.f32 %v924_v32  ;;  %v951_v35 = vld [vmem:[%s3996_s0 + $0x57] sm:$0x1] }
 0x6a8   :  { %2886 = vtanh.f32 %v925_v33 }
 0x6a9   :  { %2888 = vtanh.f32 %v926_v36 }
 0x6aa   :  { %2890 = vtanh.f32 %v927_v37 }
 0x6ab   :  { %2892 = vtanh.f32 %v928_v38 }
 0x6ac   :  { %2894 = vtanh.f32 %v929_v39 }
 0x6af   :  { %v2881_v40 = vpop.eup %2880 }
 0x6b0   :  { %v2883_v41 = vpop.eup %2882  ;;  %938 = vst [vmem:[#allocation3 + $0x6] sm:$0x1] %v2881_v40  ;;  %v954_v43 = vpack.c.bf16 %v2881_v40, %v2881_v40  ;;  %v952_v40 = vld [vmem:[%s3996_s0 + $0x67] sm:$0x1] }
 0x6b1   :  { %v2885_v42 = vpop.eup %2884  ;;  %939 = vst [vmem:[#allocation3 + $0x16] sm:$0x1] %v2883_v41  ;;  %v955_v44 = vpack.c.bf16 %v2883_v41, %v2883_v41 }
 0x6b2   :  { %v2887_v45 = vpop.eup %2886  ;;  %940 = vst [vmem:[#allocation3 + $0x26] sm:$0x1] %v2885_v42  ;;  %v956_v46 = vpack.c.bf16 %v2885_v42, %v2885_v42  ;;  %v970_v2 = vunpack.c.l.b16 %v954_v43 }
 0x6b3   :  { %v2889_v47 = vpop.eup %2888  ;;  %941 = vst [vmem:[#allocation3 + $0x36] sm:$0x1] %v2887_v45  ;;  %v957_v48 = vpack.c.bf16 %v2887_v45, %v2887_v45  ;;  %v971_v49 = vunpack.c.l.b16 %v955_v44 }
 0x6b4   :  { %v2891_v50 = vpop.eup %2890  ;;  %942 = vst [vmem:[#allocation3 + $0x46] sm:$0x1] %v2889_v47  ;;  %v958_v51 = vpack.c.bf16 %v2889_v47, %v2889_v47  ;;  %v972_v52 = vunpack.c.l.b16 %v956_v46  ;;  %v953_v46 = vld [vmem:[%s3996_s0 + $0x77] sm:$0x1] }
 0x6b5   :  { %v2893_v53 = vpop.eup %2892  ;;  %943 = vst [vmem:[#allocation3 + $0x56] sm:$0x1] %v2891_v50  ;;  %v959_v1 = vpack.c.bf16 %v2891_v50, %v2891_v50  ;;  %v973_v3 = vunpack.c.l.b16 %v957_v48  ;;  %v978_v57 = vrot.slane %v971_v49, 7 }
 0x6b6   :  { %v2895_v58 = vpop.eup %2894  ;;  %944 = vst [vmem:[#allocation3 + $0x66] sm:$0x1] %v2893_v53  ;;  %v960_v59 = vpack.c.bf16 %v2893_v53, %v2893_v53  ;;  %v974_v60 = vunpack.c.l.b16 %v958_v51  ;;  %v980_v61 = vrot.slane %v972_v52, 6 }
 0x6b7   :  { %945 = vst [vmem:[#allocation3 + $0x76] sm:$0x1] %v2895_v58  ;;  %v961_v62 = vpack.c.bf16 %v2895_v58, %v2895_v58  ;;  %v975_v63 = vunpack.c.l.b16 %v959_v1  ;;  %v979_v9 = vsel %vm204_vm1, %v978_v57, %v970_v2  ;;  %v982_v10 = vrot.slane %v973_v3, 5 }
 0x6b8   :  { %v976_v11 = vunpack.c.l.b16 %v960_v59  ;;  %v981_v12 = vsel %vm207_vm2, %v980_v61, %v979_v9  ;;  %v984_v13 = vrot.slane %v974_v60, 4 }
 0x6b9   :  { %v977_v14 = vunpack.c.l.b16 %v961_v62  ;;  %v983_v15 = vsel %vm210_vm3, %v982_v10, %v981_v12  ;;  %v986_v16 = vrot.slane %v975_v63, 3 }
 0x6ba   :  { %v985_v17 = vsel %vm213_vm4, %v984_v13, %v983_v15  ;;  %v988_v18 = vrot.slane %v976_v11, 2 }
 0x6bb   :  { %v987_v19 = vsel %vm216_vm5, %v986_v16, %v985_v17  ;;  %v990_v20 = vrot.slane %v977_v14, 1 }
 0x6bc   :  { %v989_v21 = vsel %vm219_vm6, %v988_v18, %v987_v19 }
 0x6bd   :  { %v991_v22 = vsel %vm222_vm7, %v990_v20, %v989_v21 }
 0x6be   :  { %v992_v23 = vpack.c.b16 %v991_v22, %v991_v22 }
 0x6c0   :  { %2610 = vmatmul.mubr.bf16.vlgmr.msra.gmra.mrb[12].mxu1 %v992_v23 }
 0x6c1   :  { %2634 = vmatpush3.bf16.msra.mxu1 %v3400_v4  ;;  %2649 = vmatprep.mubr.msk.bf16.mxu1 %vm3057_vm0, %v3056_v0 }
 0x6c2   :  { %2635 = vmatprep.subr.bf16.mxu1 %v3056_v0 }
 0x6c5   :  { %2636 = vmatpush3.bf16.msra.mxu1 %v3409_v5 }
 0x6c6   :  { %2637 = vmatprep.subr.bf16.mxu1 %v3056_v0 }
 0x6c9   :  { %2638 = vmatpush3.bf16.msra.mxu1 %v3416_v6 }
 0x6ca   :  { %2639 = vmatprep.subr.bf16.mxu1 %v3056_v0 }
 0x6cd   :  { %2640 = vmatpush3.bf16.msra.mxu1 %v3423_v7 }
 0x6ce   :  { %2641 = vmatprep.subr.bf16.mxu1 %v3056_v0 }
 0x6d1   :  { %2642 = vmatpush3.bf16.msra.mxu1 %v3430_v8 }
 0x6d2   :  { %2643 = vmatprep.subr.bf16.mxu1 %v3056_v0 }
 0x6d5   :  { %2644 = vmatpush3.bf16.msra.mxu1 %v3437_v54 }
 0x6d6   :  { %2645 = vmatprep.subr.bf16.mxu1 %v3056_v0 }
 0x6d9   :  { %2646 = vmatpush3.bf16.msra.mxu1 %v3444_v55 }
 0x6da   :  { %2647 = vmatprep.subr.bf16.mxu1 %v3056_v0 }
 0x6dd   :  { %2648 = vmatpush3.bf16.msra.mxu1 %v3451_v56 }
 0x6de   :  { %2673 = vmatprep.subr.bf16.mxu1 %v3056_v0 }
 0x793   :  { %v1028_v29 = vpop.f32.mrb[12].mxu1 }
 0x794   :  { %v1035_v30 = vrot.slane %v1028_v29, 1  ;;  %v1036_v31 = vrot.slane %v1028_v29, 2  ;;  %v1037_v32 = vrot.slane %v1028_v29, 3  ;;  %v1038_v33 = vrot.slane %v1028_v29, 4  ;;  %v2611_v34 = vpop.f32.mrb[13].mxu1 }
 0x795   :  { %v1039_v36 = vrot.slane %v1028_v29, 5  ;;  %v1040_v37 = vrot.slane %v1028_v29, 6  ;;  %v1050_v38 = vadd.f32 %v1028_v29, %v946_v24  ;;  %v1031_v39 = vpop.f32.mrb[14].mxu1  ;;  %v1041_v41 = vrot.slane %v1028_v29, 7 }
 0x796   :  { %v1051_v42 = vadd.f32 %v1035_v30, %v947_v25  ;;  %v1052_v43 = vadd.f32 %v1036_v31, %v948_v26  ;;  %v1053_v44 = vadd.f32 %v1037_v32, %v949_v27  ;;  %v2612_v45 = vpop.f32.mrb[15].mxu1  ;;  %v1054_v47 = vadd.f32 %v1038_v33, %v950_v28  ;;  %v1078_v39 = vld [vmem:[%s3996_s0 + $0x48] sm:$0x1] }
 0x797   :  { %2896 = vtanh.f32 %v1050_v38  ;;  %v1055_v48 = vadd.f32 %v1039_v36, %v951_v35  ;;  %v1056_v49 = vadd.f32 %v1040_v37, %v952_v40  ;;  %v1057_v50 = vadd.f32 %v1041_v41, %v953_v46  ;;  %v1074_v35 = vld [vmem:[%s3996_s0 + $0x8] sm:$0x1]  ;;  %v1075_v36 = vld [vmem:[%s3996_s0 + $0x18] sm:$0x1] }
 0x798   :  { %2898 = vtanh.f32 %v1051_v42  ;;  %v1076_v37 = vld [vmem:[%s3996_s0 + $0x28] sm:$0x1]  ;;  %v1077_v38 = vld [vmem:[%s3996_s0 + $0x38] sm:$0x1] }
 0x799   :  { %2900 = vtanh.f32 %v1052_v43  ;;  %v1079_v46 = vld [vmem:[%s3996_s0 + $0x58] sm:$0x1] }
 0x79a   :  { %2902 = vtanh.f32 %v1053_v44 }
 0x79b   :  { %2904 = vtanh.f32 %v1054_v47 }
 0x79c   :  { %2906 = vtanh.f32 %v1055_v48 }
 0x79d   :  { %2908 = vtanh.f32 %v1056_v49 }
 0x79e   :  { %2910 = vtanh.f32 %v1057_v50 }
 0x7a1   :  { %v2897_v51 = vpop.eup %2896 }
 0x7a2   :  { %v2899_v52 = vpop.eup %2898  ;;  %1066 = vst [vmem:[#allocation3 + $0x7] sm:$0x1] %v2897_v51  ;;  %v1082_v1 = vpack.c.bf16 %v2897_v51, %v2897_v51  ;;  %v1080_v51 = vld [vmem:[%s3996_s0 + $0x68] sm:$0x1] }
 0x7a3   :  { %v2901_v53 = vpop.eup %2900  ;;  %1067 = vst [vmem:[#allocation3 + $0x17] sm:$0x1] %v2899_v52  ;;  %v1083_v2 = vpack.c.bf16 %v2899_v52, %v2899_v52 }
 0x7a4   :  { %v2903_v3 = vpop.eup %2902  ;;  %1068 = vst [vmem:[#allocation3 + $0x27] sm:$0x1] %v2901_v53  ;;  %v1084_v57 = vpack.c.bf16 %v2901_v53, %v2901_v53  ;;  %v1098_v11 = vunpack.c.l.b16 %v1082_v1 }
 0x7a5   :  { %v2905_v58 = vpop.eup %2904  ;;  %1069 = vst [vmem:[#allocation3 + $0x37] sm:$0x1] %v2903_v3  ;;  %v1085_v59 = vpack.c.bf16 %v2903_v3, %v2903_v3  ;;  %v1099_v60 = vunpack.c.l.b16 %v1083_v2 }
 0x7a6   :  { %v2907_v61 = vpop.eup %2906  ;;  %1070 = vst [vmem:[#allocation3 + $0x47] sm:$0x1] %v2905_v58  ;;  %v1086_v62 = vpack.c.bf16 %v2905_v58, %v2905_v58  ;;  %v1100_v63 = vunpack.c.l.b16 %v1084_v57  ;;  %v1081_v57 = vld [vmem:[%s3996_s0 + $0x78] sm:$0x1] }
 0x7a7   :  { %v2909_v9 = vpop.eup %2908  ;;  %1071 = vst [vmem:[#allocation3 + $0x57] sm:$0x1] %v2907_v61  ;;  %v1087_v10 = vpack.c.bf16 %v2907_v61, %v2907_v61  ;;  %v1101_v12 = vunpack.c.l.b16 %v1085_v59  ;;  %v1106_v13 = vrot.slane %v1099_v60, 7 }
 0x7a8   :  { %v2911_v14 = vpop.eup %2910  ;;  %1072 = vst [vmem:[#allocation3 + $0x67] sm:$0x1] %v2909_v9  ;;  %v1088_v15 = vpack.c.bf16 %v2909_v9, %v2909_v9  ;;  %v1102_v16 = vunpack.c.l.b16 %v1086_v62  ;;  %v1108_v17 = vrot.slane %v1100_v63, 6 }
 0x7a9   :  { %1073 = vst [vmem:[#allocation3 + $0x77] sm:$0x1] %v2911_v14  ;;  %v1089_v18 = vpack.c.bf16 %v2911_v14, %v2911_v14  ;;  %v1103_v19 = vunpack.c.l.b16 %v1087_v10  ;;  %v1107_v20 = vsel %vm204_vm1, %v1106_v13, %v1098_v11  ;;  %v1110_v21 = vrot.slane %v1101_v12, 5 }
 0x7aa   :  { %v1104_v22 = vunpack.c.l.b16 %v1088_v15  ;;  %v1109_v23 = vsel %vm207_vm2, %v1108_v17, %v1107_v20  ;;  %v1112_v24 = vrot.slane %v1102_v16, 4 }
 0x7ab   :  { %v1105_v25 = vunpack.c.l.b16 %v1089_v18  ;;  %v1111_v26 = vsel %vm210_vm3, %v1110_v21, %v1109_v23  ;;  %v1114_v27 = vrot.slane %v1103_v19, 3 }
 0x7ac   :  { %v1113_v28 = vsel %vm213_vm4, %v1112_v24, %v1111_v26  ;;  %v1116_v29 = vrot.slane %v1104_v22, 2 }
 0x7ad   :  { %v1115_v30 = vsel %vm216_vm5, %v1114_v27, %v1113_v28  ;;  %v1118_v31 = vrot.slane %v1105_v25, 1 }
 0x7ae   :  { %v1117_v32 = vsel %vm219_vm6, %v1116_v29, %v1115_v30 }
 0x7af   :  { %v1119_v33 = vsel %vm222_vm7, %v1118_v31, %v1117_v32 }
 0x7b0   :  { %v1120_v34 = vpack.c.b16 %v1119_v33, %v1119_v33 }
 0x7b2   :  { %2630 = vmatmul.mubr.bf16.vlgmr.msra.gmra.mrb[16].mxu0 %v1120_v34 }
 0x7b3   :  { %2654 = vmatpush3.bf16.msra.mxu0 %v3400_v4  ;;  %2669 = vmatprep.mubr.msk.bf16.mxu0 %vm3057_vm0, %v3056_v0 }
 0x7b4   :  { %2655 = vmatprep.subr.bf16.mxu0 %v3056_v0 }
 0x7b7   :  { %2656 = vmatpush3.bf16.msra.mxu0 %v3409_v5 }
 0x7b8   :  { %2657 = vmatprep.subr.bf16.mxu0 %v3056_v0 }
 0x7bb   :  { %2658 = vmatpush3.bf16.msra.mxu0 %v3416_v6 }
 0x7bc   :  { %2659 = vmatprep.subr.bf16.mxu0 %v3056_v0 }
 0x7bf   :  { %2660 = vmatpush3.bf16.msra.mxu0 %v3423_v7 }
 0x7c0   :  { %2661 = vmatprep.subr.bf16.mxu0 %v3056_v0 }
 0x7c3   :  { %2662 = vmatpush3.bf16.msra.mxu0 %v3430_v8 }
 0x7c4   :  { %2663 = vmatprep.subr.bf16.mxu0 %v3056_v0 }
 0x7c7   :  { %2664 = vmatpush3.bf16.msra.mxu0 %v3437_v54 }
 0x7c8   :  { %2665 = vmatprep.subr.bf16.mxu0 %v3056_v0 }
 0x7cb   :  { %2666 = vmatpush3.bf16.msra.mxu0 %v3444_v55 }
 0x7cc   :  { %2667 = vmatprep.subr.bf16.mxu0 %v3056_v0 }
 0x7cf   :  { %2668 = vmatpush3.bf16.msra.mxu0 %v3451_v56 }
 0x7d0   :  { %2693 = vmatprep.subr.bf16.mxu0 %v3056_v0 }
 0x885   :  { %v1156_v40 = vpop.f32.mrb[16].mxu0 }
 0x886   :  { %v1163_v41 = vrot.slane %v1156_v40, 1  ;;  %v1164_v42 = vrot.slane %v1156_v40, 2  ;;  %v1165_v43 = vrot.slane %v1156_v40, 3  ;;  %v1166_v44 = vrot.slane %v1156_v40, 4  ;;  %v2631_v45 = vpop.f32.mrb[17].mxu0 }
 0x887   :  { %v1167_v47 = vrot.slane %v1156_v40, 5  ;;  %v1168_v48 = vrot.slane %v1156_v40, 6  ;;  %v1178_v49 = vadd.f32 %v1156_v40, %v1074_v35  ;;  %v1159_v50 = vpop.f32.mrb[18].mxu0  ;;  %v1169_v52 = vrot.slane %v1156_v40, 7 }
 0x888   :  { %v1179_v53 = vadd.f32 %v1163_v41, %v1075_v36  ;;  %v1180_v1 = vadd.f32 %v1164_v42, %v1076_v37  ;;  %v1181_v2 = vadd.f32 %v1165_v43, %v1077_v38  ;;  %v2632_v3 = vpop.f32.mrb[19].mxu0  ;;  %v1182_v58 = vadd.f32 %v1166_v44, %v1078_v39  ;;  %v1206_v50 = vld [vmem:[%s3996_s0 + $0x49] sm:$0x1] }
 0x889   :  { %2912 = vtanh.f32 %v1178_v49  ;;  %v1183_v59 = vadd.f32 %v1167_v47, %v1079_v46  ;;  %v1184_v60 = vadd.f32 %v1168_v48, %v1080_v51  ;;  %v1185_v61 = vadd.f32 %v1169_v52, %v1081_v57  ;;  %v1202_v46 = vld [vmem:[%s3996_s0 + $0x9] sm:$0x1]  ;;  %v1203_v47 = vld [vmem:[%s3996_s0 + $0x19] sm:$0x1] }
 0x88a   :  { %2914 = vtanh.f32 %v1179_v53  ;;  %v1204_v48 = vld [vmem:[%s3996_s0 + $0x29] sm:$0x1]  ;;  %v1205_v49 = vld [vmem:[%s3996_s0 + $0x39] sm:$0x1] }
 0x88b   :  { %2916 = vtanh.f32 %v1180_v1  ;;  %v1207_v57 = vld [vmem:[%s3996_s0 + $0x59] sm:$0x1] }
 0x88c   :  { %2918 = vtanh.f32 %v1181_v2 }
 0x88d   :  { %2920 = vtanh.f32 %v1182_v58 }
 0x88e   :  { %2922 = vtanh.f32 %v1183_v59 }
 0x88f   :  { %2924 = vtanh.f32 %v1184_v60 }
 0x890   :  { %2926 = vtanh.f32 %v1185_v61 }
 0x893   :  { %v2913_v62 = vpop.eup %2912 }
 0x894   :  { %v2915_v63 = vpop.eup %2914  ;;  %1194 = vst [vmem:[#allocation3 + $0x8] sm:$0x1] %v2913_v62  ;;  %v1210_v10 = vpack.c.bf16 %v2913_v62, %v2913_v62  ;;  %v1208_v62 = vld [vmem:[%s3996_s0 + $0x69] sm:$0x1] }
 0x895   :  { %v2917_v9 = vpop.eup %2916  ;;  %1195 = vst [vmem:[#allocation3 + $0x18] sm:$0x1] %v2915_v63  ;;  %v1211_v11 = vpack.c.bf16 %v2915_v63, %v2915_v63 }
 0x896   :  { %v2919_v12 = vpop.eup %2918  ;;  %1196 = vst [vmem:[#allocation3 + $0x28] sm:$0x1] %v2917_v9  ;;  %v1212_v13 = vpack.c.bf16 %v2917_v9, %v2917_v9  ;;  %v1226_v22 = vunpack.c.l.b16 %v1210_v10 }
 0x897   :  { %v2921_v14 = vpop.eup %2920  ;;  %1197 = vst [vmem:[#allocation3 + $0x38] sm:$0x1] %v2919_v12  ;;  %v1213_v15 = vpack.c.bf16 %v2919_v12, %v2919_v12  ;;  %v1227_v16 = vunpack.c.l.b16 %v1211_v11 }
 0x898   :  { %v2923_v17 = vpop.eup %2922  ;;  %1198 = vst [vmem:[#allocation3 + $0x48] sm:$0x1] %v2921_v14  ;;  %v1214_v18 = vpack.c.bf16 %v2921_v14, %v2921_v14  ;;  %v1228_v19 = vunpack.c.l.b16 %v1212_v13  ;;  %v1209_v13 = vld [vmem:[%s3996_s0 + $0x79] sm:$0x1] }
 0x899   :  { %v2925_v20 = vpop.eup %2924  ;;  %1199 = vst [vmem:[#allocation3 + $0x58] sm:$0x1] %v2923_v17  ;;  %v1215_v21 = vpack.c.bf16 %v2923_v17, %v2923_v17  ;;  %v1229_v23 = vunpack.c.l.b16 %v1213_v15  ;;  %v1234_v24 = vrot.slane %v1227_v16, 7 }
 0x89a   :  { %v2927_v25 = vpop.eup %2926  ;;  %1200 = vst [vmem:[#allocation3 + $0x68] sm:$0x1] %v2925_v20  ;;  %v1216_v26 = vpack.c.bf16 %v2925_v20, %v2925_v20  ;;  %v1230_v27 = vunpack.c.l.b16 %v1214_v18  ;;  %v1236_v28 = vrot.slane %v1228_v19, 6 }
 0x89b   :  { %1201 = vst [vmem:[#allocation3 + $0x78] sm:$0x1] %v2927_v25  ;;  %v1217_v29 = vpack.c.bf16 %v2927_v25, %v2927_v25  ;;  %v1231_v30 = vunpack.c.l.b16 %v1215_v21  ;;  %v1235_v31 = vsel %vm204_vm1, %v1234_v24, %v1226_v22  ;;  %v1238_v32 = vrot.slane %v1229_v23, 5 }
 0x89c   :  { %v1232_v33 = vunpack.c.l.b16 %v1216_v26  ;;  %v1237_v34 = vsel %vm207_vm2, %v1236_v28, %v1235_v31  ;;  %v1240_v35 = vrot.slane %v1230_v27, 4 }
 0x89d   :  { %v1233_v36 = vunpack.c.l.b16 %v1217_v29  ;;  %v1239_v37 = vsel %vm210_vm3, %v1238_v32, %v1237_v34  ;;  %v1242_v38 = vrot.slane %v1231_v30, 3 }
 0x89e   :  { %v1241_v39 = vsel %vm213_vm4, %v1240_v35, %v1239_v37  ;;  %v1244_v40 = vrot.slane %v1232_v33, 2 }
 0x89f   :  { %v1243_v41 = vsel %vm216_vm5, %v1242_v38, %v1241_v39  ;;  %v1246_v42 = vrot.slane %v1233_v36, 1 }
 0x8a0   :  { %v1245_v43 = vsel %vm219_vm6, %v1244_v40, %v1243_v41 }
 0x8a1   :  { %v1247_v44 = vsel %vm222_vm7, %v1246_v42, %v1245_v43 }
 0x8a2   :  { %v1248_v45 = vpack.c.b16 %v1247_v44, %v1247_v44 }
 0x8a4   :  { %2650 = vmatmul.mubr.bf16.vlgmr.msra.gmra.mrb[16].mxu1 %v1248_v45 }
 0x8a5   :  { %2674 = vmatpush3.bf16.msra.mxu1 %v3400_v4  ;;  %2689 = vmatprep.mubr.msk.bf16.mxu1 %vm3057_vm0, %v3056_v0 }
 0x8a6   :  { %2675 = vmatprep.subr.bf16.mxu1 %v3056_v0 }
 0x8a9   :  { %2676 = vmatpush3.bf16.msra.mxu1 %v3409_v5 }
 0x8aa   :  { %2677 = vmatprep.subr.bf16.mxu1 %v3056_v0 }
 0x8ad   :  { %2678 = vmatpush3.bf16.msra.mxu1 %v3416_v6 }
 0x8ae   :  { %2679 = vmatprep.subr.bf16.mxu1 %v3056_v0 }
 0x8b1   :  { %2680 = vmatpush3.bf16.msra.mxu1 %v3423_v7 }
 0x8b2   :  { %2681 = vmatprep.subr.bf16.mxu1 %v3056_v0 }
 0x8b5   :  { %2682 = vmatpush3.bf16.msra.mxu1 %v3430_v8 }
 0x8b6   :  { %2683 = vmatprep.subr.bf16.mxu1 %v3056_v0 }
 0x8b9   :  { %2684 = vmatpush3.bf16.msra.mxu1 %v3437_v54 }
 0x8ba   :  { %2685 = vmatprep.subr.bf16.mxu1 %v3056_v0 }
 0x8bd   :  { %2686 = vmatpush3.bf16.msra.mxu1 %v3444_v55 }
 0x8be   :  { %2687 = vmatprep.subr.bf16.mxu1 %v3056_v0 }
 0x8c1   :  { %2688 = vmatpush3.bf16.msra.mxu1 %v3451_v56 }
 0x8c2   :  { %2713 = vmatprep.subr.bf16.mxu1 %v3056_v0 }
 0x977   :  { %v1284_v51 = vpop.f32.mrb[16].mxu1 }
 0x978   :  { %v1291_v52 = vrot.slane %v1284_v51, 1  ;;  %v1292_v53 = vrot.slane %v1284_v51, 2  ;;  %v1293_v1 = vrot.slane %v1284_v51, 3  ;;  %v1294_v2 = vrot.slane %v1284_v51, 4  ;;  %v2651_v3 = vpop.f32.mrb[17].mxu1 }
 0x979   :  { %v1295_v58 = vrot.slane %v1284_v51, 5  ;;  %v1296_v59 = vrot.slane %v1284_v51, 6  ;;  %v1306_v60 = vadd.f32 %v1284_v51, %v1202_v46  ;;  %v1287_v61 = vpop.f32.mrb[18].mxu1  ;;  %v1297_v63 = vrot.slane %v1284_v51, 7 }
 0x97a   :  { %v1307_v9 = vadd.f32 %v1291_v52, %v1203_v47  ;;  %v1308_v10 = vadd.f32 %v1292_v53, %v1204_v48  ;;  %v1309_v11 = vadd.f32 %v1293_v1, %v1205_v49  ;;  %v2652_v12 = vpop.f32.mrb[19].mxu1  ;;  %v1310_v14 = vadd.f32 %v1294_v2, %v1206_v50 }
 0x97b   :  { %2928 = vtanh.f32 %v1306_v60  ;;  %v1311_v15 = vadd.f32 %v1295_v58, %v1207_v57  ;;  %v1312_v16 = vadd.f32 %v1296_v59, %v1208_v62  ;;  %v1313_v17 = vadd.f32 %v1297_v63, %v1209_v13  ;;  %v1335_v60 = vld [vmem:[%s3996_s0 + $0x5a] sm:$0x1] }
 0x97c   :  { %2930 = vtanh.f32 %v1307_v9 }
 0x97d   :  { %2932 = vtanh.f32 %v1308_v10  ;;  %v1336_v10 = vld [vmem:[%s3996_s0 + $0x6a] sm:$0x1] }
 0x97e   :  { %2934 = vtanh.f32 %v1309_v11 }
 0x97f   :  { %2936 = vtanh.f32 %v1310_v14 }
 0x980   :  { %2938 = vtanh.f32 %v1311_v15 }
 0x981   :  { %2940 = vtanh.f32 %v1312_v16  ;;  %v1337_v16 = vld [vmem:[%s3996_s0 + $0x7a] sm:$0x1] }
 0x982   :  { %2942 = vtanh.f32 %v1313_v17 }
 0x985   :  { %v2929_v18 = vpop.eup %2928 }
 0x986   :  { %v2931_v19 = vpop.eup %2930  ;;  %1322 = vst [vmem:[#allocation3 + $0x9] sm:$0x1] %v2929_v18  ;;  %v1338_v21 = vpack.c.bf16 %v2929_v18, %v2929_v18 }
 0x987   :  { %v2933_v20 = vpop.eup %2932  ;;  %1323 = vst [vmem:[#allocation3 + $0x19] sm:$0x1] %v2931_v19  ;;  %v1339_v22 = vpack.c.bf16 %v2931_v19, %v2931_v19 }
 0x988   :  { %v2935_v23 = vpop.eup %2934  ;;  %1324 = vst [vmem:[#allocation3 + $0x29] sm:$0x1] %v2933_v20  ;;  %v1340_v24 = vpack.c.bf16 %v2933_v20, %v2933_v20  ;;  %v1354_v33 = vunpack.c.l.b16 %v1338_v21 }
 0x989   :  { %v2937_v25 = vpop.eup %2936  ;;  %1325 = vst [vmem:[#allocation3 + $0x39] sm:$0x1] %v2935_v23  ;;  %v1341_v26 = vpack.c.bf16 %v2935_v23, %v2935_v23  ;;  %v1355_v27 = vunpack.c.l.b16 %v1339_v22 }
 0x98a   :  { %v2939_v28 = vpop.eup %2938  ;;  %1326 = vst [vmem:[#allocation3 + $0x49] sm:$0x1] %v2937_v25  ;;  %v1342_v29 = vpack.c.bf16 %v2937_v25, %v2937_v25  ;;  %v1356_v30 = vunpack.c.l.b16 %v1340_v24 }
 0x98b   :  { %v2941_v31 = vpop.eup %2940  ;;  %1327 = vst [vmem:[#allocation3 + $0x59] sm:$0x1] %v2939_v28  ;;  %v1343_v32 = vpack.c.bf16 %v2939_v28, %v2939_v28  ;;  %v1357_v34 = vunpack.c.l.b16 %v1341_v26  ;;  %v1362_v35 = vrot.slane %v1355_v27, 7 }
 0x98c   :  { %v2943_v36 = vpop.eup %2942  ;;  %1328 = vst [vmem:[#allocation3 + $0x69] sm:$0x1] %v2941_v31  ;;  %v1344_v37 = vpack.c.bf16 %v2941_v31, %v2941_v31  ;;  %v1358_v38 = vunpack.c.l.b16 %v1342_v29  ;;  %v1364_v39 = vrot.slane %v1356_v30, 6 }
 0x98d   :  { %1329 = vst [vmem:[#allocation3 + $0x79] sm:$0x1] %v2943_v36  ;;  %v1345_v40 = vpack.c.bf16 %v2943_v36, %v2943_v36  ;;  %v1359_v41 = vunpack.c.l.b16 %v1343_v32  ;;  %v1363_v42 = vsel %vm204_vm1, %v1362_v35, %v1354_v33  ;;  %v1366_v43 = vrot.slane %v1357_v34, 5 }
 0x98e   :  { %v1360_v44 = vunpack.c.l.b16 %v1344_v37  ;;  %v1365_v45 = vsel %vm207_vm2, %v1364_v39, %v1363_v42  ;;  %v1368_v46 = vrot.slane %v1358_v38, 4 }
 0x98f   :  { %v1361_v47 = vunpack.c.l.b16 %v1345_v40  ;;  %v1367_v48 = vsel %vm210_vm3, %v1366_v43, %v1365_v45  ;;  %v1370_v49 = vrot.slane %v1359_v41, 3 }
 0x990   :  { %v1369_v50 = vsel %vm213_vm4, %v1368_v46, %v1367_v48  ;;  %v1372_v51 = vrot.slane %v1360_v44, 2 }
 0x991   :  { %v1371_v52 = vsel %vm216_vm5, %v1370_v49, %v1369_v50  ;;  %v1374_v53 = vrot.slane %v1361_v47, 1 }
 0x992   :  { %v1373_v1 = vsel %vm219_vm6, %v1372_v51, %v1371_v52 }
 0x993   :  { %v1375_v2 = vsel %vm222_vm7, %v1374_v53, %v1373_v1 }
 0x994   :  { %v1376_v3 = vpack.c.b16 %v1375_v2, %v1375_v2 }
 0x996   :  { %2670 = vmatmul.mubr.bf16.vlgmr.msra.gmra.mrb[20].mxu0 %v1376_v3 }
 0x997   :  { %2694 = vmatpush3.bf16.msra.mxu0 %v3400_v4  ;;  %2709 = vmatprep.mubr.msk.bf16.mxu0 %vm3057_vm0, %v3056_v0  ;;  %v1330_v4 = vld [vmem:[%s3996_s0 + $0xa] sm:$0x1] }
 0x998   :  { %2695 = vmatprep.subr.bf16.mxu0 %v3056_v0 }
 0x99b   :  { %2696 = vmatpush3.bf16.msra.mxu0 %v3409_v5  ;;  %v1331_v5 = vld [vmem:[%s3996_s0 + $0x1a] sm:$0x1] }
 0x99c   :  { %2697 = vmatprep.subr.bf16.mxu0 %v3056_v0 }
 0x99f   :  { %2698 = vmatpush3.bf16.msra.mxu0 %v3416_v6  ;;  %v1332_v6 = vld [vmem:[%s3996_s0 + $0x2a] sm:$0x1] }
 0x9a0   :  { %2699 = vmatprep.subr.bf16.mxu0 %v3056_v0 }
 0x9a3   :  { %2700 = vmatpush3.bf16.msra.mxu0 %v3423_v7  ;;  %v1333_v7 = vld [vmem:[%s3996_s0 + $0x3a] sm:$0x1] }
 0x9a4   :  { %2701 = vmatprep.subr.bf16.mxu0 %v3056_v0 }
 0x9a7   :  { %2702 = vmatpush3.bf16.msra.mxu0 %v3430_v8  ;;  %v1334_v8 = vld [vmem:[%s3996_s0 + $0x4a] sm:$0x1] }
 0x9a8   :  { %2703 = vmatprep.subr.bf16.mxu0 %v3056_v0 }
 0x9ab   :  { %2704 = vmatpush3.bf16.msra.mxu0 %v3437_v54 }
 0x9ac   :  { %2705 = vmatprep.subr.bf16.mxu0 %v3056_v0 }
 0x9af   :  { %2706 = vmatpush3.bf16.msra.mxu0 %v3444_v55 }
 0x9b0   :  { %2707 = vmatprep.subr.bf16.mxu0 %v3056_v0 }
 0x9b3   :  { %2708 = vmatpush3.bf16.msra.mxu0 %v3451_v56 }
 0x9b4   :  { %2733 = vmatprep.subr.bf16.mxu0 %v3056_v0 }
 0xa69   :  { %v1412_v54 = vpop.f32.mrb[20].mxu0 }
 0xa6a   :  { %v1419_v55 = vrot.slane %v1412_v54, 1  ;;  %v1420_v56 = vrot.slane %v1412_v54, 2  ;;  %v1421_v57 = vrot.slane %v1412_v54, 3  ;;  %v1422_v58 = vrot.slane %v1412_v54, 4  ;;  %v2671_v59 = vpop.f32.mrb[21].mxu0 }
 0xa6b   :  { %v1423_v61 = vrot.slane %v1412_v54, 5  ;;  %v1424_v62 = vrot.slane %v1412_v54, 6  ;;  %v1434_v63 = vadd.f32 %v1412_v54, %v1330_v4  ;;  %v1415_v9 = vpop.f32.mrb[22].mxu0  ;;  %v1425_v11 = vrot.slane %v1412_v54, 7  ;;  %v3750_v54 = vld [vmem:[%s3995_s1 + $0x10] sm:$0xff]   ;;  %v3785_v59 = vld [vmem:[%s3995_s1 + $0x38] sm:$0xff]  }
 0xa6c   :  { %v1435_v12 = vadd.f32 %v1419_v55, %v1331_v5  ;;  %v1436_v13 = vadd.f32 %v1420_v56, %v1332_v6  ;;  %v1437_v14 = vadd.f32 %v1421_v57, %v1333_v7  ;;  %v2672_v15 = vpop.f32.mrb[23].mxu0  ;;  %v1438_v17 = vadd.f32 %v1422_v58, %v1334_v8  ;;  %v3734_v7 = vld [vmem:[%s3995_s1] sm:$0xff]   ;;  %v3743_v8 = vld [vmem:[%s3995_s1 + $0x8] sm:$0xff]   ;;  %v3757_v55 = vld [vmem:[%s3995_s1 + $0x18] sm:$0xff]  }
 0xa6d   :  { %2944 = vtanh.f32 %v1434_v63  ;;  %v1439_v18 = vadd.f32 %v1423_v61, %v1335_v60  ;;  %v1440_v19 = vadd.f32 %v1424_v62, %v1336_v10  ;;  %v1441_v20 = vadd.f32 %v1425_v11, %v1337_v16  ;;  %v3764_v56 = vld [vmem:[%s3995_s1 + $0x20] sm:$0xff]   ;;  %v3771_v57 = vld [vmem:[%s3995_s1 + $0x28] sm:$0xff]   ;;  %v3778_v58 = vld [vmem:[%s3995_s1 + $0x30] sm:$0xff]  }
 0xa6e   :  { %2946 = vtanh.f32 %v1435_v12  ;;  %v1458_v60 = vld [vmem:[%s3996_s0 + $0xb] sm:$0x1]  ;;  %v1459_v61 = vld [vmem:[%s3996_s0 + $0x1b] sm:$0x1] }
 0xa6f   :  { %2948 = vtanh.f32 %v1436_v13  ;;  %v1460_v62 = vld [vmem:[%s3996_s0 + $0x2b] sm:$0x1]  ;;  %v1461_v63 = vld [vmem:[%s3996_s0 + $0x3b] sm:$0x1] }
 0xa70   :  { %2950 = vtanh.f32 %v1437_v14  ;;  %v1462_v9 = vld [vmem:[%s3996_s0 + $0x4b] sm:$0x1]  ;;  %v1463_v16 = vld [vmem:[%s3996_s0 + $0x5b] sm:$0x1] }
 0xa71   :  { %2952 = vtanh.f32 %v1438_v17 }
 0xa72   :  { %2954 = vtanh.f32 %v1439_v18 }
 0xa73   :  { %2956 = vtanh.f32 %v1440_v19 }
 0xa74   :  { %2958 = vtanh.f32 %v1441_v20 }
 0xa77   :  { %v2945_v21 = vpop.eup %2944 }
 0xa78   :  { %v2947_v22 = vpop.eup %2946  ;;  %1450 = vst [vmem:[#allocation3 + $0xa] sm:$0x1] %v2945_v21  ;;  %v1466_v24 = vpack.c.bf16 %v2945_v21, %v2945_v21  ;;  %v1464_v21 = vld [vmem:[%s3996_s0 + $0x6b] sm:$0x1] }
 0xa79   :  { %v2949_v23 = vpop.eup %2948  ;;  %1451 = vst [vmem:[#allocation3 + $0x1a] sm:$0x1] %v2947_v22  ;;  %v1467_v25 = vpack.c.bf16 %v2947_v22, %v2947_v22 }
 0xa7a   :  { %v2951_v26 = vpop.eup %2950  ;;  %1452 = vst [vmem:[#allocation3 + $0x2a] sm:$0x1] %v2949_v23  ;;  %v1468_v27 = vpack.c.bf16 %v2949_v23, %v2949_v23  ;;  %v1482_v36 = vunpack.c.l.b16 %v1466_v24 }
 0xa7b   :  { %v2953_v28 = vpop.eup %2952  ;;  %1453 = vst [vmem:[#allocation3 + $0x3a] sm:$0x1] %v2951_v26  ;;  %v1469_v29 = vpack.c.bf16 %v2951_v26, %v2951_v26  ;;  %v1483_v30 = vunpack.c.l.b16 %v1467_v25 }
 0xa7c   :  { %v2955_v31 = vpop.eup %2954  ;;  %1454 = vst [vmem:[#allocation3 + $0x4a] sm:$0x1] %v2953_v28  ;;  %v1470_v32 = vpack.c.bf16 %v2953_v28, %v2953_v28  ;;  %v1484_v33 = vunpack.c.l.b16 %v1468_v27  ;;  %v1465_v27 = vld [vmem:[%s3996_s0 + $0x7b] sm:$0x1] }
 0xa7d   :  { %v2957_v34 = vpop.eup %2956  ;;  %1455 = vst [vmem:[#allocation3 + $0x5a] sm:$0x1] %v2955_v31  ;;  %v1471_v35 = vpack.c.bf16 %v2955_v31, %v2955_v31  ;;  %v1485_v37 = vunpack.c.l.b16 %v1469_v29  ;;  %v1490_v38 = vrot.slane %v1483_v30, 7 }
 0xa7e   :  { %v2959_v39 = vpop.eup %2958  ;;  %1456 = vst [vmem:[#allocation3 + $0x6a] sm:$0x1] %v2957_v34  ;;  %v1472_v40 = vpack.c.bf16 %v2957_v34, %v2957_v34  ;;  %v1486_v41 = vunpack.c.l.b16 %v1470_v32  ;;  %v1492_v42 = vrot.slane %v1484_v33, 6 }
 0xa7f   :  { %1457 = vst [vmem:[#allocation3 + $0x7a] sm:$0x1] %v2959_v39  ;;  %v1473_v43 = vpack.c.bf16 %v2959_v39, %v2959_v39  ;;  %v1487_v44 = vunpack.c.l.b16 %v1471_v35  ;;  %v1491_v45 = vsel %vm204_vm1, %v1490_v38, %v1482_v36  ;;  %v1494_v46 = vrot.slane %v1485_v37, 5 }
 0xa80   :  { %v1488_v47 = vunpack.c.l.b16 %v1472_v40  ;;  %v1493_v48 = vsel %vm207_vm2, %v1492_v42, %v1491_v45  ;;  %v1496_v49 = vrot.slane %v1486_v41, 4 }
 0xa81   :  { %v1489_v50 = vunpack.c.l.b16 %v1473_v43  ;;  %v1495_v51 = vsel %vm210_vm3, %v1494_v46, %v1493_v48  ;;  %v1498_v52 = vrot.slane %v1487_v44, 3 }
 0xa82   :  { %v1497_v53 = vsel %vm213_vm4, %v1496_v49, %v1495_v51  ;;  %v1500_v1 = vrot.slane %v1488_v47, 2 }
 0xa83   :  { %v1499_v2 = vsel %vm216_vm5, %v1498_v52, %v1497_v53  ;;  %v1502_v3 = vrot.slane %v1489_v50, 1 }
 0xa84   :  { %v1501_v4 = vsel %vm219_vm6, %v1500_v1, %v1499_v2 }
 0xa85   :  { %v1503_v5 = vsel %vm222_vm7, %v1502_v3, %v1501_v4 }
 0xa86   :  { %v1504_v6 = vpack.c.b16 %v1503_v5, %v1503_v5 }
 0xa88   :  { %2690 = vmatmul.mubr.bf16.vlgmr.msra.gmra.mrb[20].mxu1 %v1504_v6 }
 0xa89   :  { %2714 = vmatpush3.bf16.msra.mxu1 %v3734_v7  ;;  %2729 = vmatprep.mubr.msk.bf16.mxu1 %vm3057_vm0, %v3056_v0 }
 0xa8a   :  { %2715 = vmatprep.subr.bf16.mxu1 %v3056_v0 }
 0xa8d   :  { %2716 = vmatpush3.bf16.msra.mxu1 %v3743_v8 }
 0xa8e   :  { %2717 = vmatprep.subr.bf16.mxu1 %v3056_v0 }
 0xa91   :  { %2718 = vmatpush3.bf16.msra.mxu1 %v3750_v54 }
 0xa92   :  { %2719 = vmatprep.subr.bf16.mxu1 %v3056_v0 }
 0xa95   :  { %2720 = vmatpush3.bf16.msra.mxu1 %v3757_v55 }
 0xa96   :  { %2721 = vmatprep.subr.bf16.mxu1 %v3056_v0 }
 0xa99   :  { %2722 = vmatpush3.bf16.msra.mxu1 %v3764_v56 }
 0xa9a   :  { %2723 = vmatprep.subr.bf16.mxu1 %v3056_v0 }
 0xa9d   :  { %2724 = vmatpush3.bf16.msra.mxu1 %v3771_v57 }
 0xa9e   :  { %2725 = vmatprep.subr.bf16.mxu1 %v3056_v0 }
 0xaa1   :  { %2726 = vmatpush3.bf16.msra.mxu1 %v3778_v58 }
 0xaa2   :  { %2727 = vmatprep.subr.bf16.mxu1 %v3056_v0 }
 0xaa5   :  { %2728 = vmatpush3.bf16.msra.mxu1 %v3785_v59 }
 0xaa6   :  { %2753 = vmatprep.subr.bf16.mxu1 %v3056_v0 }
 0xb5b   :  { %v1540_v10 = vpop.f32.mrb[20].mxu1 }
 0xb5c   :  { %v1547_v11 = vrot.slane %v1540_v10, 1  ;;  %v1548_v12 = vrot.slane %v1540_v10, 2  ;;  %v1549_v13 = vrot.slane %v1540_v10, 3  ;;  %v1550_v14 = vrot.slane %v1540_v10, 4  ;;  %v2691_v15 = vpop.f32.mrb[21].mxu1 }
 0xb5d   :  { %v1551_v17 = vrot.slane %v1540_v10, 5  ;;  %v1552_v18 = vrot.slane %v1540_v10, 6  ;;  %v1562_v19 = vadd.f32 %v1540_v10, %v1458_v60  ;;  %v1543_v20 = vpop.f32.mrb[22].mxu1  ;;  %v1553_v22 = vrot.slane %v1540_v10, 7 }
 0xb5e   :  { %v1563_v23 = vadd.f32 %v1547_v11, %v1459_v61  ;;  %v1564_v24 = vadd.f32 %v1548_v12, %v1460_v62  ;;  %v1565_v25 = vadd.f32 %v1549_v13, %v1461_v63  ;;  %v2692_v26 = vpop.f32.mrb[23].mxu1  ;;  %v1566_v28 = vadd.f32 %v1550_v14, %v1462_v9  ;;  %v1590_v20 = vld [vmem:[%s3996_s0 + $0x4c] sm:$0x1] }
 0xb5f   :  { %2960 = vtanh.f32 %v1562_v19  ;;  %v1567_v29 = vadd.f32 %v1551_v17, %v1463_v16  ;;  %v1568_v30 = vadd.f32 %v1552_v18, %v1464_v21  ;;  %v1569_v31 = vadd.f32 %v1553_v22, %v1465_v27  ;;  %v1586_v16 = vld [vmem:[%s3996_s0 + $0xc] sm:$0x1]  ;;  %v1587_v17 = vld [vmem:[%s3996_s0 + $0x1c] sm:$0x1] }
 0xb60   :  { %2962 = vtanh.f32 %v1563_v23  ;;  %v1588_v18 = vld [vmem:[%s3996_s0 + $0x2c] sm:$0x1]  ;;  %v1589_v19 = vld [vmem:[%s3996_s0 + $0x3c] sm:$0x1] }
 0xb61   :  { %2964 = vtanh.f32 %v1564_v24  ;;  %v1591_v27 = vld [vmem:[%s3996_s0 + $0x5c] sm:$0x1] }
 0xb62   :  { %2966 = vtanh.f32 %v1565_v25 }
 0xb63   :  { %2968 = vtanh.f32 %v1566_v28 }
 0xb64   :  { %2970 = vtanh.f32 %v1567_v29 }
 0xb65   :  { %2972 = vtanh.f32 %v1568_v30 }
 0xb66   :  { %2974 = vtanh.f32 %v1569_v31 }
 0xb69   :  { %v2961_v32 = vpop.eup %2960 }
 0xb6a   :  { %v2963_v33 = vpop.eup %2962  ;;  %1578 = vst [vmem:[#allocation3 + $0xb] sm:$0x1] %v2961_v32  ;;  %v1594_v35 = vpack.c.bf16 %v2961_v32, %v2961_v32  ;;  %v1592_v32 = vld [vmem:[%s3996_s0 + $0x6c] sm:$0x1] }
 0xb6b   :  { %v2965_v34 = vpop.eup %2964  ;;  %1579 = vst [vmem:[#allocation3 + $0x1b] sm:$0x1] %v2963_v33  ;;  %v1595_v36 = vpack.c.bf16 %v2963_v33, %v2963_v33 }
 0xb6c   :  { %v2967_v37 = vpop.eup %2966  ;;  %1580 = vst [vmem:[#allocation3 + $0x2b] sm:$0x1] %v2965_v34  ;;  %v1596_v38 = vpack.c.bf16 %v2965_v34, %v2965_v34  ;;  %v1610_v47 = vunpack.c.l.b16 %v1594_v35 }
 0xb6d   :  { %v2969_v39 = vpop.eup %2968  ;;  %1581 = vst [vmem:[#allocation3 + $0x3b] sm:$0x1] %v2967_v37  ;;  %v1597_v40 = vpack.c.bf16 %v2967_v37, %v2967_v37  ;;  %v1611_v41 = vunpack.c.l.b16 %v1595_v36 }
 0xb6e   :  { %v2971_v42 = vpop.eup %2970  ;;  %1582 = vst [vmem:[#allocation3 + $0x4b] sm:$0x1] %v2969_v39  ;;  %v1598_v43 = vpack.c.bf16 %v2969_v39, %v2969_v39  ;;  %v1612_v44 = vunpack.c.l.b16 %v1596_v38  ;;  %v1593_v38 = vld [vmem:[%s3996_s0 + $0x7c] sm:$0x1] }
 0xb6f   :  { %v2973_v45 = vpop.eup %2972  ;;  %1583 = vst [vmem:[#allocation3 + $0x5b] sm:$0x1] %v2971_v42  ;;  %v1599_v46 = vpack.c.bf16 %v2971_v42, %v2971_v42  ;;  %v1613_v48 = vunpack.c.l.b16 %v1597_v40  ;;  %v1618_v49 = vrot.slane %v1611_v41, 7 }
 0xb70   :  { %v2975_v50 = vpop.eup %2974  ;;  %1584 = vst [vmem:[#allocation3 + $0x6b] sm:$0x1] %v2973_v45  ;;  %v1600_v51 = vpack.c.bf16 %v2973_v45, %v2973_v45  ;;  %v1614_v52 = vunpack.c.l.b16 %v1598_v43  ;;  %v1620_v53 = vrot.slane %v1612_v44, 6 }
 0xb71   :  { %1585 = vst [vmem:[#allocation3 + $0x7b] sm:$0x1] %v2975_v50  ;;  %v1601_v1 = vpack.c.bf16 %v2975_v50, %v2975_v50  ;;  %v1615_v2 = vunpack.c.l.b16 %v1599_v46  ;;  %v1619_v3 = vsel %vm204_vm1, %v1618_v49, %v1610_v47  ;;  %v1622_v4 = vrot.slane %v1613_v48, 5 }
 0xb72   :  { %v1616_v5 = vunpack.c.l.b16 %v1600_v51  ;;  %v1621_v6 = vsel %vm207_vm2, %v1620_v53, %v1619_v3  ;;  %v1624_v60 = vrot.slane %v1614_v52, 4 }
 0xb73   :  { %v1617_v61 = vunpack.c.l.b16 %v1601_v1  ;;  %v1623_v62 = vsel %vm210_vm3, %v1622_v4, %v1621_v6  ;;  %v1626_v63 = vrot.slane %v1615_v2, 3 }
 0xb74   :  { %v1625_v9 = vsel %vm213_vm4, %v1624_v60, %v1623_v62  ;;  %v1628_v10 = vrot.slane %v1616_v5, 2 }
 0xb75   :  { %v1627_v11 = vsel %vm216_vm5, %v1626_v63, %v1625_v9  ;;  %v1630_v12 = vrot.slane %v1617_v61, 1 }
 0xb76   :  { %v1629_v13 = vsel %vm219_vm6, %v1628_v10, %v1627_v11 }
 0xb77   :  { %v1631_v14 = vsel %vm222_vm7, %v1630_v12, %v1629_v13 }
 0xb78   :  { %v1632_v15 = vpack.c.b16 %v1631_v14, %v1631_v14 }
 0xb7a   :  { %2710 = vmatmul.mubr.bf16.vlgmr.msra.gmra.mrb[24].mxu0 %v1632_v15 }
 0xb7b   :  { %2734 = vmatpush3.bf16.msra.mxu0 %v3734_v7  ;;  %2749 = vmatprep.mubr.msk.bf16.mxu0 %vm3057_vm0, %v3056_v0 }
 0xb7c   :  { %2735 = vmatprep.subr.bf16.mxu0 %v3056_v0 }
 0xb7f   :  { %2736 = vmatpush3.bf16.msra.mxu0 %v3743_v8 }
 0xb80   :  { %2737 = vmatprep.subr.bf16.mxu0 %v3056_v0 }
 0xb83   :  { %2738 = vmatpush3.bf16.msra.mxu0 %v3750_v54 }
 0xb84   :  { %2739 = vmatprep.subr.bf16.mxu0 %v3056_v0 }
 0xb87   :  { %2740 = vmatpush3.bf16.msra.mxu0 %v3757_v55 }
 0xb88   :  { %2741 = vmatprep.subr.bf16.mxu0 %v3056_v0 }
 0xb8b   :  { %2742 = vmatpush3.bf16.msra.mxu0 %v3764_v56 }
 0xb8c   :  { %2743 = vmatprep.subr.bf16.mxu0 %v3056_v0 }
 0xb8f   :  { %2744 = vmatpush3.bf16.msra.mxu0 %v3771_v57 }
 0xb90   :  { %2745 = vmatprep.subr.bf16.mxu0 %v3056_v0 }
 0xb93   :  { %2746 = vmatpush3.bf16.msra.mxu0 %v3778_v58 }
 0xb94   :  { %2747 = vmatprep.subr.bf16.mxu0 %v3056_v0 }
 0xb97   :  { %2748 = vmatpush3.bf16.msra.mxu0 %v3785_v59 }
 0xc4d   :  { %v1668_v21 = vpop.f32.mrb[24].mxu0 }
 0xc4e   :  { %v1675_v22 = vrot.slane %v1668_v21, 1  ;;  %v1676_v23 = vrot.slane %v1668_v21, 2  ;;  %v1677_v24 = vrot.slane %v1668_v21, 3  ;;  %v1678_v25 = vrot.slane %v1668_v21, 4  ;;  %v2711_v26 = vpop.f32.mrb[25].mxu0 }
 0xc4f   :  { %v1679_v28 = vrot.slane %v1668_v21, 5  ;;  %v1680_v29 = vrot.slane %v1668_v21, 6  ;;  %v1690_v30 = vadd.f32 %v1668_v21, %v1586_v16  ;;  %v1671_v31 = vpop.f32.mrb[26].mxu0  ;;  %v1681_v33 = vrot.slane %v1668_v21, 7 }
 0xc50   :  { %v1691_v34 = vadd.f32 %v1675_v22, %v1587_v17  ;;  %v1692_v35 = vadd.f32 %v1676_v23, %v1588_v18  ;;  %v1693_v36 = vadd.f32 %v1677_v24, %v1589_v19  ;;  %v2712_v37 = vpop.f32.mrb[27].mxu0  ;;  %v1694_v39 = vadd.f32 %v1678_v25, %v1590_v20 }
 0xc51   :  { %2976 = vtanh.f32 %v1690_v30  ;;  %v1695_v40 = vadd.f32 %v1679_v28, %v1591_v27  ;;  %v1696_v41 = vadd.f32 %v1680_v29, %v1592_v32  ;;  %v1697_v42 = vadd.f32 %v1681_v33, %v1593_v38  ;;  %v1719_v29 = vld [vmem:[%s3996_s0 + $0x5d] sm:$0x1] }
 0xc52   :  { %2978 = vtanh.f32 %v1691_v34  ;;  %v1720_v34 = vld [vmem:[%s3996_s0 + $0x6d] sm:$0x1] }
 0xc53   :  { %2980 = vtanh.f32 %v1692_v35 }
 0xc54   :  { %2982 = vtanh.f32 %v1693_v36 }
 0xc55   :  { %2984 = vtanh.f32 %v1694_v39 }
 0xc56   :  { %2986 = vtanh.f32 %v1695_v40  ;;  %v1721_v40 = vld [vmem:[%s3996_s0 + $0x7d] sm:$0x1] }
 0xc57   :  { %2988 = vtanh.f32 %v1696_v41 }
 0xc58   :  { %2990 = vtanh.f32 %v1697_v42 }
 0xc5b   :  { %v2977_v43 = vpop.eup %2976 }
 0xc5c   :  { %v2979_v44 = vpop.eup %2978  ;;  %1706 = vst [vmem:[#allocation3 + $0xc] sm:$0x1] %v2977_v43  ;;  %v1722_v46 = vpack.c.bf16 %v2977_v43, %v2977_v43 }
 0xc5d   :  { %v2981_v45 = vpop.eup %2980  ;;  %1707 = vst [vmem:[#allocation3 + $0x1c] sm:$0x1] %v2979_v44  ;;  %v1723_v47 = vpack.c.bf16 %v2979_v44, %v2979_v44 }
 0xc5e   :  { %v2983_v48 = vpop.eup %2982  ;;  %1708 = vst [vmem:[#allocation3 + $0x2c] sm:$0x1] %v2981_v45  ;;  %v1724_v49 = vpack.c.bf16 %v2981_v45, %v2981_v45  ;;  %v1738_v5 = vunpack.c.l.b16 %v1722_v46 }
 0xc5f   :  { %v2985_v50 = vpop.eup %2984  ;;  %1709 = vst [vmem:[#allocation3 + $0x3c] sm:$0x1] %v2983_v48  ;;  %v1725_v51 = vpack.c.bf16 %v2983_v48, %v2983_v48  ;;  %v1739_v52 = vunpack.c.l.b16 %v1723_v47 }
 0xc60   :  { %v2987_v53 = vpop.eup %2986  ;;  %1710 = vst [vmem:[#allocation3 + $0x4c] sm:$0x1] %v2985_v50  ;;  %v1726_v1 = vpack.c.bf16 %v2985_v50, %v2985_v50  ;;  %v1740_v2 = vunpack.c.l.b16 %v1724_v49 }
 0xc61   :  { %v2989_v3 = vpop.eup %2988  ;;  %1711 = vst [vmem:[#allocation3 + $0x5c] sm:$0x1] %v2987_v53  ;;  %v1727_v4 = vpack.c.bf16 %v2987_v53, %v2987_v53  ;;  %v1741_v6 = vunpack.c.l.b16 %v1725_v51  ;;  %v1746_v60 = vrot.slane %v1739_v52, 7 }
 0xc62   :  { %v2991_v61 = vpop.eup %2990  ;;  %1712 = vst [vmem:[#allocation3 + $0x6c] sm:$0x1] %v2989_v3  ;;  %v1728_v62 = vpack.c.bf16 %v2989_v3, %v2989_v3  ;;  %v1742_v63 = vunpack.c.l.b16 %v1726_v1  ;;  %v1748_v9 = vrot.slane %v1740_v2, 6 }
 0xc63   :  { %1713 = vst [vmem:[#allocation3 + $0x7c] sm:$0x1] %v2991_v61  ;;  %v1729_v10 = vpack.c.bf16 %v2991_v61, %v2991_v61  ;;  %v1743_v11 = vunpack.c.l.b16 %v1727_v4  ;;  %v1747_v12 = vsel %vm204_vm1, %v1746_v60, %v1738_v5  ;;  %v1750_v13 = vrot.slane %v1741_v6, 5 }
 0xc64   :  { %v1744_v14 = vunpack.c.l.b16 %v1728_v62  ;;  %v1749_v15 = vsel %vm207_vm2, %v1748_v9, %v1747_v12  ;;  %v1752_v16 = vrot.slane %v1742_v63, 4 }
 0xc65   :  { %v1745_v17 = vunpack.c.l.b16 %v1729_v10  ;;  %v1751_v18 = vsel %vm210_vm3, %v1750_v13, %v1749_v15  ;;  %v1754_v19 = vrot.slane %v1743_v11, 3 }
 0xc66   :  { %v1753_v20 = vsel %vm213_vm4, %v1752_v16, %v1751_v18  ;;  %v1756_v21 = vrot.slane %v1744_v14, 2 }
 0xc67   :  { %v1755_v22 = vsel %vm216_vm5, %v1754_v19, %v1753_v20  ;;  %v1758_v23 = vrot.slane %v1745_v17, 1 }
 0xc68   :  { %v1757_v24 = vsel %vm219_vm6, %v1756_v21, %v1755_v22 }
 0xc69   :  { %v1759_v25 = vsel %vm222_vm7, %v1758_v23, %v1757_v24 }
 0xc6a   :  { %v1760_v26 = vpack.c.b16 %v1759_v25, %v1759_v25 }
 0xc6c   :  { %2730 = vmatmul.mubr.bf16.vlgmr.msra.gmra.mrb[24].mxu1 %v1760_v26 }
 0xc6d   :  { %2754 = vmatpush3.bf16.msra.mxu1 %v3734_v7  ;;  %2769 = vmatprep.mubr.msk.bf16.mxu1 %vm3057_vm0, %v3056_v0  ;;  %v1714_v7 = vld [vmem:[%s3996_s0 + $0xd] sm:$0x1] }
 0xc6e   :  { %2755 = vmatprep.subr.bf16.mxu1 %v3056_v0 }
 0xc71   :  { %2756 = vmatpush3.bf16.msra.mxu1 %v3743_v8  ;;  %v1715_v8 = vld [vmem:[%s3996_s0 + $0x1d] sm:$0x1] }
 0xc72   :  { %2757 = vmatprep.subr.bf16.mxu1 %v3056_v0 }
 0xc75   :  { %2758 = vmatpush3.bf16.msra.mxu1 %v3750_v54  ;;  %v1716_v54 = vld [vmem:[%s3996_s0 + $0x2d] sm:$0x1] }
 0xc76   :  { %2759 = vmatprep.subr.bf16.mxu1 %v3056_v0 }
 0xc79   :  { %2760 = vmatpush3.bf16.msra.mxu1 %v3757_v55  ;;  %v1717_v55 = vld [vmem:[%s3996_s0 + $0x3d] sm:$0x1] }
 0xc7a   :  { %2761 = vmatprep.subr.bf16.mxu1 %v3056_v0 }
 0xc7d   :  { %2762 = vmatpush3.bf16.msra.mxu1 %v3764_v56 }
 0xc7e   :  { %2763 = vmatprep.subr.bf16.mxu1 %v3056_v0 }
 0xc81   :  { %2764 = vmatpush3.bf16.msra.mxu1 %v3771_v57 }
 0xc82   :  { %2765 = vmatprep.subr.bf16.mxu1 %v3056_v0 }
 0xc85   :  { %2766 = vmatpush3.bf16.msra.mxu1 %v3778_v58 }
 0xc86   :  { %2767 = vmatprep.subr.bf16.mxu1 %v3056_v0  ;;  %v1718_v0 = vld [vmem:[%s3996_s0 + $0x4d] sm:$0x1] }
 0xc89   :  { %2768 = vmatpush3.bf16.msra.mxu1 %v3785_v59 }
 0xd3f   :  { %v1796_v56 = vpop.f32.mrb[24].mxu1 }
 0xd40   :  { %v1803_v57 = vrot.slane %v1796_v56, 1  ;;  %v1804_v58 = vrot.slane %v1796_v56, 2  ;;  %v1805_v59 = vrot.slane %v1796_v56, 3  ;;  %v1806_v27 = vrot.slane %v1796_v56, 4  ;;  %v2731_v28 = vpop.f32.mrb[25].mxu1 }
 0xd41   :  { %v1807_v30 = vrot.slane %v1796_v56, 5  ;;  %v1808_v31 = vrot.slane %v1796_v56, 6  ;;  %v1818_v32 = vadd.f32 %v1796_v56, %v1714_v7  ;;  %v1799_v33 = vpop.f32.mrb[26].mxu1  ;;  %v1809_v35 = vrot.slane %v1796_v56, 7  ;;  %v1845_v56 = vld [vmem:[%s3996_s0 + $0x3e] sm:$0x1] }
 0xd42   :  { %v1819_v36 = vadd.f32 %v1803_v57, %v1715_v8  ;;  %v1820_v37 = vadd.f32 %v1804_v58, %v1716_v54  ;;  %v1821_v38 = vadd.f32 %v1805_v59, %v1717_v55  ;;  %v2732_v39 = vpop.f32.mrb[27].mxu1  ;;  %v1822_v41 = vadd.f32 %v1806_v27, %v1718_v0  ;;  %v1842_v54 = vld [vmem:[%s3996_s0 + $0xe] sm:$0x1]  ;;  %v1843_v55 = vld [vmem:[%s3996_s0 + $0x1e] sm:$0x1] }
 0xd43   :  { %2992 = vtanh.f32 %v1818_v32  ;;  %v1823_v42 = vadd.f32 %v1807_v30, %v1719_v29  ;;  %v1824_v43 = vadd.f32 %v1808_v31, %v1720_v34  ;;  %v1825_v44 = vadd.f32 %v1809_v35, %v1721_v40  ;;  %v1844_v0 = vld [vmem:[%s3996_s0 + $0x2e] sm:$0x1]  ;;  %v1847_v31 = vld [vmem:[%s3996_s0 + $0x5e] sm:$0x1] }
 0xd44   :  { %2994 = vtanh.f32 %v1819_v36  ;;  %v1846_v57 = vld [vmem:[%s3996_s0 + $0x4e] sm:$0x1] }
 0xd45   :  { %2996 = vtanh.f32 %v1820_v37  ;;  %v1848_v36 = vld [vmem:[%s3996_s0 + $0x6e] sm:$0x1] }
 0xd46   :  { %2998 = vtanh.f32 %v1821_v38 }
 0xd47   :  { %3000 = vtanh.f32 %v1822_v41 }
 0xd48   :  { %3002 = vtanh.f32 %v1823_v42  ;;  %v1849_v42 = vld [vmem:[%s3996_s0 + $0x7e] sm:$0x1] }
 0xd49   :  { %3004 = vtanh.f32 %v1824_v43 }
 0xd4a   :  { %3006 = vtanh.f32 %v1825_v44 }
 0xd4d   :  { %v2993_v45 = vpop.eup %2992 }
 0xd4e   :  { %v2995_v46 = vpop.eup %2994  ;;  %1834 = vst [vmem:[#allocation3 + $0xd] sm:$0x1] %v2993_v45  ;;  %v1850_v48 = vpack.c.bf16 %v2993_v45, %v2993_v45 }
 0xd4f   :  { %v2997_v47 = vpop.eup %2996  ;;  %1835 = vst [vmem:[#allocation3 + $0x1d] sm:$0x1] %v2995_v46  ;;  %v1851_v49 = vpack.c.bf16 %v2995_v46, %v2995_v46 }
 0xd50   :  { %v2999_v50 = vpop.eup %2998  ;;  %1836 = vst [vmem:[#allocation3 + $0x2d] sm:$0x1] %v2997_v47  ;;  %v1852_v51 = vpack.c.bf16 %v2997_v47, %v2997_v47  ;;  %v1866_v60 = vunpack.c.l.b16 %v1850_v48 }
 0xd51   :  { %v3001_v52 = vpop.eup %3000  ;;  %1837 = vst [vmem:[#allocation3 + $0x3d] sm:$0x1] %v2999_v50  ;;  %v1853_v53 = vpack.c.bf16 %v2999_v50, %v2999_v50  ;;  %v1867_v1 = vunpack.c.l.b16 %v1851_v49 }
 0xd52   :  { %v3003_v2 = vpop.eup %3002  ;;  %1838 = vst [vmem:[#allocation3 + $0x4d] sm:$0x1] %v3001_v52  ;;  %v1854_v3 = vpack.c.bf16 %v3001_v52, %v3001_v52  ;;  %v1868_v4 = vunpack.c.l.b16 %v1852_v51 }
 0xd53   :  { %v3005_v5 = vpop.eup %3004  ;;  %1839 = vst [vmem:[#allocation3 + $0x5d] sm:$0x1] %v3003_v2  ;;  %v1855_v6 = vpack.c.bf16 %v3003_v2, %v3003_v2  ;;  %v1869_v61 = vunpack.c.l.b16 %v1853_v53  ;;  %v1874_v62 = vrot.slane %v1867_v1, 7 }
 0xd54   :  { %v3007_v63 = vpop.eup %3006  ;;  %1840 = vst [vmem:[#allocation3 + $0x6d] sm:$0x1] %v3005_v5  ;;  %v1856_v9 = vpack.c.bf16 %v3005_v5, %v3005_v5  ;;  %v1870_v10 = vunpack.c.l.b16 %v1854_v3  ;;  %v1876_v11 = vrot.slane %v1868_v4, 6 }
 0xd55   :  { %1841 = vst [vmem:[#allocation3 + $0x7d] sm:$0x1] %v3007_v63  ;;  %v1857_v12 = vpack.c.bf16 %v3007_v63, %v3007_v63  ;;  %v1871_v13 = vunpack.c.l.b16 %v1855_v6  ;;  %v1875_v14 = vsel %vm204_vm1, %v1874_v62, %v1866_v60  ;;  %v1878_v15 = vrot.slane %v1869_v61, 5 }
 0xd56   :  { %v1872_v16 = vunpack.c.l.b16 %v1856_v9  ;;  %v1877_v17 = vsel %vm207_vm2, %v1876_v11, %v1875_v14  ;;  %v1880_v18 = vrot.slane %v1870_v10, 4 }
 0xd57   :  { %v1873_v19 = vunpack.c.l.b16 %v1857_v12  ;;  %v1879_v20 = vsel %vm210_vm3, %v1878_v15, %v1877_v17  ;;  %v1882_v21 = vrot.slane %v1871_v13, 3 }
 0xd58   :  { %v1881_v22 = vsel %vm213_vm4, %v1880_v18, %v1879_v20  ;;  %v1884_v23 = vrot.slane %v1872_v16, 2 }
 0xd59   :  { %v1883_v24 = vsel %vm216_vm5, %v1882_v21, %v1881_v22  ;;  %v1886_v25 = vrot.slane %v1873_v19, 1 }
 0xd5a   :  { %v1885_v26 = vsel %vm219_vm6, %v1884_v23, %v1883_v24 }
 0xd5b   :  { %v1887_v7 = vsel %vm222_vm7, %v1886_v25, %v1885_v26 }
 0xd5c   :  { %v1888_v8 = vpack.c.b16 %v1887_v7, %v1887_v7 }
 0xd5e   :  { %2750 = vmatmul.mubr.bf16.vlgmr.msra.gmra.mrb[28].mxu0 %v1888_v8 }
 0xe31   :  { %v1924_v58 = vpop.f32.mrb[28].mxu0 }
 0xe32   :  { %v1931_v59 = vrot.slane %v1924_v58, 1  ;;  %v1932_v27 = vrot.slane %v1924_v58, 2  ;;  %v1933_v28 = vrot.slane %v1924_v58, 3  ;;  %v1934_v29 = vrot.slane %v1924_v58, 4  ;;  %v2751_v30 = vpop.f32.mrb[29].mxu0 }
 0xe33   :  { %v1935_v32 = vrot.slane %v1924_v58, 5  ;;  %v1936_v33 = vrot.slane %v1924_v58, 6  ;;  %v1946_v34 = vadd.f32 %v1924_v58, %v1842_v54  ;;  %v1927_v35 = vpop.f32.mrb[30].mxu0  ;;  %v1937_v37 = vrot.slane %v1924_v58, 7  ;;  %v1973_v58 = vld [vmem:[%s3996_s0 + $0x3f] sm:$0x1] }
 0xe34   :  { %v1947_v38 = vadd.f32 %v1931_v59, %v1843_v55  ;;  %v1948_v39 = vadd.f32 %v1932_v27, %v1844_v0  ;;  %v1949_v40 = vadd.f32 %v1933_v28, %v1845_v56  ;;  %v2752_v41 = vpop.f32.mrb[31].mxu0  ;;  %v1950_v43 = vadd.f32 %v1934_v29, %v1846_v57  ;;  %v1970_v0 = vld [vmem:[%s3996_s0 + $0xf] sm:$0x1]  ;;  %v1971_v56 = vld [vmem:[%s3996_s0 + $0x1f] sm:$0x1] }
 0xe35   :  { %3008 = vtanh.f32 %v1946_v34  ;;  %v1951_v44 = vadd.f32 %v1935_v32, %v1847_v31  ;;  %v1952_v45 = vadd.f32 %v1936_v33, %v1848_v36  ;;  %v1953_v46 = vadd.f32 %v1937_v37, %v1849_v42  ;;  %v1972_v57 = vld [vmem:[%s3996_s0 + $0x2f] sm:$0x1]  ;;  %v1975_v33 = vld [vmem:[%s3996_s0 + $0x5f] sm:$0x1] }
 0xe36   :  { %3010 = vtanh.f32 %v1947_v38  ;;  %v1974_v59 = vld [vmem:[%s3996_s0 + $0x4f] sm:$0x1] }
 0xe37   :  { %3012 = vtanh.f32 %v1948_v39  ;;  %v1976_v38 = vld [vmem:[%s3996_s0 + $0x6f] sm:$0x1] }
 0xe38   :  { %3014 = vtanh.f32 %v1949_v40 }
 0xe39   :  { %3016 = vtanh.f32 %v1950_v43 }
 0xe3a   :  { %3018 = vtanh.f32 %v1951_v44  ;;  %v1977_v44 = vld [vmem:[%s3996_s0 + $0x7f] sm:$0x1] }
 0xe3b   :  { %3020 = vtanh.f32 %v1952_v45 }
 0xe3c   :  { %3022 = vtanh.f32 %v1953_v46 }
 0xe3f   :  { %v3009_v47 = vpop.eup %3008 }
 0xe40   :  { %v3011_v48 = vpop.eup %3010  ;;  %1962 = vst [vmem:[#allocation3 + $0xe] sm:$0x1] %v3009_v47  ;;  %v1978_v50 = vpack.c.bf16 %v3009_v47, %v3009_v47 }
 0xe41   :  { %v3013_v49 = vpop.eup %3012  ;;  %1963 = vst [vmem:[#allocation3 + $0x1e] sm:$0x1] %v3011_v48  ;;  %v1979_v51 = vpack.c.bf16 %v3011_v48, %v3011_v48 }
 0xe42   :  { %v3015_v52 = vpop.eup %3014  ;;  %1964 = vst [vmem:[#allocation3 + $0x2e] sm:$0x1] %v3013_v49  ;;  %v1980_v53 = vpack.c.bf16 %v3013_v49, %v3013_v49  ;;  %v1994_v62 = vunpack.c.l.b16 %v1978_v50 }
 0xe43   :  { %v3017_v1 = vpop.eup %3016  ;;  %1965 = vst [vmem:[#allocation3 + $0x3e] sm:$0x1] %v3015_v52  ;;  %v1981_v2 = vpack.c.bf16 %v3015_v52, %v3015_v52  ;;  %v1995_v3 = vunpack.c.l.b16 %v1979_v51 }
 0xe44   :  { %v3019_v4 = vpop.eup %3018  ;;  %1966 = vst [vmem:[#allocation3 + $0x4e] sm:$0x1] %v3017_v1  ;;  %v1982_v5 = vpack.c.bf16 %v3017_v1, %v3017_v1  ;;  %v1996_v6 = vunpack.c.l.b16 %v1980_v53 }
 0xe45   :  { %v3021_v60 = vpop.eup %3020  ;;  %1967 = vst [vmem:[#allocation3 + $0x5e] sm:$0x1] %v3019_v4  ;;  %v1983_v61 = vpack.c.bf16 %v3019_v4, %v3019_v4  ;;  %v1997_v63 = vunpack.c.l.b16 %v1981_v2  ;;  %v2002_v9 = vrot.slane %v1995_v3, 7  ;;  %v2122_v4 = vld [vmem:[#allocation3] sm:$0xff] }
 0xe46   :  { %v3023_v10 = vpop.eup %3022  ;;  %1968 = vst [vmem:[#allocation3 + $0x6e] sm:$0x1] %v3021_v60  ;;  %v1984_v11 = vpack.c.bf16 %v3021_v60, %v3021_v60  ;;  %v1998_v12 = vunpack.c.l.b16 %v1982_v5  ;;  %v2004_v13 = vrot.slane %v1996_v6, 6  ;;  %v2124_v6 = vld [vmem:[#allocation3 + $0x10] sm:$0xff] }
 0xe47   :  { %1969 = vst [vmem:[#allocation3 + $0x7e] sm:$0x1] %v3023_v10  ;;  %v1985_v14 = vpack.c.bf16 %v3023_v10, %v3023_v10  ;;  %v1999_v15 = vunpack.c.l.b16 %v1983_v61  ;;  %v2003_v16 = vsel %vm204_vm1, %v2002_v9, %v1994_v62  ;;  %v2006_v17 = vrot.slane %v1997_v63, 5  ;;  %v2126_v62 = vld [vmem:[#allocation3 + $0x20] sm:$0xff]  ;;  %v2128_v10 = vld [vmem:[#allocation3 + $0x30] sm:$0xff] }
 0xe48   :  { %v2000_v18 = vunpack.c.l.b16 %v1984_v11  ;;  %v2005_v19 = vsel %vm207_vm2, %v2004_v13, %v2003_v16  ;;  %v2008_v20 = vrot.slane %v1998_v12, 4  ;;  %v2130_v13 = vld [vmem:[#allocation3 + $0x40] sm:$0xff]  ;;  %v2132_v16 = vld [vmem:[#allocation3 + $0x50] sm:$0xff] }
 0xe49   :  { %v2001_v21 = vunpack.c.l.b16 %v1985_v14  ;;  %v2007_v22 = vsel %vm210_vm3, %v2006_v17, %v2005_v19  ;;  %v2010_v23 = vrot.slane %v1999_v15, 3  ;;  %v2134_v19 = vld [vmem:[#allocation3 + $0x60] sm:$0xff] }
 0xe4a   :  { %v2009_v24 = vsel %vm213_vm4, %v2008_v20, %v2007_v22  ;;  %v2012_v25 = vrot.slane %v2000_v18, 2  ;;  %v2136_v22 = vld [vmem:[#allocation3 + $0x70] sm:$0xff] }
 0xe4b   :  { %v2011_v26 = vsel %vm216_vm5, %v2010_v23, %v2009_v24  ;;  %v2014_v7 = vrot.slane %v2001_v21, 1 }
 0xe4c   :  { %v2013_v8 = vsel %vm219_vm6, %v2012_v25, %v2011_v26 }
 0xe4d   :  { %v2015_v54 = vsel %vm222_vm7, %v2014_v7, %v2013_v8 }
 0xe4e   :  { %v2016_v55 = vpack.c.b16 %v2015_v54, %v2015_v54 }
 0xe50   :  { %2770 = vmatmul.mubr.bf16.vlgmr.msra.gmra.mrb[28].mxu1 %v2016_v55 }
 0xf23   :  { %v2052_v27 = vpop.f32.mrb[28].mxu1 }
 0xf24   :  { %v2059_v28 = vrot.slane %v2052_v27, 1  ;;  %v2060_v29 = vrot.slane %v2052_v27, 2  ;;  %v2061_v30 = vrot.slane %v2052_v27, 3  ;;  %v2062_v31 = vrot.slane %v2052_v27, 4  ;;  %v2771_v32 = vpop.f32.mrb[29].mxu1 }
 0xf25   :  { %v2063_v34 = vrot.slane %v2052_v27, 5  ;;  %v2064_v35 = vrot.slane %v2052_v27, 6  ;;  %v2074_v36 = vadd.f32 %v2052_v27, %v1970_v0  ;;  %v2055_v37 = vpop.f32.mrb[30].mxu1  ;;  %v2065_v39 = vrot.slane %v2052_v27, 7 }
 0xf26   :  { %v2075_v40 = vadd.f32 %v2059_v28, %v1971_v56  ;;  %v2076_v41 = vadd.f32 %v2060_v29, %v1972_v57  ;;  %v2077_v42 = vadd.f32 %v2061_v30, %v1973_v58  ;;  %v2772_v43 = vpop.f32.mrb[31].mxu1  ;;  %v2078_v45 = vadd.f32 %v2062_v31, %v1974_v59 }
 0xf27   :  { %3024 = vtanh.f32 %v2074_v36  ;;  %v2079_v46 = vadd.f32 %v2063_v34, %v1975_v33  ;;  %v2080_v47 = vadd.f32 %v2064_v35, %v1976_v38  ;;  %v2081_v48 = vadd.f32 %v2065_v39, %v1977_v44 }
 0xf28   :  { %3026 = vtanh.f32 %v2075_v40 }
 0xf29   :  { %3028 = vtanh.f32 %v2076_v41 }
 0xf2a   :  { %3030 = vtanh.f32 %v2077_v42 }
 0xf2b   :  { %3032 = vtanh.f32 %v2078_v45 }
 0xf2c   :  { %3034 = vtanh.f32 %v2079_v46 }
 0xf2d   :  { %3036 = vtanh.f32 %v2080_v47 }
 0xf2e   :  { %3038 = vtanh.f32 %v2081_v48 }
 0xf31   :  { %v3025_v49 = vpop.eup %3024 }
 0xf32   :  { %v3027_v50 = vpop.eup %3026  ;;  %2090 = vst [vmem:[#allocation3 + $0xf] sm:$0x1] %v3025_v49 }
 0xf33   :  { %v3029_v51 = vpop.eup %3028  ;;  %2091 = vst [vmem:[#allocation3 + $0x1f] sm:$0x1] %v3027_v50 }
 0xf34   :  { %v3031_v52 = vpop.eup %3030  ;;  %2092 = vst [vmem:[#allocation3 + $0x2f] sm:$0x1] %v3029_v51 }
 0xf35   :  { %v3033_v53 = vpop.eup %3032  ;;  %2093 = vst [vmem:[#allocation3 + $0x3f] sm:$0x1] %v3031_v52 }
 0xf36   :  { %v3035_v1 = vpop.eup %3034  ;;  %2094 = vst [vmem:[#allocation3 + $0x4f] sm:$0x1] %v3033_v53 }
 0xf37   :  { %v3037_v2 = vpop.eup %3036  ;;  %2095 = vst [vmem:[#allocation3 + $0x5f] sm:$0x1] %v3035_v1 }
 0xf38   :  { %v3039_v3 = vpop.eup %3038  ;;  %2096 = vst [vmem:[#allocation3 + $0x6f] sm:$0x1] %v3037_v2 }
 0xf39   :  { %2097 = vst [vmem:[#allocation3 + $0x7f] sm:$0x1] %v3039_v3  ;;  %v2123_v5 = vld [vmem:[#allocation3 + $0x8] sm:$0xff] }
 0xf3a   :  { %v2125_v60 = vld [vmem:[#allocation3 + $0x18] sm:$0xff]  ;;  %v2265_v61 = vpack.c.bf16 %v2123_v5, %v2122_v4 }
 0xf3b   :  { %v2127_v63 = vld [vmem:[#allocation3 + $0x28] sm:$0xff]  ;;  %v2270_v9 = vpack.c.bf16 %v2125_v60, %v2124_v6 }
 0xf3c   :  { %v2129_v11 = vld [vmem:[#allocation3 + $0x38] sm:$0xff]  ;;  %2266 = vst [vmem:[%s3997_s2] sm:$0xff] %v2265_v61   ;;  %v2275_v12 = vpack.c.bf16 %v2127_v63, %v2126_v62 }
 0xf3d   :  { %v2131_v14 = vld [vmem:[#allocation3 + $0x48] sm:$0xff]  ;;  %2302 = vst [vmem:[%s3997_s2 + $0x8] sm:$0xff] %v2270_v9   ;;  %v2280_v15 = vpack.c.bf16 %v2129_v11, %v2128_v10 }
 0xf3e   :  { %v2133_v17 = vld [vmem:[#allocation3 + $0x58] sm:$0xff]  ;;  %2303 = vst [vmem:[%s3997_s2 + $0x10] sm:$0xff] %v2275_v12   ;;  %v2285_v18 = vpack.c.bf16 %v2131_v14, %v2130_v13 }
 0xf3f   :  { %v2135_v20 = vld [vmem:[#allocation3 + $0x68] sm:$0xff]  ;;  %2304 = vst [vmem:[%s3997_s2 + $0x18] sm:$0xff] %v2280_v15   ;;  %v2290_v21 = vpack.c.bf16 %v2133_v17, %v2132_v16 }
 0xf40   :  { %v2137_v23 = vld [vmem:[#allocation3 + $0x78] sm:$0xff]  ;;  %2305 = vst [vmem:[%s3997_s2 + $0x20] sm:$0xff] %v2285_v18   ;;  %v2295_v24 = vpack.c.bf16 %v2135_v20, %v2134_v19 }
 0xf41   :  { %2306 = vst [vmem:[%s3997_s2 + $0x28] sm:$0xff] %v2290_v21   ;;  %v2300_v25 = vpack.c.bf16 %v2137_v23, %v2136_v22 }
 0xf42   :  { %2307 = vst [vmem:[%s3997_s2 + $0x30] sm:$0xff] %v2295_v24  }
 0xf43   :  { %2308 = vst [vmem:[%s3997_s2 + $0x38] sm:$0xff] %v2300_v25  }

</bundles_post_ra>
